<compile_context>
chip_gen: v6e
topology: v6e:2x2x1
jax: 0.10.0
libtpu: 0.0.40
codegen_flags: <defaults>
</compile_context>

<pallas_src>
import functools
import math

import jax
import jax.numpy as jnp
from jax.experimental import pallas as pl
from jax.experimental.pallas import tpu as pltpu

LN_EPS = 1e-6  # CAE uses norm_layer = partial(nn.LayerNorm, eps=1e-6)

# Row order inside the packed (12, C) vector bundle.
_VEC_C_ORDER = ('n1q_w', 'n1q_b', 'n1k_w', 'n1k_b', 'n1v_w', 'n1v_b',
                'n2_w', 'n2_b', 'proj_b', 'g1', 'g2', 'fc2_b')
# Kernel parameter order (after the 4 activation inputs).
_PARAM_ORDER = ('wq', 'wk', 'wv', 'wproj', 'fc1_w', 'fc2_w',
                'vec_c', 'vec_d', 'fc1_b')


# ----------------------------- in-kernel helpers -----------------------------

def _layer_norm(x, w, b):
    # f32 statistics, biased variance (matches torch.nn.LayerNorm)
    mean = jnp.mean(x, axis=-1, keepdims=True)
    xc = x - mean
    var = jnp.mean(xc * xc, axis=-1, keepdims=True)
    return xc * jax.lax.rsqrt(var + LN_EPS) * w + b


def _gelu(x):
    # TODO(synk): torch nn.GELU default is the exact erf GELU; tanh approximation used here.
    c = math.sqrt(2.0 / math.pi)
    return 0.5 * x * (1.0 + jnp.tanh(c * (x + 0.044715 * x * x * x)))


# ------------------------------- Pallas kernel -------------------------------

def regressor_block_kernel(
        num_heads,
        # activations (per grid step)
        xq_ref, posq_ref, xkv_ref, posk_ref,
        # bf16 (in, out)-layout matmul weights; q-scale folded into wq / q_b
        wq, wk, wv, wproj, fc1_w, fc2_w,
        # packed small vectors
        vec_c, vec_d, fc1_b,
        # output
        o_ref,
        # VMEM scratch: cached head-major K/V for the current batch
        k_sc, v_sc):
    TQ, C = xq_ref.shape
    Nk = xkv_ref.shape[0]
    Dall = wq.shape[1]
    H = num_heads
    Dh = Dall // H
    f32 = jnp.float32
    bf16 = jnp.bfloat16

    # Unpack the stacked small vectors (all kept 2-D (1, X) for broadcasting).
    vc = vec_c[...]                                   # (12, C) f32
    vd = vec_d[...]                                   # (2, Dall) f32
    (n1q_w, n1q_b, n1k_w, n1k_b, n1v_w, n1v_b,
     n2_w, n2_b, proj_b, g1, g2, fc2_b) = [vc[i:i + 1, :] for i in range(12)]
    q_b = vd[0:1, :]
    v_b = vd[1:2, :]

    # ---- K/V path: compute once per batch (qi == 0), cache head-major bf16 ----
    @pl.when(pl.program_id(1) == 0)
    def _():
        xkv = xkv_ref[...].astype(f32)
        k_in = _layer_norm(xkv + posk_ref[...].astype(f32), n1k_w, n1k_b)
        v_in = _layer_norm(xkv, n1v_w, n1v_b)
        k = jnp.dot(k_in.astype(bf16), wk[...], preferred_element_type=f32)        # k bias == 0
        v = jnp.dot(v_in.astype(bf16), wv[...], preferred_element_type=f32) + v_b
        k_sc[...] = jnp.swapaxes(k.reshape(Nk, H, Dh), 0, 1).astype(bf16)           # (H, Nk, Dh)
        v_sc[...] = jnp.swapaxes(v.reshape(Nk, H, Dh), 0, 1).astype(bf16)

    # ---- Q path + attention for this query tile ----
    xq = xq_ref[...].astype(f32)
    q_in = _layer_norm(xq + posq_ref[...].astype(f32), n1q_w, n1q_b)
    q = jnp.dot(q_in.astype(bf16), wq[...], preferred_element_type=f32) + q_b       # scale folded in

    qh = q.reshape(TQ, H, Dh).astype(bf16)
    kh = k_sc[...]                                                                   # (H, Nk, Dh) bf16
    vh = v_sc[...]

    s = jnp.einsum('qhd,hkd->hqk', qh, kh, preferred_element_type=f32)               # (H, TQ, Nk)
    s = s - jnp.max(s, axis=-1, keepdims=True)
    p = jnp.exp(s)
    p = p * pl.reciprocal(jnp.sum(p, axis=-1, keepdims=True), approx=True)
    attn = jnp.einsum('hqk,hkd->qhd', p.astype(bf16), vh,
                      preferred_element_type=f32)                                    # (TQ, H, Dh)
    attn = attn.reshape(TQ, Dall)
    attn = jnp.dot(attn.astype(bf16), wproj[...],
                   preferred_element_type=f32) + proj_b

    # residual + gamma_1 (f32), then norm2_cross
    x = xq + g1 * attn
    x = _layer_norm(x, n2_w, n2_b)

    # ---- MLP branch (fc1 -> GELU -> fc2), bf16 matmuls, f32 elementwise ----
    h = jnp.dot(x.astype(bf16), fc1_w[...], preferred_element_type=f32) + fc1_b[...]
    h = _gelu(h)
    mlp = jnp.dot(h.astype(bf16), fc2_w[...], preferred_element_type=f32) + fc2_b
    x = x + g2 * mlp

    o_ref[...] = x.astype(o_ref.dtype)


# --------------------------------- wrapper ------------------------------------

def _vmem_limit_bytes():
    """Generation-aware VMEM budget with headroom below physical capacity
    (~52 MiB on v7x's 64 MiB, ~112 MiB on v5e/v6e's 128 MiB)."""
    try:
        cap = int(pltpu.get_tpu_info().vmem_capacity_bytes)
    except Exception:
        cap = 64 * 1024 * 1024                      # conservative fallback, safe on all gens
    return int(min(cap - 12 * 1024 * 1024, (cap * 7) // 8))


def regressor_block_forward(kparams, x_q, x_kv, pos_q, pos_k, *, num_heads,
                            q_tile=256, single_buffer_weights=True):
    # NOTE: q_tile=128 is preferable on v5e (4x128^2 MXU, smaller scoped-VMEM default).
    B, Nq, C = x_q.shape
    Nk = x_kv.shape[1]
    Dall = kparams['wq'].shape[1]
    Dh = Dall // num_heads
    Hm = kparams['fc1_w'].shape[1]

    TQ = Nq if Nq <= q_tile else q_tile
    assert Nq % TQ == 0, "Nq must be divisible by the query tile"
    grid = (B, Nq // TQ)                            # batch "parallel", q tiles "arbitrary"

    param_args = tuple(kparams[k] for k in _PARAM_ORDER)

    act_specs = [
        pl.BlockSpec((pl.Squeezed(), TQ, C), lambda b, qi: (b, qi, 0)),   # x_q tile
        pl.BlockSpec((pl.Squeezed(), TQ, C), lambda b, qi: (0, qi, 0)),   # pos_q (batch bcast)
        pl.BlockSpec((pl.Squeezed(), Nk, C), lambda b, qi: (b, 0, 0)),    # x_kv (full per batch)
        pl.BlockSpec((pl.Squeezed(), Nk, C), lambda b, qi: (0, 0, 0)),    # pos_k (batch bcast)
    ]

    # VMEM-resident weights: full-extent blocks, constant index_map; single-buffered
    # (double-buffering a constant block only wastes VMEM).
    def w_spec(p):
        if single_buffer_weights:
            return pl.BlockSpec(p.shape, lambda b, qi: (0, 0),
                                pipeline_mode=pl.Buffered(1))
        return pl.BlockSpec(p.shape, lambda b, qi: (0, 0))

    w_specs = [w_spec(p) for p in param_args]
    out_spec = pl.BlockSpec((pl.Squeezed(), TQ, C), lambda b, qi: (b, qi, 0))

    # Cached head-major K/V for the current batch (written at qi == 0).
    scratch = [pltpu.VMEM((num_heads, Nk, Dh), jnp.bfloat16),
               pltpu.VMEM((num_heads, Nk, Dh), jnp.bfloat16)]

    # Advisory cost estimate (weights DMA'd once, not per batch).
    flops = B * (2 * Nq * C * Dall + 4 * Nk * C * Dall + 4 * Nq * Nk * Dall
                 + 2 * Nq * Dall * C + 4 * Nq * C * Hm)
    transcendentals = B * (num_heads * Nq * Nk + Nq * Hm)
    weight_bytes = sum(int(p.size) * p.dtype.itemsize for p in param_args)
    act_bytes = 4 * (2 * B * Nq * C + Nq * C + B * Nk * C + Nk * C)
    cost = pl.CostEstimate(flops=int(flops),
                           transcendentals=int(transcendentals),
                           bytes_accessed=int(act_bytes + weight_bytes))

    return pl.pallas_call(
        functools.partial(regressor_block_kernel, num_heads),
        grid=grid,
        in_specs=act_specs + w_specs,
        out_specs=out_spec,
        out_shape=jax.ShapeDtypeStruct((B, Nq, C), x_q.dtype),
        scratch_shapes=scratch,
        compiler_params=pltpu.CompilerParams(
            dimension_semantics=("parallel", "arbitrary"),   # batch across cores; q tiles carry K/V cache
            vmem_limit_bytes=_vmem_limit_bytes()),
        cost_estimate=cost,
    )(x_q, pos_q, x_kv, pos_k, *param_args)


# --------------------------- parameters (raw + kernel) -------------------------

def init_raw_params(key, *, dim, num_heads, mlp_ratio=4.0, qkv_bias=True,
                    init_values=0.1, attn_head_dim=None, init_std=0.02):
    """f32 parameters; matmul weights in (in, out) layout, vectors 1-D."""
    C = dim
    Dh = attn_head_dim if attn_head_dim is not None else C // num_heads
    Dall = Dh * num_heads
    Hm = int(C * mlp_ratio)
    ks = jax.random.split(key, 10)

    def tn(k, shape):
        return jax.random.truncated_normal(k, -2.0, 2.0, shape, jnp.float32) * init_std

    gamma_val = init_values if (init_values is not None and init_values > 0) else 1.0
    ones_c = jnp.ones((C,), jnp.float32)
    zeros_c = jnp.zeros((C,), jnp.float32)

    return dict(
        n1q_w=ones_c, n1q_b=zeros_c,
        n1k_w=ones_c, n1k_b=zeros_c,
        n1v_w=ones_c, n1v_b=zeros_c,
        wq=tn(ks[0], (C, Dall)), wk=tn(ks[1], (C, Dall)), wv=tn(ks[2], (C, Dall)),
        q_b=tn(ks[3], (Dall,)) if qkv_bias else jnp.zeros((Dall,), jnp.float32),
        v_b=tn(ks[4], (Dall,)) if qkv_bias else jnp.zeros((Dall,), jnp.float32),
        wproj=tn(ks[5], (Dall, C)), proj_b=tn(ks[6], (C,)),
        g1=gamma_val * ones_c,
        n2_w=ones_c, n2_b=zeros_c,
        fc1_w=tn(ks[7], (C, Hm)), fc1_b=tn(ks[8], (Hm,)),
        fc2_w=tn(ks[9], (Hm, C)), fc2_b=zeros_c,
        g2=gamma_val * ones_c,
    )


def prepare_kernel_params(raw, num_heads):
    """bf16 matmul weights (q-scale folded into wq / q_bias); small vectors packed
    into three stacked f32 arrays to minimize BlockSpec / DMA / padding overhead."""
    Dall = raw['wq'].shape[1]
    scale = (Dall // num_heads) ** -0.5
    f32, bf16 = jnp.float32, jnp.bfloat16

    vec_c = jnp.stack([raw[name] for name in _VEC_C_ORDER]).astype(f32)     # (12, C)
    vec_d = jnp.stack([raw['q_b'] * scale, raw['v_b']]).astype(f32)         # (2, Dall)

    return dict(
        wq=(raw['wq'] * scale).astype(bf16),
        wk=raw['wk'].astype(bf16),
        wv=raw['wv'].astype(bf16),
        wproj=raw['wproj'].astype(bf16),
        fc1_w=raw['fc1_w'].astype(bf16),
        fc2_w=raw['fc2_w'].astype(bf16),
        vec_c=vec_c,
        vec_d=vec_d,
        fc1_b=raw['fc1_b'].reshape(1, -1).astype(f32),
    )


# ------------------------------ pure-JAX reference -----------------------------

def regressor_block_ref(raw, x_q, x_kv, pos_q, pos_k, num_heads):
    def ln(x, w, b):
        m = jnp.mean(x, -1, keepdims=True)
        v = jnp.mean((x - m) ** 2, -1, keepdims=True)
        return (x - m) * jax.lax.rsqrt(v + LN_EPS) * w + b

    B, Nq, C = x_q.shape
    Nk = x_kv.shape[1]
    Dall = raw['wq'].shape[1]
    Dh = Dall // num_heads
    scale = Dh ** -0.5

    q_in = ln(x_q + pos_q, raw['n1q_w'], raw['n1q_b'])
    k_in = ln(x_kv + pos_k, raw['n1k_w'], raw['n1k_b'])
    v_in = ln(x_kv, raw['n1v_w'], raw['n1v_b'])

    q = (q_in @ raw['wq'] + raw['q_b']) * scale
    k = k_in @ raw['wk']
    v = v_in @ raw['wv'] + raw['v_b']
    q = q.reshape(B, Nq, num_heads, Dh).transpose(0, 2, 1, 3)
    k = k.reshape(B, Nk, num_heads, Dh).transpose(0, 2, 1, 3)
    v = v.reshape(B, Nk, num_heads, Dh).transpose(0, 2, 1, 3)

    attn = jax.nn.softmax(q @ jnp.swapaxes(k, -1, -2), axis=-1)
    out = (attn @ v).transpose(0, 2, 1, 3).reshape(B, Nq, Dall)
    out = out @ raw['wproj'] + raw['proj_b']

    x = x_q + raw['g1'] * out
    x = ln(x, raw['n2_w'], raw['n2_b'])
    h = _gelu(x @ raw['fc1_w'] + raw['fc1_b'])
    return x + raw['g2'] * (h @ raw['fc2_w'] + raw['fc2_b'])


# ----------------------------------- main --------------------------------------

if __name__ == "__main__":
    B, NQ, NK, C = 2, 8, 16, 128     # batch, query tokens, kv tokens, embed dim (lane-dense)
    NUM_HEADS = 4                    # head_dim = 32
    MLP_RATIO = 4.0
    INIT_VALUES = 0.1

    key = jax.random.PRNGKey(0)
    kp, kq, kkv, kpq, kpk = jax.random.split(key, 5)

    raw = init_raw_params(kp, dim=C, num_heads=NUM_HEADS, mlp_ratio=MLP_RATIO,
                          qkv_bias=True, init_values=INIT_VALUES)
    kparams = prepare_kernel_params(raw, NUM_HEADS)

    x_q = jax.random.normal(kq, (B, NQ, C), jnp.float32)
    x_kv = jax.random.normal(kkv, (B, NK, C), jnp.float32)
    pos_q = jax.random.normal(kpq, (1, NQ, C), jnp.float32)
    pos_k = jax.random.normal(kpk, (1, NK, C), jnp.float32)

    run = functools.partial(regressor_block_forward, kparams, x_q, x_kv, pos_q, pos_k,
                            num_heads=NUM_HEADS)
    try:
        out = jax.block_until_ready(run(single_buffer_weights=True))
    except Exception:
        # Fallback if this jax/libtpu build rejects pl.Buffered(1) single-buffering.
        out = jax.block_until_ready(run(single_buffer_weights=False))

    assert out.shape == (B, NQ, C)
    assert bool(jnp.all(jnp.isfinite(out)))

    # Loose check vs f32 pure-JAX reference (kernel uses bf16 matmul inputs).
    ref = regressor_block_ref(raw, x_q, x_kv, pos_q, pos_k, NUM_HEADS)
    max_err = float(jnp.max(jnp.abs(out - ref)))
    assert max_err < 0.1, max_err

    print("KERNEL_OK")
</pallas_src>

<mosaic_0001>
module attributes {stable_mosaic.version = 11 : i64} {
  func.func @regressor_block_kernel(%arg0: i32, %arg1: i32, %arg2: memref<1x8x128xf32, #tpu.memory_space<vmem>>, %arg3: memref<1x8x128xf32, #tpu.memory_space<vmem>>, %arg4: memref<1x16x128xf32, #tpu.memory_space<vmem>>, %arg5: memref<1x16x128xf32, #tpu.memory_space<vmem>>, %arg6: memref<128x128xbf16, #tpu.memory_space<vmem>>, %arg7: memref<128x128xbf16, #tpu.memory_space<vmem>>, %arg8: memref<128x128xbf16, #tpu.memory_space<vmem>>, %arg9: memref<128x128xbf16, #tpu.memory_space<vmem>>, %arg10: memref<128x512xbf16, #tpu.memory_space<vmem>>, %arg11: memref<512x128xbf16, #tpu.memory_space<vmem>>, %arg12: memref<12x128xf32, #tpu.memory_space<vmem>>, %arg13: memref<2x128xf32, #tpu.memory_space<vmem>>, %arg14: memref<1x512xf32, #tpu.memory_space<vmem>>, %arg15: memref<1x8x128xf32, #tpu.memory_space<vmem>>, %arg16: memref<4x16x32xbf16, #tpu.memory_space<vmem>>, %arg17: memref<4x16x32xbf16, #tpu.memory_space<vmem>>) attributes {dimension_semantics = [#tpu.dimension_semantics<parallel>, #tpu.dimension_semantics<arbitrary>], iteration_bounds = array<i64: 2, 1>, scalar_prefetch = 0 : i64, scratch_operands = 2 : i64, tpu.core_type = #tpu.core_type<tc>, window_params = [{transform_indices = @transform_0, window_bounds = array<i64: 1, 8, 128>}, {transform_indices = @transform_1, window_bounds = array<i64: 1, 8, 128>}, {transform_indices = @transform_2, window_bounds = array<i64: 1, 16, 128>}, {pipeline_mode = #tpu.pipeline_mode<synchronous>, transform_indices = @transform_3, window_bounds = array<i64: 1, 16, 128>}, {pipeline_mode = #tpu.pipeline_mode<synchronous>, transform_indices = @transform_4, window_bounds = array<i64: 128, 128>}, {pipeline_mode = #tpu.pipeline_mode<synchronous>, transform_indices = @transform_5, window_bounds = array<i64: 128, 128>}, {pipeline_mode = #tpu.pipeline_mode<synchronous>, transform_indices = @transform_6, window_bounds = array<i64: 128, 128>}, {pipeline_mode = #tpu.pipeline_mode<synchronous>, transform_indices = @transform_7, window_bounds = array<i64: 128, 128>}, {pipeline_mode = #tpu.pipeline_mode<synchronous>, transform_indices = @transform_8, window_bounds = array<i64: 128, 512>}, {pipeline_mode = #tpu.pipeline_mode<synchronous>, transform_indices = @transform_9, window_bounds = array<i64: 512, 128>}, {pipeline_mode = #tpu.pipeline_mode<synchronous>, transform_indices = @transform_10, window_bounds = array<i64: 12, 128>}, {pipeline_mode = #tpu.pipeline_mode<synchronous>, transform_indices = @transform_11, window_bounds = array<i64: 2, 128>}, {pipeline_mode = #tpu.pipeline_mode<synchronous>, transform_indices = @transform_12, window_bounds = array<i64: 1, 512>}, {transform_indices = @transform_13, window_bounds = array<i64: 1, 8, 128>}]} {
    %c0 = arith.constant 0 : index
    %c0_0 = arith.constant 0 : index
    %0 = vector.load %arg12[%c0, %c0_0] : memref<12x128xf32, #tpu.memory_space<vmem>>, vector<12x128xf32>
    %c0_1 = arith.constant 0 : index
    %c0_2 = arith.constant 0 : index
    %1 = vector.load %arg13[%c0_1, %c0_2] : memref<2x128xf32, #tpu.memory_space<vmem>>, vector<2x128xf32>
    %2 = vector.extract_strided_slice %0 {offsets = [0, 0], sizes = [1, 128], strides = [1, 1]} : vector<12x128xf32> to vector<1x128xf32>
    %3 = vector.extract_strided_slice %0 {offsets = [1, 0], sizes = [1, 128], strides = [1, 1]} : vector<12x128xf32> to vector<1x128xf32>
    %4 = vector.extract_strided_slice %0 {offsets = [2, 0], sizes = [1, 128], strides = [1, 1]} : vector<12x128xf32> to vector<1x128xf32>
    %5 = vector.extract_strided_slice %0 {offsets = [3, 0], sizes = [1, 128], strides = [1, 1]} : vector<12x128xf32> to vector<1x128xf32>
    %6 = vector.extract_strided_slice %0 {offsets = [4, 0], sizes = [1, 128], strides = [1, 1]} : vector<12x128xf32> to vector<1x128xf32>
    %7 = vector.extract_strided_slice %0 {offsets = [5, 0], sizes = [1, 128], strides = [1, 1]} : vector<12x128xf32> to vector<1x128xf32>
    %8 = vector.extract_strided_slice %0 {offsets = [6, 0], sizes = [1, 128], strides = [1, 1]} : vector<12x128xf32> to vector<1x128xf32>
    %9 = vector.extract_strided_slice %0 {offsets = [7, 0], sizes = [1, 128], strides = [1, 1]} : vector<12x128xf32> to vector<1x128xf32>
    %10 = vector.extract_strided_slice %0 {offsets = [8, 0], sizes = [1, 128], strides = [1, 1]} : vector<12x128xf32> to vector<1x128xf32>
    %11 = vector.extract_strided_slice %0 {offsets = [9, 0], sizes = [1, 128], strides = [1, 1]} : vector<12x128xf32> to vector<1x128xf32>
    %12 = vector.extract_strided_slice %0 {offsets = [10, 0], sizes = [1, 128], strides = [1, 1]} : vector<12x128xf32> to vector<1x128xf32>
    %13 = vector.extract_strided_slice %0 {offsets = [11, 0], sizes = [1, 128], strides = [1, 1]} : vector<12x128xf32> to vector<1x128xf32>
    %14 = vector.extract_strided_slice %1 {offsets = [0, 0], sizes = [1, 128], strides = [1, 1]} : vector<2x128xf32> to vector<1x128xf32>
    %15 = vector.extract_strided_slice %1 {offsets = [1, 0], sizes = [1, 128], strides = [1, 1]} : vector<2x128xf32> to vector<1x128xf32>
    %c0_i32 = arith.constant 0 : i32
    %16 = arith.cmpi eq, %arg1, %c0_i32 : i32
    %17 = arith.extui %16 : i1 to i32
    %c0_i32_3 = arith.constant 0 : i32
    %18 = arith.cmpi ne, %17, %c0_i32_3 : i32
    scf.if %18 {
      %c0_50 = arith.constant 0 : index
      %c0_51 = arith.constant 0 : index
      %c0_52 = arith.constant 0 : index
      %126 = vector.load %arg4[%c0_50, %c0_51, %c0_52] : memref<1x16x128xf32, #tpu.memory_space<vmem>>, vector<1x16x128xf32>
      %127 = vector.shape_cast %126 : vector<1x16x128xf32> to vector<16x128xf32>
      %c0_53 = arith.constant 0 : index
      %c0_54 = arith.constant 0 : index
      %c0_55 = arith.constant 0 : index
      %128 = vector.load %arg5[%c0_53, %c0_54, %c0_55] : memref<1x16x128xf32, #tpu.memory_space<vmem>>, vector<1x16x128xf32>
      %129 = vector.shape_cast %128 : vector<1x16x128xf32> to vector<16x128xf32>
      %130 = arith.addf %127, %129 : vector<16x128xf32>
      %cst_56 = arith.constant dense<0.000000e+00> : vector<16xf32>
      %131 = vector.multi_reduction <add>, %130, %cst_56 [1] : vector<16x128xf32> to vector<16xf32>
      %132 = vector.shape_cast %131 : vector<16xf32> to vector<16x1xf32>
      %cst_57 = arith.constant 1.280000e+02 : f32
      %133 = vector.broadcast %cst_57 : f32 to vector<16x1xf32>
      %134 = arith.divf %132, %133 : vector<16x1xf32>
      %135 = vector.broadcast %134 : vector<16x1xf32> to vector<16x128xf32>
      %136 = arith.subf %130, %135 : vector<16x128xf32>
      %137 = arith.mulf %136, %136 : vector<16x128xf32>
      %cst_58 = arith.constant dense<0.000000e+00> : vector<16xf32>
      %138 = vector.multi_reduction <add>, %137, %cst_58 [1] : vector<16x128xf32> to vector<16xf32>
      %139 = vector.shape_cast %138 : vector<16xf32> to vector<16x1xf32>
      %cst_59 = arith.constant 1.280000e+02 : f32
      %140 = vector.broadcast %cst_59 : f32 to vector<16x1xf32>
      %141 = arith.divf %139, %140 : vector<16x1xf32>
      %cst_60 = arith.constant 9.99999997E-7 : f32
      %142 = vector.broadcast %cst_60 : f32 to vector<16x1xf32>
      %143 = arith.addf %141, %142 : vector<16x1xf32>
      %144 = math.rsqrt %143 : vector<16x1xf32>
      %145 = vector.broadcast %144 : vector<16x1xf32> to vector<16x128xf32>
      %146 = arith.mulf %136, %145 : vector<16x128xf32>
      %147 = vector.broadcast %4 : vector<1x128xf32> to vector<16x128xf32>
      %148 = arith.mulf %146, %147 : vector<16x128xf32>
      %149 = vector.broadcast %5 : vector<1x128xf32> to vector<16x128xf32>
      %150 = arith.addf %148, %149 : vector<16x128xf32>
      %cst_61 = arith.constant dense<0.000000e+00> : vector<16xf32>
      %151 = vector.multi_reduction <add>, %127, %cst_61 [1] : vector<16x128xf32> to vector<16xf32>
      %152 = vector.shape_cast %151 : vector<16xf32> to vector<16x1xf32>
      %cst_62 = arith.constant 1.280000e+02 : f32
      %153 = vector.broadcast %cst_62 : f32 to vector<16x1xf32>
      %154 = arith.divf %152, %153 : vector<16x1xf32>
      %155 = vector.broadcast %154 : vector<16x1xf32> to vector<16x128xf32>
      %156 = arith.subf %127, %155 : vector<16x128xf32>
      %157 = arith.mulf %156, %156 : vector<16x128xf32>
      %cst_63 = arith.constant dense<0.000000e+00> : vector<16xf32>
      %158 = vector.multi_reduction <add>, %157, %cst_63 [1] : vector<16x128xf32> to vector<16xf32>
      %159 = vector.shape_cast %158 : vector<16xf32> to vector<16x1xf32>
      %cst_64 = arith.constant 1.280000e+02 : f32
      %160 = vector.broadcast %cst_64 : f32 to vector<16x1xf32>
      %161 = arith.divf %159, %160 : vector<16x1xf32>
      %cst_65 = arith.constant 9.99999997E-7 : f32
      %162 = vector.broadcast %cst_65 : f32 to vector<16x1xf32>
      %163 = arith.addf %161, %162 : vector<16x1xf32>
      %164 = math.rsqrt %163 : vector<16x1xf32>
      %165 = vector.broadcast %164 : vector<16x1xf32> to vector<16x128xf32>
      %166 = arith.mulf %156, %165 : vector<16x128xf32>
      %167 = vector.broadcast %6 : vector<1x128xf32> to vector<16x128xf32>
      %168 = arith.mulf %166, %167 : vector<16x128xf32>
      %169 = vector.broadcast %7 : vector<1x128xf32> to vector<16x128xf32>
      %170 = arith.addf %168, %169 : vector<16x128xf32>
      %171 = arith.truncf %150 : vector<16x128xf32> to vector<16x128xbf16>
      %c0_66 = arith.constant 0 : index
      %c0_67 = arith.constant 0 : index
      %172 = vector.load %arg7[%c0_66, %c0_67] : memref<128x128xbf16, #tpu.memory_space<vmem>>, vector<128x128xbf16>
      %cst_68 = arith.constant dense<0.000000e+00> : vector<16x128xf32>
      %173 = tpu.matmul %171, %172, %cst_68 {dimension_numbers = #tpu.dot_dimension_numbers<[1], [0], [0], [1], [0, 0, 1, 1], [], []>} : vector<16x128xbf16>, vector<128x128xbf16>, vector<16x128xf32> -> vector<16x128xf32>
      %174 = arith.truncf %170 : vector<16x128xf32> to vector<16x128xbf16>
      %c0_69 = arith.constant 0 : index
      %c0_70 = arith.constant 0 : index
      %175 = vector.load %arg8[%c0_69, %c0_70] : memref<128x128xbf16, #tpu.memory_space<vmem>>, vector<128x128xbf16>
      %cst_71 = arith.constant dense<0.000000e+00> : vector<16x128xf32>
      %176 = tpu.matmul %174, %175, %cst_71 {dimension_numbers = #tpu.dot_dimension_numbers<[1], [0], [0], [1], [0, 0, 1, 1], [], []>} : vector<16x128xbf16>, vector<128x128xbf16>, vector<16x128xf32> -> vector<16x128xf32>
      %177 = vector.broadcast %15 : vector<1x128xf32> to vector<16x128xf32>
      %178 = arith.addf %176, %177 : vector<16x128xf32>
      %179 = vector.shape_cast %173 : vector<16x128xf32> to vector<16x4x32xf32>
      %180 = tpu.transpose %179, [1, 0, 2] : vector<16x4x32xf32> -> vector<4x16x32xf32>
      %181 = arith.truncf %180 : vector<4x16x32xf32> to vector<4x16x32xbf16>
      %c0_72 = arith.constant 0 : index
      %c0_73 = arith.constant 0 : index
      %c0_74 = arith.constant 0 : index
      %182 = vector.load %arg16[%c0_72, %c0_73, %c0_74] : memref<4x16x32xbf16, #tpu.memory_space<vmem>>, vector<4x16x32xbf16>
      tpu.vector_store %arg16[%c0_72, %c0_73, %c0_74], %181 {strides = array<i32>} : memref<4x16x32xbf16, #tpu.memory_space<vmem>>, vector<4x16x32xbf16>,
      %183 = vector.shape_cast %178 : vector<16x128xf32> to vector<16x4x32xf32>
      %184 = tpu.transpose %183, [1, 0, 2] : vector<16x4x32xf32> -> vector<4x16x32xf32>
      %185 = arith.truncf %184 : vector<4x16x32xf32> to vector<4x16x32xbf16>
      %c0_75 = arith.constant 0 : index
      %c0_76 = arith.constant 0 : index
      %c0_77 = arith.constant 0 : index
      %186 = vector.load %arg17[%c0_75, %c0_76, %c0_77] : memref<4x16x32xbf16, #tpu.memory_space<vmem>>, vector<4x16x32xbf16>
      tpu.vector_store %arg17[%c0_75, %c0_76, %c0_77], %185 {strides = array<i32>} : memref<4x16x32xbf16, #tpu.memory_space<vmem>>, vector<4x16x32xbf16>,
    } else {
    }
    %c0_4 = arith.constant 0 : index
    %c0_5 = arith.constant 0 : index
    %c0_6 = arith.constant 0 : index
    %19 = vector.load %arg2[%c0_4, %c0_5, %c0_6] : memref<1x8x128xf32, #tpu.memory_space<vmem>>, vector<1x8x128xf32>
    %20 = vector.shape_cast %19 : vector<1x8x128xf32> to vector<8x128xf32>
    %c0_7 = arith.constant 0 : index
    %c0_8 = arith.constant 0 : index
    %c0_9 = arith.constant 0 : index
    %21 = vector.load %arg3[%c0_7, %c0_8, %c0_9] : memref<1x8x128xf32, #tpu.memory_space<vmem>>, vector<1x8x128xf32>
    %22 = vector.shape_cast %21 : vector<1x8x128xf32> to vector<8x128xf32>
    %23 = arith.addf %20, %22 : vector<8x128xf32>
    %cst = arith.constant dense<0.000000e+00> : vector<8xf32>
    %24 = vector.multi_reduction <add>, %23, %cst [1] : vector<8x128xf32> to vector<8xf32>
    %25 = vector.shape_cast %24 : vector<8xf32> to vector<8x1xf32>
    %cst_10 = arith.constant 1.280000e+02 : f32
    %26 = vector.broadcast %cst_10 : f32 to vector<8x1xf32>
    %27 = arith.divf %25, %26 : vector<8x1xf32>
    %28 = vector.broadcast %27 : vector<8x1xf32> to vector<8x128xf32>
    %29 = arith.subf %23, %28 : vector<8x128xf32>
    %30 = arith.mulf %29, %29 : vector<8x128xf32>
    %cst_11 = arith.constant dense<0.000000e+00> : vector<8xf32>
    %31 = vector.multi_reduction <add>, %30, %cst_11 [1] : vector<8x128xf32> to vector<8xf32>
    %32 = vector.shape_cast %31 : vector<8xf32> to vector<8x1xf32>
    %cst_12 = arith.constant 1.280000e+02 : f32
    %33 = vector.broadcast %cst_12 : f32 to vector<8x1xf32>
    %34 = arith.divf %32, %33 : vector<8x1xf32>
    %cst_13 = arith.constant 9.99999997E-7 : f32
    %35 = vector.broadcast %cst_13 : f32 to vector<8x1xf32>
    %36 = arith.addf %34, %35 : vector<8x1xf32>
    %37 = math.rsqrt %36 : vector<8x1xf32>
    %38 = vector.broadcast %37 : vector<8x1xf32> to vector<8x128xf32>
    %39 = arith.mulf %29, %38 : vector<8x128xf32>
    %40 = vector.broadcast %2 : vector<1x128xf32> to vector<8x128xf32>
    %41 = arith.mulf %39, %40 : vector<8x128xf32>
    %42 = vector.broadcast %3 : vector<1x128xf32> to vector<8x128xf32>
    %43 = arith.addf %41, %42 : vector<8x128xf32>
    %44 = arith.truncf %43 : vector<8x128xf32> to vector<8x128xbf16>
    %c0_14 = arith.constant 0 : index
    %c0_15 = arith.constant 0 : index
    %45 = vector.load %arg6[%c0_14, %c0_15] : memref<128x128xbf16, #tpu.memory_space<vmem>>, vector<128x128xbf16>
    %cst_16 = arith.constant dense<0.000000e+00> : vector<8x128xf32>
    %46 = tpu.matmul %44, %45, %cst_16 {dimension_numbers = #tpu.dot_dimension_numbers<[1], [0], [0], [1], [0, 0, 1, 1], [], []>} : vector<8x128xbf16>, vector<128x128xbf16>, vector<8x128xf32> -> vector<8x128xf32>
    %47 = vector.broadcast %14 : vector<1x128xf32> to vector<8x128xf32>
    %48 = arith.addf %46, %47 : vector<8x128xf32>
    %49 = vector.shape_cast %48 : vector<8x128xf32> to vector<8x4x32xf32>
    %50 = arith.truncf %49 : vector<8x4x32xf32> to vector<8x4x32xbf16>
    %c0_17 = arith.constant 0 : index
    %c0_18 = arith.constant 0 : index
    %c0_19 = arith.constant 0 : index
    %51 = vector.load %arg16[%c0_17, %c0_18, %c0_19] : memref<4x16x32xbf16, #tpu.memory_space<vmem>>, vector<4x16x32xbf16>
    %c0_20 = arith.constant 0 : index
    %c0_21 = arith.constant 0 : index
    %c0_22 = arith.constant 0 : index
    %52 = vector.load %arg17[%c0_20, %c0_21, %c0_22] : memref<4x16x32xbf16, #tpu.memory_space<vmem>>, vector<4x16x32xbf16>
    "tpu.trace_start"() <{level = 10 : i32, message = "qhd,hkd->hqk"}> : () -> ()
    %cst_23 = arith.constant dense<0.000000e+00> : vector<4x8x16xf32>
    %53 = tpu.matmul %50, %51, %cst_23 {dimension_numbers = #tpu.dot_dimension_numbers<[2], [2], [0], [1], [0, 1, 0, 0, 1, 1], [1], [0]>} : vector<8x4x32xbf16>, vector<4x16x32xbf16>, vector<4x8x16xf32> -> vector<4x8x16xf32>
    "tpu.trace_stop"() : () -> ()
    %cst_24 = arith.constant dense<0xFF800000> : vector<4x8xf32>
    %54 = vector.multi_reduction <maximumf>, %53, %cst_24 [2] : vector<4x8x16xf32> to vector<4x8xf32>
    %55 = vector.shape_cast %54 : vector<4x8xf32> to vector<4x8x1xf32>
    %56 = vector.broadcast %55 : vector<4x8x1xf32> to vector<4x8x16xf32>
    %57 = arith.subf %53, %56 : vector<4x8x16xf32>
    %58 = math.exp %57 : vector<4x8x16xf32>
    %cst_25 = arith.constant dense<0.000000e+00> : vector<4x8xf32>
    %59 = vector.multi_reduction <add>, %58, %cst_25 [2] : vector<4x8x16xf32> to vector<4x8xf32>
    %60 = vector.shape_cast %59 : vector<4x8xf32> to vector<4x8x1xf32>
    %61 = tpu.reciprocal %60 {approx = true} : vector<4x8x1xf32> -> vector<4x8x1xf32>
    %62 = vector.broadcast %61 : vector<4x8x1xf32> to vector<4x8x16xf32>
    %63 = arith.mulf %58, %62 : vector<4x8x16xf32>
    %64 = arith.truncf %63 : vector<4x8x16xf32> to vector<4x8x16xbf16>
    "tpu.trace_start"() <{level = 10 : i32, message = "hqk,hkd->qhd"}> : () -> ()
    %cst_26 = arith.constant dense<0.000000e+00> : vector<4x32x8xf32>
    %65 = tpu.matmul %52, %64, %cst_26 {dimension_numbers = #tpu.dot_dimension_numbers<[1], [2], [2], [1], [0, 0, 0, 2, 1, 1], [0], [0]>} : vector<4x16x32xbf16>, vector<4x8x16xbf16>, vector<4x32x8xf32> -> vector<4x32x8xf32>
    %66 = tpu.transpose %65, [2, 0, 1] : vector<4x32x8xf32> -> vector<8x4x32xf32>
    "tpu.trace_stop"() : () -> ()
    %67 = vector.shape_cast %66 : vector<8x4x32xf32> to vector<8x128xf32>
    %68 = arith.truncf %67 : vector<8x128xf32> to vector<8x128xbf16>
    %c0_27 = arith.constant 0 : index
    %c0_28 = arith.constant 0 : index
    %69 = vector.load %arg9[%c0_27, %c0_28] : memref<128x128xbf16, #tpu.memory_space<vmem>>, vector<128x128xbf16>
    %cst_29 = arith.constant dense<0.000000e+00> : vector<8x128xf32>
    %70 = tpu.matmul %68, %69, %cst_29 {dimension_numbers = #tpu.dot_dimension_numbers<[1], [0], [0], [1], [0, 0, 1, 1], [], []>} : vector<8x128xbf16>, vector<128x128xbf16>, vector<8x128xf32> -> vector<8x128xf32>
    %71 = vector.broadcast %10 : vector<1x128xf32> to vector<8x128xf32>
    %72 = arith.addf %70, %71 : vector<8x128xf32>
    %73 = vector.broadcast %11 : vector<1x128xf32> to vector<8x128xf32>
    %74 = arith.mulf %73, %72 : vector<8x128xf32>
    %75 = arith.addf %20, %74 : vector<8x128xf32>
    %cst_30 = arith.constant dense<0.000000e+00> : vector<8xf32>
    %76 = vector.multi_reduction <add>, %75, %cst_30 [1] : vector<8x128xf32> to vector<8xf32>
    %77 = vector.shape_cast %76 : vector<8xf32> to vector<8x1xf32>
    %cst_31 = arith.constant 1.280000e+02 : f32
    %78 = vector.broadcast %cst_31 : f32 to vector<8x1xf32>
    %79 = arith.divf %77, %78 : vector<8x1xf32>
    %80 = vector.broadcast %79 : vector<8x1xf32> to vector<8x128xf32>
    %81 = arith.subf %75, %80 : vector<8x128xf32>
    %82 = arith.mulf %81, %81 : vector<8x128xf32>
    %cst_32 = arith.constant dense<0.000000e+00> : vector<8xf32>
    %83 = vector.multi_reduction <add>, %82, %cst_32 [1] : vector<8x128xf32> to vector<8xf32>
    %84 = vector.shape_cast %83 : vector<8xf32> to vector<8x1xf32>
    %cst_33 = arith.constant 1.280000e+02 : f32
    %85 = vector.broadcast %cst_33 : f32 to vector<8x1xf32>
    %86 = arith.divf %84, %85 : vector<8x1xf32>
    %cst_34 = arith.constant 9.99999997E-7 : f32
    %87 = vector.broadcast %cst_34 : f32 to vector<8x1xf32>
    %88 = arith.addf %86, %87 : vector<8x1xf32>
    %89 = math.rsqrt %88 : vector<8x1xf32>
    %90 = vector.broadcast %89 : vector<8x1xf32> to vector<8x128xf32>
    %91 = arith.mulf %81, %90 : vector<8x128xf32>
    %92 = vector.broadcast %8 : vector<1x128xf32> to vector<8x128xf32>
    %93 = arith.mulf %91, %92 : vector<8x128xf32>
    %94 = vector.broadcast %9 : vector<1x128xf32> to vector<8x128xf32>
    %95 = arith.addf %93, %94 : vector<8x128xf32>
    %96 = arith.truncf %95 : vector<8x128xf32> to vector<8x128xbf16>
    %c0_35 = arith.constant 0 : index
    %c0_36 = arith.constant 0 : index
    %97 = vector.load %arg10[%c0_35, %c0_36] : memref<128x512xbf16, #tpu.memory_space<vmem>>, vector<128x512xbf16>
    %cst_37 = arith.constant dense<0.000000e+00> : vector<8x512xf32>
    %98 = tpu.matmul %96, %97, %cst_37 {dimension_numbers = #tpu.dot_dimension_numbers<[1], [0], [0], [1], [0, 0, 1, 1], [], []>} : vector<8x128xbf16>, vector<128x512xbf16>, vector<8x512xf32> -> vector<8x512xf32>
    %c0_38 = arith.constant 0 : index
    %c0_39 = arith.constant 0 : index
    %99 = vector.load %arg14[%c0_38, %c0_39] : memref<1x512xf32, #tpu.memory_space<vmem>>, vector<1x512xf32>
    %100 = vector.broadcast %99 : vector<1x512xf32> to vector<8x512xf32>
    %101 = arith.addf %98, %100 : vector<8x512xf32>
    %cst_40 = arith.constant 5.000000e-01 : f32
    %102 = vector.broadcast %cst_40 : f32 to vector<8x512xf32>
    %103 = arith.mulf %102, %101 : vector<8x512xf32>
    %cst_41 = arith.constant 4.471500e-02 : f32
    %104 = vector.broadcast %cst_41 : f32 to vector<8x512xf32>
    %105 = arith.mulf %104, %101 : vector<8x512xf32>
    %106 = arith.mulf %105, %101 : vector<8x512xf32>
    %107 = arith.mulf %106, %101 : vector<8x512xf32>
    %108 = arith.addf %101, %107 : vector<8x512xf32>
    %cst_42 = arith.constant 0.797884583 : f32
    %109 = vector.broadcast %cst_42 : f32 to vector<8x512xf32>
    %110 = arith.mulf %109, %108 : vector<8x512xf32>
    %111 = math.tanh %110 : vector<8x512xf32>
    %cst_43 = arith.constant 1.000000e+00 : f32
    %112 = vector.broadcast %cst_43 : f32 to vector<8x512xf32>
    %113 = arith.addf %112, %111 : vector<8x512xf32>
    %114 = arith.mulf %103, %113 : vector<8x512xf32>
    %115 = arith.truncf %114 : vector<8x512xf32> to vector<8x512xbf16>
    %c0_44 = arith.constant 0 : index
    %c0_45 = arith.constant 0 : index
    %116 = vector.load %arg11[%c0_44, %c0_45] : memref<512x128xbf16, #tpu.memory_space<vmem>>, vector<512x128xbf16>
    %cst_46 = arith.constant dense<0.000000e+00> : vector<8x128xf32>
    %117 = tpu.matmul %115, %116, %cst_46 {dimension_numbers = #tpu.dot_dimension_numbers<[1], [0], [0], [1], [0, 0, 1, 1], [], []>} : vector<8x512xbf16>, vector<512x128xbf16>, vector<8x128xf32> -> vector<8x128xf32>
    %118 = vector.broadcast %13 : vector<1x128xf32> to vector<8x128xf32>
    %119 = arith.addf %117, %118 : vector<8x128xf32>
    %120 = vector.broadcast %12 : vector<1x128xf32> to vector<8x128xf32>
    %121 = arith.mulf %120, %119 : vector<8x128xf32>
    %122 = arith.addf %95, %121 : vector<8x128xf32>
    %c0_47 = arith.constant 0 : index
    %c0_48 = arith.constant 0 : index
    %c0_49 = arith.constant 0 : index
    %123 = vector.load %arg15[%c0_47, %c0_48, %c0_49] : memref<1x8x128xf32, #tpu.memory_space<vmem>>, vector<1x8x128xf32>
    %124 = vector.shape_cast %123 : vector<1x8x128xf32> to vector<8x128xf32>
    %125 = vector.shape_cast %122 : vector<8x128xf32> to vector<1x8x128xf32>
    tpu.vector_store %arg15[%c0_47, %c0_48, %c0_49], %125 {strides = array<i32>} : memref<1x8x128xf32, #tpu.memory_space<vmem>>, vector<1x8x128xf32>,
    return
  }
  func.func @transform_0(%arg0: i32, %arg1: i32) -> (i32, i32, i32) {
    %c0_i32 = arith.constant 0 : i32
    %c0_i32_0 = arith.constant 0 : i32
    return %arg0, %arg1, %c0_i32 : i32, i32, i32
  }
  func.func @transform_1(%arg0: i32, %arg1: i32) -> (i32, i32, i32) {
    %c0_i32 = arith.constant 0 : i32
    %c0_i32_0 = arith.constant 0 : i32
    %c0_i32_1 = arith.constant 0 : i32
    return %c0_i32, %arg1, %c0_i32_0 : i32, i32, i32
  }
  func.func @transform_2(%arg0: i32, %arg1: i32) -> (i32, i32, i32) {
    %c0_i32 = arith.constant 0 : i32
    %c0_i32_0 = arith.constant 0 : i32
    %c0_i32_1 = arith.constant 0 : i32
    return %arg0, %c0_i32, %c0_i32_0 : i32, i32, i32
  }
  func.func @transform_3(%arg0: i32, %arg1: i32) -> (i32, i32, i32) {
    %c0_i32 = arith.constant 0 : i32
    %c0_i32_0 = arith.constant 0 : i32
    %c0_i32_1 = arith.constant 0 : i32
    %c0_i32_2 = arith.constant 0 : i32
    return %c0_i32, %c0_i32_0, %c0_i32_1 : i32, i32, i32
  }
  func.func @transform_4(%arg0: i32, %arg1: i32) -> (i32, i32) {
    %c0_i32 = arith.constant 0 : i32
    %c0_i32_0 = arith.constant 0 : i32
    %c0_i32_1 = arith.constant 0 : i32
    return %c0_i32, %c0_i32_0 : i32, i32
  }
  func.func @transform_5(%arg0: i32, %arg1: i32) -> (i32, i32) {
    %c0_i32 = arith.constant 0 : i32
    %c0_i32_0 = arith.constant 0 : i32
    %c0_i32_1 = arith.constant 0 : i32
    return %c0_i32, %c0_i32_0 : i32, i32
  }
  func.func @transform_6(%arg0: i32, %arg1: i32) -> (i32, i32) {
    %c0_i32 = arith.constant 0 : i32
    %c0_i32_0 = arith.constant 0 : i32
    %c0_i32_1 = arith.constant 0 : i32
    return %c0_i32, %c0_i32_0 : i32, i32
  }
  func.func @transform_7(%arg0: i32, %arg1: i32) -> (i32, i32) {
    %c0_i32 = arith.constant 0 : i32
    %c0_i32_0 = arith.constant 0 : i32
    %c0_i32_1 = arith.constant 0 : i32
    return %c0_i32, %c0_i32_0 : i32, i32
  }
  func.func @transform_8(%arg0: i32, %arg1: i32) -> (i32, i32) {
    %c0_i32 = arith.constant 0 : i32
    %c0_i32_0 = arith.constant 0 : i32
    %c0_i32_1 = arith.constant 0 : i32
    return %c0_i32, %c0_i32_0 : i32, i32
  }
  func.func @transform_9(%arg0: i32, %arg1: i32) -> (i32, i32) {
    %c0_i32 = arith.constant 0 : i32
    %c0_i32_0 = arith.constant 0 : i32
    %c0_i32_1 = arith.constant 0 : i32
    return %c0_i32, %c0_i32_0 : i32, i32
  }
  func.func @transform_10(%arg0: i32, %arg1: i32) -> (i32, i32) {
    %c0_i32 = arith.constant 0 : i32
    %c0_i32_0 = arith.constant 0 : i32
    %c0_i32_1 = arith.constant 0 : i32
    return %c0_i32, %c0_i32_0 : i32, i32
  }
  func.func @transform_11(%arg0: i32, %arg1: i32) -> (i32, i32) {
    %c0_i32 = arith.constant 0 : i32
    %c0_i32_0 = arith.constant 0 : i32
    %c0_i32_1 = arith.constant 0 : i32
    return %c0_i32, %c0_i32_0 : i32, i32
  }
  func.func @transform_12(%arg0: i32, %arg1: i32) -> (i32, i32) {
    %c0_i32 = arith.constant 0 : i32
    %c0_i32_0 = arith.constant 0 : i32
    %c0_i32_1 = arith.constant 0 : i32
    return %c0_i32, %c0_i32_0 : i32, i32
  }
  func.func @transform_13(%arg0: i32, %arg1: i32) -> (i32, i32, i32) {
    %c0_i32 = arith.constant 0 : i32
    %c0_i32_0 = arith.constant 0 : i32
    return %arg0, %arg1, %c0_i32 : i32, i32, i32
  }
}

module attributes {stable_mosaic.version = 11 : i64} {
  func.func @regressor_block_kernel(%arg0: i32, %arg1: i32, %arg2: memref<1x8x128xf32, #tpu.memory_space<vmem>>, %arg3: memref<1x8x128xf32, #tpu.memory_space<vmem>>, %arg4: memref<1x16x128xf32, #tpu.memory_space<vmem>>, %arg5: memref<1x16x128xf32, #tpu.memory_space<vmem>>, %arg6: memref<128x128xbf16, #tpu.memory_space<vmem>>, %arg7: memref<128x128xbf16, #tpu.memory_space<vmem>>, %arg8: memref<128x128xbf16, #tpu.memory_space<vmem>>, %arg9: memref<128x128xbf16, #tpu.memory_space<vmem>>, %arg10: memref<128x512xbf16, #tpu.memory_space<vmem>>, %arg11: memref<512x128xbf16, #tpu.memory_space<vmem>>, %arg12: memref<12x128xf32, #tpu.memory_space<vmem>>, %arg13: memref<2x128xf32, #tpu.memory_space<vmem>>, %arg14: memref<1x512xf32, #tpu.memory_space<vmem>>, %arg15: memref<1x8x128xf32, #tpu.memory_space<vmem>>, %arg16: memref<4x16x32xbf16, #tpu.memory_space<vmem>>, %arg17: memref<4x16x32xbf16, #tpu.memory_space<vmem>>) attributes {dimension_semantics = [#tpu.dimension_semantics<parallel>, #tpu.dimension_semantics<arbitrary>], iteration_bounds = array<i64: 2, 1>, scalar_prefetch = 0 : i64, scratch_operands = 2 : i64, tpu.core_type = #tpu.core_type<tc>, window_params = [{transform_indices = @transform_0, window_bounds = array<i64: 1, 8, 128>}, {transform_indices = @transform_1, window_bounds = array<i64: 1, 8, 128>}, {transform_indices = @transform_2, window_bounds = array<i64: 1, 16, 128>}, {pipeline_mode = #tpu.pipeline_mode<synchronous>, transform_indices = @transform_3, window_bounds = array<i64: 1, 16, 128>}, {pipeline_mode = #tpu.pipeline_mode<synchronous>, transform_indices = @transform_4, window_bounds = array<i64: 128, 128>}, {pipeline_mode = #tpu.pipeline_mode<synchronous>, transform_indices = @transform_5, window_bounds = array<i64: 128, 128>}, {pipeline_mode = #tpu.pipeline_mode<synchronous>, transform_indices = @transform_6, window_bounds = array<i64: 128, 128>}, {pipeline_mode = #tpu.pipeline_mode<synchronous>, transform_indices = @transform_7, window_bounds = array<i64: 128, 128>}, {pipeline_mode = #tpu.pipeline_mode<synchronous>, transform_indices = @transform_8, window_bounds = array<i64: 128, 512>}, {pipeline_mode = #tpu.pipeline_mode<synchronous>, transform_indices = @transform_9, window_bounds = array<i64: 512, 128>}, {pipeline_mode = #tpu.pipeline_mode<synchronous>, transform_indices = @transform_10, window_bounds = array<i64: 12, 128>}, {pipeline_mode = #tpu.pipeline_mode<synchronous>, transform_indices = @transform_11, window_bounds = array<i64: 2, 128>}, {pipeline_mode = #tpu.pipeline_mode<synchronous>, transform_indices = @transform_12, window_bounds = array<i64: 1, 512>}, {transform_indices = @transform_13, window_bounds = array<i64: 1, 8, 128>}]} {
    %c0 = arith.constant 0 : index
    %c0_0 = arith.constant 0 : index
    %0 = vector.load %arg12[%c0, %c0_0] : memref<12x128xf32, #tpu.memory_space<vmem>>, vector<12x128xf32>
    %c0_1 = arith.constant 0 : index
    %c0_2 = arith.constant 0 : index
    %1 = vector.load %arg13[%c0_1, %c0_2] : memref<2x128xf32, #tpu.memory_space<vmem>>, vector<2x128xf32>
    %2 = vector.extract_strided_slice %0 {offsets = [0, 0], sizes = [1, 128], strides = [1, 1]} : vector<12x128xf32> to vector<1x128xf32>
    %3 = vector.extract_strided_slice %0 {offsets = [1, 0], sizes = [1, 128], strides = [1, 1]} : vector<12x128xf32> to vector<1x128xf32>
    %4 = vector.extract_strided_slice %0 {offsets = [2, 0], sizes = [1, 128], strides = [1, 1]} : vector<12x128xf32> to vector<1x128xf32>
    %5 = vector.extract_strided_slice %0 {offsets = [3, 0], sizes = [1, 128], strides = [1, 1]} : vector<12x128xf32> to vector<1x128xf32>
    %6 = vector.extract_strided_slice %0 {offsets = [4, 0], sizes = [1, 128], strides = [1, 1]} : vector<12x128xf32> to vector<1x128xf32>
    %7 = vector.extract_strided_slice %0 {offsets = [5, 0], sizes = [1, 128], strides = [1, 1]} : vector<12x128xf32> to vector<1x128xf32>
    %8 = vector.extract_strided_slice %0 {offsets = [6, 0], sizes = [1, 128], strides = [1, 1]} : vector<12x128xf32> to vector<1x128xf32>
    %9 = vector.extract_strided_slice %0 {offsets = [7, 0], sizes = [1, 128], strides = [1, 1]} : vector<12x128xf32> to vector<1x128xf32>
    %10 = vector.extract_strided_slice %0 {offsets = [8, 0], sizes = [1, 128], strides = [1, 1]} : vector<12x128xf32> to vector<1x128xf32>
    %11 = vector.extract_strided_slice %0 {offsets = [9, 0], sizes = [1, 128], strides = [1, 1]} : vector<12x128xf32> to vector<1x128xf32>
    %12 = vector.extract_strided_slice %0 {offsets = [10, 0], sizes = [1, 128], strides = [1, 1]} : vector<12x128xf32> to vector<1x128xf32>
    %13 = vector.extract_strided_slice %0 {offsets = [11, 0], sizes = [1, 128], strides = [1, 1]} : vector<12x128xf32> to vector<1x128xf32>
    %14 = vector.extract_strided_slice %1 {offsets = [0, 0], sizes = [1, 128], strides = [1, 1]} : vector<2x128xf32> to vector<1x128xf32>
    %15 = vector.extract_strided_slice %1 {offsets = [1, 0], sizes = [1, 128], strides = [1, 1]} : vector<2x128xf32> to vector<1x128xf32>
    %c0_i32 = arith.constant 0 : i32
    %16 = arith.cmpi eq, %arg1, %c0_i32 : i32
    %17 = arith.extui %16 : i1 to i32
    %c0_i32_3 = arith.constant 0 : i32
    %18 = arith.cmpi ne, %17, %c0_i32_3 : i32
    scf.if %18 {
      %c0_50 = arith.constant 0 : index
      %c0_51 = arith.constant 0 : index
      %c0_52 = arith.constant 0 : index
      %126 = vector.load %arg4[%c0_50, %c0_51, %c0_52] : memref<1x16x128xf32, #tpu.memory_space<vmem>>, vector<1x16x128xf32>
      %127 = vector.shape_cast %126 : vector<1x16x128xf32> to vector<16x128xf32>
      %c0_53 = arith.constant 0 : index
      %c0_54 = arith.constant 0 : index
      %c0_55 = arith.constant 0 : index
      %128 = vector.load %arg5[%c0_53, %c0_54, %c0_55] : memref<1x16x128xf32, #tpu.memory_space<vmem>>, vector<1x16x128xf32>
      %129 = vector.shape_cast %128 : vector<1x16x128xf32> to vector<16x128xf32>
      %130 = arith.addf %127, %129 : vector<16x128xf32>
      %cst_56 = arith.constant dense<0.000000e+00> : vector<16xf32>
      %131 = vector.multi_reduction <add>, %130, %cst_56 [1] : vector<16x128xf32> to vector<16xf32>
      %132 = vector.shape_cast %131 : vector<16xf32> to vector<16x1xf32>
      %cst_57 = arith.constant 1.280000e+02 : f32
      %133 = vector.broadcast %cst_57 : f32 to vector<16x1xf32>
      %134 = arith.divf %132, %133 : vector<16x1xf32>
      %135 = vector.broadcast %134 : vector<16x1xf32> to vector<16x128xf32>
      %136 = arith.subf %130, %135 : vector<16x128xf32>
      %137 = arith.mulf %136, %136 : vector<16x128xf32>
      %cst_58 = arith.constant dense<0.000000e+00> : vector<16xf32>
      %138 = vector.multi_reduction <add>, %137, %cst_58 [1] : vector<16x128xf32> to vector<16xf32>
      %139 = vector.shape_cast %138 : vector<16xf32> to vector<16x1xf32>
      %cst_59 = arith.constant 1.280000e+02 : f32
      %140 = vector.broadcast %cst_59 : f32 to vector<16x1xf32>
      %141 = arith.divf %139, %140 : vector<16x1xf32>
      %cst_60 = arith.constant 9.99999997E-7 : f32
      %142 = vector.broadcast %cst_60 : f32 to vector<16x1xf32>
      %143 = arith.addf %141, %142 : vector<16x1xf32>
      %144 = math.rsqrt %143 : vector<16x1xf32>
      %145 = vector.broadcast %144 : vector<16x1xf32> to vector<16x128xf32>
      %146 = arith.mulf %136, %145 : vector<16x128xf32>
      %147 = vector.broadcast %4 : vector<1x128xf32> to vector<16x128xf32>
      %148 = arith.mulf %146, %147 : vector<16x128xf32>
      %149 = vector.broadcast %5 : vector<1x128xf32> to vector<16x128xf32>
      %150 = arith.addf %148, %149 : vector<16x128xf32>
      %cst_61 = arith.constant dense<0.000000e+00> : vector<16xf32>
      %151 = vector.multi_reduction <add>, %127, %cst_61 [1] : vector<16x128xf32> to vector<16xf32>
      %152 = vector.shape_cast %151 : vector<16xf32> to vector<16x1xf32>
      %cst_62 = arith.constant 1.280000e+02 : f32
      %153 = vector.broadcast %cst_62 : f32 to vector<16x1xf32>
      %154 = arith.divf %152, %153 : vector<16x1xf32>
      %155 = vector.broadcast %154 : vector<16x1xf32> to vector<16x128xf32>
      %156 = arith.subf %127, %155 : vector<16x128xf32>
      %157 = arith.mulf %156, %156 : vector<16x128xf32>
      %cst_63 = arith.constant dense<0.000000e+00> : vector<16xf32>
      %158 = vector.multi_reduction <add>, %157, %cst_63 [1] : vector<16x128xf32> to vector<16xf32>
      %159 = vector.shape_cast %158 : vector<16xf32> to vector<16x1xf32>
      %cst_64 = arith.constant 1.280000e+02 : f32
      %160 = vector.broadcast %cst_64 : f32 to vector<16x1xf32>
      %161 = arith.divf %159, %160 : vector<16x1xf32>
      %cst_65 = arith.constant 9.99999997E-7 : f32
      %162 = vector.broadcast %cst_65 : f32 to vector<16x1xf32>
      %163 = arith.addf %161, %162 : vector<16x1xf32>
      %164 = math.rsqrt %163 : vector<16x1xf32>
      %165 = vector.broadcast %164 : vector<16x1xf32> to vector<16x128xf32>
      %166 = arith.mulf %156, %165 : vector<16x128xf32>
      %167 = vector.broadcast %6 : vector<1x128xf32> to vector<16x128xf32>
      %168 = arith.mulf %166, %167 : vector<16x128xf32>
      %169 = vector.broadcast %7 : vector<1x128xf32> to vector<16x128xf32>
      %170 = arith.addf %168, %169 : vector<16x128xf32>
      %171 = arith.truncf %150 : vector<16x128xf32> to vector<16x128xbf16>
      %c0_66 = arith.constant 0 : index
      %c0_67 = arith.constant 0 : index
      %172 = vector.load %arg7[%c0_66, %c0_67] : memref<128x128xbf16, #tpu.memory_space<vmem>>, vector<128x128xbf16>
      %cst_68 = arith.constant dense<0.000000e+00> : vector<16x128xf32>
      %173 = tpu.matmul %171, %172, %cst_68 {dimension_numbers = #tpu.dot_dimension_numbers<[1], [0], [0], [1], [0, 0, 1, 1], [], []>} : vector<16x128xbf16>, vector<128x128xbf16>, vector<16x128xf32> -> vector<16x128xf32>
      %174 = arith.truncf %170 : vector<16x128xf32> to vector<16x128xbf16>
      %c0_69 = arith.constant 0 : index
      %c0_70 = arith.constant 0 : index
      %175 = vector.load %arg8[%c0_69, %c0_70] : memref<128x128xbf16, #tpu.memory_space<vmem>>, vector<128x128xbf16>
      %cst_71 = arith.constant dense<0.000000e+00> : vector<16x128xf32>
      %176 = tpu.matmul %174, %175, %cst_71 {dimension_numbers = #tpu.dot_dimension_numbers<[1], [0], [0], [1], [0, 0, 1, 1], [], []>} : vector<16x128xbf16>, vector<128x128xbf16>, vector<16x128xf32> -> vector<16x128xf32>
      %177 = vector.broadcast %15 : vector<1x128xf32> to vector<16x128xf32>
      %178 = arith.addf %176, %177 : vector<16x128xf32>
      %179 = vector.shape_cast %173 : vector<16x128xf32> to vector<16x4x32xf32>
      %180 = tpu.transpose %179, [1, 0, 2] : vector<16x4x32xf32> -> vector<4x16x32xf32>
      %181 = arith.truncf %180 : vector<4x16x32xf32> to vector<4x16x32xbf16>
      %c0_72 = arith.constant 0 : index
      %c0_73 = arith.constant 0 : index
      %c0_74 = arith.constant 0 : index
      %182 = vector.load %arg16[%c0_72, %c0_73, %c0_74] : memref<4x16x32xbf16, #tpu.memory_space<vmem>>, vector<4x16x32xbf16>
      tpu.vector_store %arg16[%c0_72, %c0_73, %c0_74], %181 {strides = array<i32>} : memref<4x16x32xbf16, #tpu.memory_space<vmem>>, vector<4x16x32xbf16>,
      %183 = vector.shape_cast %178 : vector<16x128xf32> to vector<16x4x32xf32>
      %184 = tpu.transpose %183, [1, 0, 2] : vector<16x4x32xf32> -> vector<4x16x32xf32>
      %185 = arith.truncf %184 : vector<4x16x32xf32> to vector<4x16x32xbf16>
      %c0_75 = arith.constant 0 : index
      %c0_76 = arith.constant 0 : index
      %c0_77 = arith.constant 0 : index
      %186 = vector.load %arg17[%c0_75, %c0_76, %c0_77] : memref<4x16x32xbf16, #tpu.memory_space<vmem>>, vector<4x16x32xbf16>
      tpu.vector_store %arg17[%c0_75, %c0_76, %c0_77], %185 {strides = array<i32>} : memref<4x16x32xbf16, #tpu.memory_space<vmem>>, vector<4x16x32xbf16>,
    } else {
    }
    %c0_4 = arith.constant 0 : index
    %c0_5 = arith.constant 0 : index
    %c0_6 = arith.constant 0 : index
    %19 = vector.load %arg2[%c0_4, %c0_5, %c0_6] : memref<1x8x128xf32, #tpu.memory_space<vmem>>, vector<1x8x128xf32>
    %20 = vector.shape_cast %19 : vector<1x8x128xf32> to vector<8x128xf32>
    %c0_7 = arith.constant 0 : index
    %c0_8 = arith.constant 0 : index
    %c0_9 = arith.constant 0 : index
    %21 = vector.load %arg3[%c0_7, %c0_8, %c0_9] : memref<1x8x128xf32, #tpu.memory_space<vmem>>, vector<1x8x128xf32>
    %22 = vector.shape_cast %21 : vector<1x8x128xf32> to vector<8x128xf32>
    %23 = arith.addf %20, %22 : vector<8x128xf32>
    %cst = arith.constant dense<0.000000e+00> : vector<8xf32>
    %24 = vector.multi_reduction <add>, %23, %cst [1] : vector<8x128xf32> to vector<8xf32>
    %25 = vector.shape_cast %24 : vector<8xf32> to vector<8x1xf32>
    %cst_10 = arith.constant 1.280000e+02 : f32
    %26 = vector.broadcast %cst_10 : f32 to vector<8x1xf32>
    %27 = arith.divf %25, %26 : vector<8x1xf32>
    %28 = vector.broadcast %27 : vector<8x1xf32> to vector<8x128xf32>
    %29 = arith.subf %23, %28 : vector<8x128xf32>
    %30 = arith.mulf %29, %29 : vector<8x128xf32>
    %cst_11 = arith.constant dense<0.000000e+00> : vector<8xf32>
    %31 = vector.multi_reduction <add>, %30, %cst_11 [1] : vector<8x128xf32> to vector<8xf32>
    %32 = vector.shape_cast %31 : vector<8xf32> to vector<8x1xf32>
    %cst_12 = arith.constant 1.280000e+02 : f32
    %33 = vector.broadcast %cst_12 : f32 to vector<8x1xf32>
    %34 = arith.divf %32, %33 : vector<8x1xf32>
    %cst_13 = arith.constant 9.99999997E-7 : f32
    %35 = vector.broadcast %cst_13 : f32 to vector<8x1xf32>
    %36 = arith.addf %34, %35 : vector<8x1xf32>
    %37 = math.rsqrt %36 : vector<8x1xf32>
    %38 = vector.broadcast %37 : vector<8x1xf32> to vector<8x128xf32>
    %39 = arith.mulf %29, %38 : vector<8x128xf32>
    %40 = vector.broadcast %2 : vector<1x128xf32> to vector<8x128xf32>
    %41 = arith.mulf %39, %40 : vector<8x128xf32>
    %42 = vector.broadcast %3 : vector<1x128xf32> to vector<8x128xf32>
    %43 = arith.addf %41, %42 : vector<8x128xf32>
    %44 = arith.truncf %43 : vector<8x128xf32> to vector<8x128xbf16>
    %c0_14 = arith.constant 0 : index
    %c0_15 = arith.constant 0 : index
    %45 = vector.load %arg6[%c0_14, %c0_15] : memref<128x128xbf16, #tpu.memory_space<vmem>>, vector<128x128xbf16>
    %cst_16 = arith.constant dense<0.000000e+00> : vector<8x128xf32>
    %46 = tpu.matmul %44, %45, %cst_16 {dimension_numbers = #tpu.dot_dimension_numbers<[1], [0], [0], [1], [0, 0, 1, 1], [], []>} : vector<8x128xbf16>, vector<128x128xbf16>, vector<8x128xf32> -> vector<8x128xf32>
    %47 = vector.broadcast %14 : vector<1x128xf32> to vector<8x128xf32>
    %48 = arith.addf %46, %47 : vector<8x128xf32>
    %49 = vector.shape_cast %48 : vector<8x128xf32> to vector<8x4x32xf32>
    %50 = arith.truncf %49 : vector<8x4x32xf32> to vector<8x4x32xbf16>
    %c0_17 = arith.constant 0 : index
    %c0_18 = arith.constant 0 : index
    %c0_19 = arith.constant 0 : index
    %51 = vector.load %arg16[%c0_17, %c0_18, %c0_19] : memref<4x16x32xbf16, #tpu.memory_space<vmem>>, vector<4x16x32xbf16>
    %c0_20 = arith.constant 0 : index
    %c0_21 = arith.constant 0 : index
    %c0_22 = arith.constant 0 : index
    %52 = vector.load %arg17[%c0_20, %c0_21, %c0_22] : memref<4x16x32xbf16, #tpu.memory_space<vmem>>, vector<4x16x32xbf16>
    "tpu.trace_start"() <{level = 10 : i32, message = "qhd,hkd->hqk"}> : () -> ()
    %cst_23 = arith.constant dense<0.000000e+00> : vector<4x8x16xf32>
    %53 = tpu.matmul %50, %51, %cst_23 {dimension_numbers = #tpu.dot_dimension_numbers<[2], [2], [0], [1], [0, 1, 0, 0, 1, 1], [1], [0]>} : vector<8x4x32xbf16>, vector<4x16x32xbf16>, vector<4x8x16xf32> -> vector<4x8x16xf32>
    "tpu.trace_stop"() : () -> ()
    %cst_24 = arith.constant dense<0xFF800000> : vector<4x8xf32>
    %54 = vector.multi_reduction <maximumf>, %53, %cst_24 [2] : vector<4x8x16xf32> to vector<4x8xf32>
    %55 = vector.shape_cast %54 : vector<4x8xf32> to vector<4x8x1xf32>
    %56 = vector.broadcast %55 : vector<4x8x1xf32> to vector<4x8x16xf32>
    %57 = arith.subf %53, %56 : vector<4x8x16xf32>
    %58 = math.exp %57 : vector<4x8x16xf32>
    %cst_25 = arith.constant dense<0.000000e+00> : vector<4x8xf32>
    %59 = vector.multi_reduction <add>, %58, %cst_25 [2] : vector<4x8x16xf32> to vector<4x8xf32>
    %60 = vector.shape_cast %59 : vector<4x8xf32> to vector<4x8x1xf32>
    %61 = tpu.reciprocal %60 {approx = true} : vector<4x8x1xf32> -> vector<4x8x1xf32>
    %62 = vector.broadcast %61 : vector<4x8x1xf32> to vector<4x8x16xf32>
    %63 = arith.mulf %58, %62 : vector<4x8x16xf32>
    %64 = arith.truncf %63 : vector<4x8x16xf32> to vector<4x8x16xbf16>
    "tpu.trace_start"() <{level = 10 : i32, message = "hqk,hkd->qhd"}> : () -> ()
    %cst_26 = arith.constant dense<0.000000e+00> : vector<4x32x8xf32>
    %65 = tpu.matmul %52, %64, %cst_26 {dimension_numbers = #tpu.dot_dimension_numbers<[1], [2], [2], [1], [0, 0, 0, 2, 1, 1], [0], [0]>} : vector<4x16x32xbf16>, vector<4x8x16xbf16>, vector<4x32x8xf32> -> vector<4x32x8xf32>
    %66 = tpu.transpose %65, [2, 0, 1] : vector<4x32x8xf32> -> vector<8x4x32xf32>
    "tpu.trace_stop"() : () -> ()
    %67 = vector.shape_cast %66 : vector<8x4x32xf32> to vector<8x128xf32>
    %68 = arith.truncf %67 : vector<8x128xf32> to vector<8x128xbf16>
    %c0_27 = arith.constant 0 : index
    %c0_28 = arith.constant 0 : index
    %69 = vector.load %arg9[%c0_27, %c0_28] : memref<128x128xbf16, #tpu.memory_space<vmem>>, vector<128x128xbf16>
    %cst_29 = arith.constant dense<0.000000e+00> : vector<8x128xf32>
    %70 = tpu.matmul %68, %69, %cst_29 {dimension_numbers = #tpu.dot_dimension_numbers<[1], [0], [0], [1], [0, 0, 1, 1], [], []>} : vector<8x128xbf16>, vector<128x128xbf16>, vector<8x128xf32> -> vector<8x128xf32>
    %71 = vector.broadcast %10 : vector<1x128xf32> to vector<8x128xf32>
    %72 = arith.addf %70, %71 : vector<8x128xf32>
    %73 = vector.broadcast %11 : vector<1x128xf32> to vector<8x128xf32>
    %74 = arith.mulf %73, %72 : vector<8x128xf32>
    %75 = arith.addf %20, %74 : vector<8x128xf32>
    %cst_30 = arith.constant dense<0.000000e+00> : vector<8xf32>
    %76 = vector.multi_reduction <add>, %75, %cst_30 [1] : vector<8x128xf32> to vector<8xf32>
    %77 = vector.shape_cast %76 : vector<8xf32> to vector<8x1xf32>
    %cst_31 = arith.constant 1.280000e+02 : f32
    %78 = vector.broadcast %cst_31 : f32 to vector<8x1xf32>
    %79 = arith.divf %77, %78 : vector<8x1xf32>
    %80 = vector.broadcast %79 : vector<8x1xf32> to vector<8x128xf32>
    %81 = arith.subf %75, %80 : vector<8x128xf32>
    %82 = arith.mulf %81, %81 : vector<8x128xf32>
    %cst_32 = arith.constant dense<0.000000e+00> : vector<8xf32>
    %83 = vector.multi_reduction <add>, %82, %cst_32 [1] : vector<8x128xf32> to vector<8xf32>
    %84 = vector.shape_cast %83 : vector<8xf32> to vector<8x1xf32>
    %cst_33 = arith.constant 1.280000e+02 : f32
    %85 = vector.broadcast %cst_33 : f32 to vector<8x1xf32>
    %86 = arith.divf %84, %85 : vector<8x1xf32>
    %cst_34 = arith.constant 9.99999997E-7 : f32
    %87 = vector.broadcast %cst_34 : f32 to vector<8x1xf32>
    %88 = arith.addf %86, %87 : vector<8x1xf32>
    %89 = math.rsqrt %88 : vector<8x1xf32>
    %90 = vector.broadcast %89 : vector<8x1xf32> to vector<8x128xf32>
    %91 = arith.mulf %81, %90 : vector<8x128xf32>
    %92 = vector.broadcast %8 : vector<1x128xf32> to vector<8x128xf32>
    %93 = arith.mulf %91, %92 : vector<8x128xf32>
    %94 = vector.broadcast %9 : vector<1x128xf32> to vector<8x128xf32>
    %95 = arith.addf %93, %94 : vector<8x128xf32>
    %96 = arith.truncf %95 : vector<8x128xf32> to vector<8x128xbf16>
    %c0_35 = arith.constant 0 : index
    %c0_36 = arith.constant 0 : index
    %97 = vector.load %arg10[%c0_35, %c0_36] : memref<128x512xbf16, #tpu.memory_space<vmem>>, vector<128x512xbf16>
    %cst_37 = arith.constant dense<0.000000e+00> : vector<8x512xf32>
    %98 = tpu.matmul %96, %97, %cst_37 {dimension_numbers = #tpu.dot_dimension_numbers<[1], [0], [0], [1], [0, 0, 1, 1], [], []>} : vector<8x128xbf16>, vector<128x512xbf16>, vector<8x512xf32> -> vector<8x512xf32>
    %c0_38 = arith.constant 0 : index
    %c0_39 = arith.constant 0 : index
    %99 = vector.load %arg14[%c0_38, %c0_39] : memref<1x512xf32, #tpu.memory_space<vmem>>, vector<1x512xf32>
    %100 = vector.broadcast %99 : vector<1x512xf32> to vector<8x512xf32>
    %101 = arith.addf %98, %100 : vector<8x512xf32>
    %cst_40 = arith.constant 5.000000e-01 : f32
    %102 = vector.broadcast %cst_40 : f32 to vector<8x512xf32>
    %103 = arith.mulf %102, %101 : vector<8x512xf32>
    %cst_41 = arith.constant 4.471500e-02 : f32
    %104 = vector.broadcast %cst_41 : f32 to vector<8x512xf32>
    %105 = arith.mulf %104, %101 : vector<8x512xf32>
    %106 = arith.mulf %105, %101 : vector<8x512xf32>
    %107 = arith.mulf %106, %101 : vector<8x512xf32>
    %108 = arith.addf %101, %107 : vector<8x512xf32>
    %cst_42 = arith.constant 0.797884583 : f32
    %109 = vector.broadcast %cst_42 : f32 to vector<8x512xf32>
    %110 = arith.mulf %109, %108 : vector<8x512xf32>
    %111 = math.tanh %110 : vector<8x512xf32>
    %cst_43 = arith.constant 1.000000e+00 : f32
    %112 = vector.broadcast %cst_43 : f32 to vector<8x512xf32>
    %113 = arith.addf %112, %111 : vector<8x512xf32>
    %114 = arith.mulf %103, %113 : vector<8x512xf32>
    %115 = arith.truncf %114 : vector<8x512xf32> to vector<8x512xbf16>
    %c0_44 = arith.constant 0 : index
    %c0_45 = arith.constant 0 : index
    %116 = vector.load %arg11[%c0_44, %c0_45] : memref<512x128xbf16, #tpu.memory_space<vmem>>, vector<512x128xbf16>
    %cst_46 = arith.constant dense<0.000000e+00> : vector<8x128xf32>
    %117 = tpu.matmul %115, %116, %cst_46 {dimension_numbers = #tpu.dot_dimension_numbers<[1], [0], [0], [1], [0, 0, 1, 1], [], []>} : vector<8x512xbf16>, vector<512x128xbf16>, vector<8x128xf32> -> vector<8x128xf32>
    %118 = vector.broadcast %13 : vector<1x128xf32> to vector<8x128xf32>
    %119 = arith.addf %117, %118 : vector<8x128xf32>
    %120 = vector.broadcast %12 : vector<1x128xf32> to vector<8x128xf32>
    %121 = arith.mulf %120, %119 : vector<8x128xf32>
    %122 = arith.addf %95, %121 : vector<8x128xf32>
    %c0_47 = arith.constant 0 : index
    %c0_48 = arith.constant 0 : index
    %c0_49 = arith.constant 0 : index
    %123 = vector.load %arg15[%c0_47, %c0_48, %c0_49] : memref<1x8x128xf32, #tpu.memory_space<vmem>>, vector<1x8x128xf32>
    %124 = vector.shape_cast %123 : vector<1x8x128xf32> to vector<8x128xf32>
    %125 = vector.shape_cast %122 : vector<8x128xf32> to vector<1x8x128xf32>
    tpu.vector_store %arg15[%c0_47, %c0_48, %c0_49], %125 {strides = array<i32>} : memref<1x8x128xf32, #tpu.memory_space<vmem>>, vector<1x8x128xf32>,
    return
  }
  func.func @transform_0(%arg0: i32, %arg1: i32) -> (i32, i32, i32) {
    %c0_i32 = arith.constant 0 : i32
    %c0_i32_0 = arith.constant 0 : i32
    return %arg0, %arg1, %c0_i32 : i32, i32, i32
  }
  func.func @transform_1(%arg0: i32, %arg1: i32) -> (i32, i32, i32) {
    %c0_i32 = arith.constant 0 : i32
    %c0_i32_0 = arith.constant 0 : i32
    %c0_i32_1 = arith.constant 0 : i32
    return %c0_i32, %arg1, %c0_i32_0 : i32, i32, i32
  }
  func.func @transform_2(%arg0: i32, %arg1: i32) -> (i32, i32, i32) {
    %c0_i32 = arith.constant 0 : i32
    %c0_i32_0 = arith.constant 0 : i32
    %c0_i32_1 = arith.constant 0 : i32
    return %arg0, %c0_i32, %c0_i32_0 : i32, i32, i32
  }
  func.func @transform_3(%arg0: i32, %arg1: i32) -> (i32, i32, i32) {
    %c0_i32 = arith.constant 0 : i32
    %c0_i32_0 = arith.constant 0 : i32
    %c0_i32_1 = arith.constant 0 : i32
    %c0_i32_2 = arith.constant 0 : i32
    return %c0_i32, %c0_i32_0, %c0_i32_1 : i32, i32, i32
  }
  func.func @transform_4(%arg0: i32, %arg1: i32) -> (i32, i32) {
    %c0_i32 = arith.constant 0 : i32
    %c0_i32_0 = arith.constant 0 : i32
    %c0_i32_1 = arith.constant 0 : i32
    return %c0_i32, %c0_i32_0 : i32, i32
  }
  func.func @transform_5(%arg0: i32, %arg1: i32) -> (i32, i32) {
    %c0_i32 = arith.constant 0 : i32
    %c0_i32_0 = arith.constant 0 : i32
    %c0_i32_1 = arith.constant 0 : i32
    return %c0_i32, %c0_i32_0 : i32, i32
  }
  func.func @transform_6(%arg0: i32, %arg1: i32) -> (i32, i32) {
    %c0_i32 = arith.constant 0 : i32
    %c0_i32_0 = arith.constant 0 : i32
    %c0_i32_1 = arith.constant 0 : i32
    return %c0_i32, %c0_i32_0 : i32, i32
  }
  func.func @transform_7(%arg0: i32, %arg1: i32) -> (i32, i32) {
    %c0_i32 = arith.constant 0 : i32
    %c0_i32_0 = arith.constant 0 : i32
    %c0_i32_1 = arith.constant 0 : i32
    return %c0_i32, %c0_i32_0 : i32, i32
  }
  func.func @transform_8(%arg0: i32, %arg1: i32) -> (i32, i32) {
    %c0_i32 = arith.constant 0 : i32
    %c0_i32_0 = arith.constant 0 : i32
    %c0_i32_1 = arith.constant 0 : i32
    return %c0_i32, %c0_i32_0 : i32, i32
  }
  func.func @transform_9(%arg0: i32, %arg1: i32) -> (i32, i32) {
    %c0_i32 = arith.constant 0 : i32
    %c0_i32_0 = arith.constant 0 : i32
    %c0_i32_1 = arith.constant 0 : i32
    return %c0_i32, %c0_i32_0 : i32, i32
  }
  func.func @transform_10(%arg0: i32, %arg1: i32) -> (i32, i32) {
    %c0_i32 = arith.constant 0 : i32
    %c0_i32_0 = arith.constant 0 : i32
    %c0_i32_1 = arith.constant 0 : i32
    return %c0_i32, %c0_i32_0 : i32, i32
  }
  func.func @transform_11(%arg0: i32, %arg1: i32) -> (i32, i32) {
    %c0_i32 = arith.constant 0 : i32
    %c0_i32_0 = arith.constant 0 : i32
    %c0_i32_1 = arith.constant 0 : i32
    return %c0_i32, %c0_i32_0 : i32, i32
  }
  func.func @transform_12(%arg0: i32, %arg1: i32) -> (i32, i32) {
    %c0_i32 = arith.constant 0 : i32
    %c0_i32_0 = arith.constant 0 : i32
    %c0_i32_1 = arith.constant 0 : i32
    return %c0_i32, %c0_i32_0 : i32, i32
  }
  func.func @transform_13(%arg0: i32, %arg1: i32) -> (i32, i32, i32) {
    %c0_i32 = arith.constant 0 : i32
    %c0_i32_0 = arith.constant 0 : i32
    return %arg0, %arg1, %c0_i32 : i32, i32, i32
  }
}

</mosaic_0001>

<bundles_post_ra>
// kernel: tpu_custom_call.1
= control target key start
LH: loop header
LB: loop body
LE: loop exit
PB: predicated region body
PF: predicated region fallthrough
CT: control target
= control target key end

     0   :  { %s5711_s0 = inlined_call_operand.hbm [shape: f32[2,8,128], index: 0, kind: input, shape index: {}]   ;;  %s5712_s1 = inlined_call_operand.hbm [shape: f32[1,8,128], index: 1, kind: input, shape index: {}]   ;;  %s5713_s2 = inlined_call_operand.hbm [shape: f32[2,16,128], index: 2, kind: input, shape index: {}]   ;;  %s5714_s3 = inlined_call_operand.hbm [shape: f32[1,16,128], index: 3, kind: input, shape index: {}]   ;;  %s5715_s4 = inlined_call_operand.hbm [shape: bf16[128,128], index: 4, kind: input, shape index: {}]   ;;  %s5716_s5 = inlined_call_operand.hbm [shape: bf16[128,128], index: 5, kind: input, shape index: {}]   ;;  %s5717_s6 = inlined_call_operand.hbm [shape: bf16[128,128], index: 6, kind: input, shape index: {}]   ;;  %s5718_s7 = inlined_call_operand.hbm [shape: bf16[128,128], index: 7, kind: input, shape index: {}]   ;;  %s5719_s8 = inlined_call_operand.hbm [shape: bf16[128,512], index: 8, kind: input, shape index: {}]   ;;  %s5720_s9 = inlined_call_operand.hbm [shape: bf16[512,128], index: 9, kind: input, shape index: {}]   ;;  %s5721_s10 = inlined_call_operand.vmem [shape: f32[12,128], index: 10, kind: input, shape index: {}]   ;;  %s5722_s11 = inlined_call_operand.hbm [shape: f32[2,128], index: 11, kind: input, shape index: {}]   ;;  %s5723_s12 = inlined_call_operand.vmem [shape: f32[1,512], index: 12, kind: input, shape index: {}]   ;;  %s5724_s13 = inlined_call_operand.hbm [shape: f32[2,8,128], index: 13, kind: output, shape index: {}]  }
   0x1   :  { %5741 = sst [smem:[#allocation38_spill]] %s5712_s1 }
   0x2   :  { %5742 = sst [smem:[#allocation39_spill]] %s5715_s4 }
   0x3   :  { %5743 = sst [smem:[#allocation40_spill]] %s5717_s6 }
   0x4   :  { %5744 = sst [smem:[#allocation41_spill]] %s5719_s8 }
   0x5   :  { %5745 = sst [smem:[#allocation42_spill]] %s5721_s10 }
   0x6   :  { %5746 = sst [smem:[#allocation43_spill]] %s5723_s12 }
   0x7   :  { %5747 = sst [smem:[#allocation44_spill]] %s5724_s13 }
   0x8   :  { %18 = vsyncpa [#allocation5], 0 }
   0x9   :  { %20 = vsyncpa [#allocation5 + $0x1], 0 }
   0xa   :  { %21 = vsyncpa [#allocation8], 0 }
   0xb   :  { %22 = vsyncpa [#allocation12], 0 }
   0xc   :  { %23 = vsyncpa [#allocation15], 0 }
   0xd   :  { %24 = vsyncpa [#allocation18], 0 }
   0xe   :  { %25 = vsyncpa [#allocation21], 0 }
   0xf   :  { %26 = vsyncpa [#allocation6], 0 }
  0x10   :  { %28 = vsyncpa [#allocation6 + $0x1], 0  ;;  %s5040_s25 = smov 0   ;;  %s5042_s26 = smov 0  }
  0x11   :  { %s5044_s27 = smov 0   ;;  %s5046_s28 = smov 0  }
  0x12   :  { %s5048_s29 = smov 0   ;;  %s5050_s30 = smov 0  }
  0x13 LB: > { %5748 = sst [smem:[#allocation32_spill]] %s4922_s25  ;;  %s5071_s14 = sadd.s32 4294967295, %s4942_s30   ;;  %s4942_s30 = sphi %s5050_s30, %s34_s30   ;;  %s4938_s29 = sphi %s5048_s29, %s5799_s29   ;;  %s4934_s28 = sphi %s5046_s28, %s5798_s28   ;;  %s4930_s27 = sphi %s5044_s27, %s5794_s27   ;;  %s4926_s26 = sphi %s5042_s26, %s5797_s26   ;;  %s4922_s25 = sphi %s5040_s25, %s5796_s25  }
  0x14   : > { %5749 = sst [smem:[#allocation33_spill]] %s4930_s27  ;;  %p3786_p0 = scmp.ge.s32.totalorder %s4942_s30, 1 }
  0x15   : > { %5750 = sst [smem:[#allocation34_spill]] %s4934_s28  ;;  %p5725_p1 = scmp.eq.s32.totalorder %s5071_s14, 0 }
  0x16   : > { %5751 = sst [smem:[#allocation35_spill]] %s4942_s30  ;;  %p369_p2 = scmp.lt.s32.totalorder %s4942_s30, 3 }
  0x17   : > { %s4944_s16 = smov [#allocation7]   ;;  %s4945_s18 = smov [#allocation11]  }
  0x18   : > { %p5076_p3 = pnand %p3786_p0, %p369_p2  ;;  %s384_s17 = sshll.u32 %s4944_s16, 4  ;;  %s385_s17 = int_to_ptr.vmem [resolvable:$true] %s384_s17 }
  0x19   : > { %s407_s19 = sshll.u32 %s4945_s18, 4  ;;  %s4946_s21 = smov [#allocation14]   ;;  %s408_s19 = int_to_ptr.vmem [resolvable:$true] %s407_s19 }
  0x1a   : > { %s5752_s15 = scalar_select %p5076_p3, 1, 0 }
  0x1b   : > { %p4256_p5 = pneg %p5076_p3  ;;  %s433_s22 = sshll.u32 %s4946_s21, 4  ;;  %s434_s22 = int_to_ptr.vmem [resolvable:$true] %s433_s22 }
  0x1c   : > { %s4555_s24 = scalar_lea.vmem %s385_s17, 128  ;;  %p4563_p11 = scmp.lt.s32.totalorder %s385_s17, %s385_s17 }
  0x1d   : > { %p5085_p6 = pnand %p4256_p5, %p5725_p1  ;;  %p4556_p8 = scmp.ne.s32.totalorder %s385_s17, %s4555_s24 }
  0x1e   : > { %p4564_p12 = scmp.lt.s32.totalorder %s4555_s24, %s4555_s24 }
  0x1f   : > { %p5091_p7 = pneg %p5085_p6 }
  0x20   : > { %p4565_p13 = por %p4564_p12, %p4563_p11 }
  0x21   : > { %p4558_p9 = pnand %p4556_p8, %p5091_p7 }
  0x23   : > { %p4559_p10 = pneg %p4558_p9 }
  0x25   : > { %p4566_p0 = pnand %p4565_p13, %p4559_p10 }
  0x27   : > { %4569 = shalt.err (!%p4566_p0)
}
  0x28   : > { %s5755_s1 = sld [smem:[#allocation38_spill]]  ;;  %s4581_s21 = scalar_lea.vmem %s408_s19, 1024 }
  0x29   : > { %p4582_p2 = scmp.ne.s32.totalorder %s408_s19, %s4581_s21  ;;  %p4589_p1 = scmp.lt.s32.totalorder %s408_s19, %s408_s19 }
  0x2a   : > { %p4590_p8 = scmp.lt.s32.totalorder %s4581_s21, %s4581_s21 }
  0x2b   : > { %p4584_p5 = pnand %p4582_p2, %p5091_p7 }
  0x2c   : > { %p4591_p9 = por %p4590_p8, %p4589_p1 }
  0x2d   : > { %p4585_p4 = pneg %p4584_p5 }
  0x2e   : > { %4259 = dma.hbm_to_vmem [thread:$0]  (!%p5085_p6), %s5755_s1, 128, %s385_s17, [#allocation8]  }
  0x2f   : > { %p4592_p3 = pnand %p4591_p9, %p4585_p4 }
  0x31   : > { %4595 = shalt.err (!%p4592_p3)
}
  0x32   : > { %s5728_s24 = smov 64   ;;  %s5730_s13 = smov 4  }
  0x33   : > { %s5756_s4 = sld [smem:[#allocation39_spill]]  ;;  %s4607_s18 = scalar_lea.vmem %s434_s22, 1024 }
  0x34   : > { %p4608_p10 = scmp.ne.s32.totalorder %s434_s22, %s4607_s18  ;;  %p4615_p4 = scmp.lt.s32.totalorder %s434_s22, %s434_s22 }
  0x35   : > { %p4616_p3 = scmp.lt.s32.totalorder %s4607_s18, %s4607_s18 }
  0x36   : > { %p4610_p11 = pnand %p4608_p10, %p5091_p7 }
  0x37   : > { %p4617_p12 = por %p4616_p3, %p4615_p4 }
  0x38   : > { %p4611_p1 = pneg %p4610_p11 }
  0x39   : > { %4265 = dma.hbm_to_vmem [thread:$0]  (!%p5085_p6), %s5756_s4, 1024, %s408_s19, [#allocation12], %s5728_s24, %s5728_s24, %s5730_s13  }
  0x3a   : > { %p4618_p13 = pnand %p4617_p12, %p4611_p1 }
  0x3c   : > { %4621 = shalt.err (!%p4618_p13)
}
  0x3d   : > { %s5757_s6 = sld [smem:[#allocation40_spill]]  ;;  %s4949_s19 = smov [#allocation17]  }
  0x3e   : > { %s459_s16 = sshll.u32 %s4949_s19, 4  ;;  %s460_s16 = int_to_ptr.vmem [resolvable:$true] %s459_s16 }
  0x3f   : > { %s4633_s17 = scalar_lea.vmem %s460_s16, 4096  ;;  %p4641_p8 = scmp.lt.s32.totalorder %s460_s16, %s460_s16 }
  0x40   : > { %p4634_p0 = scmp.ne.s32.totalorder %s460_s16, %s4633_s17  ;;  %p4642_p9 = scmp.lt.s32.totalorder %s4633_s17, %s4633_s17 }
  0x42   : > { %p4636_p2 = pnand %p4634_p0, %p5091_p7  ;;  %p4643_p10 = por %p4642_p9, %p4641_p8 }
  0x43   : > { %4271 = dma.hbm_to_vmem [thread:$0]  (!%p5085_p6), %s5757_s6, 1024, %s434_s22, [#allocation15], %s5728_s24, %s5728_s24, %s5730_s13  }
  0x44   : > { %p4637_p5 = pneg %p4636_p2 }
  0x46   : > { %p4644_p11 = pnand %p4643_p10, %p4637_p5 }
  0x48   : > { %4647 = shalt.err (!%p4644_p11)
}
  0x49   : > { %s4950_s18 = smov 256   ;;  %s4951_s1 = smov 16  }
  0x4a   : > { %s5758_s8 = sld [smem:[#allocation41_spill]]  ;;  %s3785_s19 = sadd.s32 4294967294, %s4942_s30  }
  0x4b   : > { %s46_s17 = sadd.s32 1, %s4938_s29  ;;  %s55_s24 = sadd.s32 1, %s4930_s27 }
  0x4c   : > { %p48_p1 = scmp.ge.s32.totalorder %s46_s17, 2  ;;  %p62_p4 = scmp.ne.s32.totalorder %s4930_s27, %s4926_s26 }
  0x4d   : > { %p63_p3 = scmp.eq.s32.totalorder %s4942_s30, 0  ;;  %p68_p13 = scmp.ne.s32.totalorder %s4926_s26, %s4922_s25 }
  0x4e   : > { %s5801_s17 = smov (%p48_p1, %s46_s17), 0  ;;  %p356_p0 = scmp.eq.s32.totalorder %s5071_s14, 1 }
  0x4f   : > { %5759 = sst [smem:[#allocation36_spill]] %s5801_s17  ;;  %p5137_p12 = por %p63_p3, %p62_p4 }
  0x50   : > { %4277 = dma.hbm_to_vmem [thread:$0]  (!%p5085_p6), %s5758_s8, 4096, %s460_s16, [#allocation18], %s4950_s18, %s4950_s18, %s4951_s1  }
  0x51   : > { %s50_s16 = ssub.s32 %s4938_s29, %s5801_s17  ;;  %p5761_p5 = scmp.eq.s32.totalorder %s5071_s14, 0 }
  0x52   : > { %p53_p2 = scmp.eq.s32.totalorder %s50_s16, 0  ;;  %p5152_p9 = por %p356_p0, %p62_p4 }
  0x53   : > { %p5148_p8 = por %p5761_p5, %p68_p13  ;;  %p362_p10 = scmp.eq.s32.totalorder %s3785_s19, 1 }
  0x54   : > { %s5157_s22 = scalar_select %p53_p2, %s4930_s27, %s55_s24  }
  0x55   : > { %p5159_p11 = por %p362_p10, %p68_p13  ;;  %p4304_p1 = scmp.lt.s32.totalorder %s4942_s30, 2 }
  0x56   : > { %5764 = sst [smem:[#allocation37_spill]] %s5157_s22  ;;  %s503_s4 = sand.u32 1, %s4942_s30  }
  0x57   : > { %s5765_s21 = scalar_select %p5159_p11, 1, 0 }
  0x58   : > { %s505_s16 = sand.u32 1, %s4930_s27   ;;  %s3798_s8 = sshll.u32 %s4938_s29, 7 }
  0x59   : > { %s3797_s6 = sshll.u32 %s505_s16, 3  ;;  %s513_s28 = scalar_lea.hbm %s5711_s0, %s3798_s8 }
  0x5a   : > { %s507_s12 = scalar_lea.vmem [#allocation4], %s3797_s6  ;;  %p5172_p4 = pnand %p4304_p1, %p5137_p12 }
  0x5b   : > { %s515_s10 = sshll.u32 %s507_s12, 4  ;;  %s3799_s19 = sshll.u32 %s505_s16, 4  ;;  %s516_s10 = int_to_ptr.vmem [resolvable:$true] %s515_s10 }
  0x5c   : > { %s3965_s22 = sshll.u32 %s4938_s29, 8  ;;  %s5177_s30 = scalar_lea.sflag [#allocation5], %s503_s4 }
  0x5d   : > { %p5738_p3 = pneg %p5172_p4  ;;  %s4661_s27 = scalar_lea.vmem %s516_s10, 128 }
  0x5e   : > { %p4662_p13 = scmp.ne.s32.totalorder %s516_s10, %s4661_s27  ;;  %s4952_s6 = smov [#allocation4]  }
  0x5f   : > { %s4666_s8 = sshll.u32 %s4952_s6, 4  ;;  %s4667_s8 = int_to_ptr.vmem [resolvable:$false] %s4666_s8 }
  0x60   : > { %p4664_p0 = pnand %p4662_p13, %p5738_p3  ;;  %s4668_s12 = scalar_lea.vmem %s4667_s8, 256 }
  0x61   : > { %p4669_p12 = scmp.lt.s32.totalorder %s516_s10, %s4667_s8  ;;  %p4670_p5 = scmp.lt.s32.totalorder %s4668_s12, %s4661_s27 }
  0x62   : > { %p4665_p2 = pneg %p4664_p0 }
  0x63   : > { %p4671_p10 = por %p4670_p5, %p4669_p12 }
  0x65   : > { %p4672_p1 = pnand %p4671_p10, %p4665_p2 }
  0x67   : > { %4675 = shalt.err (!%p4672_p1)
}
  0x68   : > { %4287 = dma.hbm_to_vmem [thread:$0]  (!%p5172_p4), %s513_s28, 128, %s516_s10, %s5177_s30  }
  0x69   : > { %s526_s4 = scalar_lea.vmem [#allocation9], %s3799_s19  ;;  %s4953_s25 = smov [#allocation10]  }
  0x6a   : > { %s533_s13 = sshll.u32 %s526_s4, 4  ;;  %s394_s17 = sshll.u32 %s4953_s25, 4  ;;  %s5187_s13 = int_to_ptr.vmem [resolvable:$true] %s533_s13  ;;  %s395_s17 = int_to_ptr.vmem [resolvable:$true] %s394_s17 }
  0x6b   : > { %s4687_s16 = scalar_lea.vmem %s395_s17, 256  ;;  %p4695_p12 = scmp.lt.s32.totalorder %s395_s17, %s395_s17 }
  0x6c   : > { %p4688_p13 = scmp.ne.s32.totalorder %s395_s17, %s4687_s16  ;;  %p4696_p2 = scmp.lt.s32.totalorder %s4687_s16, %s4687_s16 }
  0x6e   : > { %p4690_p0 = pnand %p4688_p13, %p5091_p7  ;;  %p4697_p5 = por %p4696_p2, %p4695_p12 }
  0x70   : > { %p4691_p3 = pneg %p4690_p0 }
  0x72   : > { %p4698_p10 = pnand %p4697_p5, %p4691_p3 }
  0x74   : > { %4701 = shalt.err (!%p4698_p10)
}
  0x75   : > { %s5739_s27 = smov 128   ;;  %s5740_s10 = smov 8  }
  0x76   : > { %4262 = dma.hbm_to_vmem [thread:$0]  (!%p5085_p6), %s5714_s3, 256, %s395_s17, [#allocation8], %s5739_s27, %s5739_s27, %s5740_s10  }
  0x77   : > { %s4956_s6 = smov [#allocation13]   ;;  %s4957_s12 = smov [#allocation16]  }
  0x78   : > { %s420_s8 = sshll.u32 %s4956_s6, 4  ;;  %s446_s4 = sshll.u32 %s4957_s12, 4  ;;  %s421_s8 = int_to_ptr.vmem [resolvable:$true] %s420_s8  ;;  %s447_s4 = int_to_ptr.vmem [resolvable:$true] %s446_s4 }
  0x79   : > { %s4713_s25 = scalar_lea.vmem %s421_s8, 1024  ;;  %p4721_p0 = scmp.lt.s32.totalorder %s421_s8, %s421_s8 }
  0x7a   : > { %p4714_p3 = scmp.ne.s32.totalorder %s421_s8, %s4713_s25  ;;  %p4722_p12 = scmp.lt.s32.totalorder %s4713_s25, %s4713_s25 }
  0x7c   : > { %p4716_p1 = pnand %p4714_p3, %p5091_p7  ;;  %p4723_p2 = por %p4722_p12, %p4721_p0 }
  0x7e   : > { %p4717_p13 = pneg %p4716_p1 }
  0x80   : > { %p4724_p5 = pnand %p4723_p2, %p4717_p13 }
  0x82   : > { %4727 = shalt.err (!%p4724_p5)
}
  0x83   : > { %s5767_s16 = smov 4   ;;  %s5768_s28 = smov 64  }
  0x84   : > { %4268 = dma.hbm_to_vmem [thread:$0]  (!%p5085_p6), %s5716_s5, 1024, %s421_s8, [#allocation12], %s5768_s28, %s5768_s28, %s5767_s16  }
  0x85   : > { %s4739_s6 = scalar_lea.vmem %s447_s4, 1024  ;;  %p4747_p11 = scmp.lt.s32.totalorder %s447_s4, %s447_s4 }
  0x86   : > { %p4740_p10 = scmp.ne.s32.totalorder %s447_s4, %s4739_s6  ;;  %p4748_p0 = scmp.lt.s32.totalorder %s4739_s6, %s4739_s6 }
  0x88   : > { %p4742_p3 = pnand %p4740_p10, %p5091_p7  ;;  %p4749_p13 = por %p4748_p0, %p4747_p11 }
  0x8a   : > { %p4743_p1 = pneg %p4742_p3 }
  0x8c   : > { %p4750_p12 = pnand %p4749_p13, %p4743_p1 }
  0x8e   : > { %4753 = shalt.err (!%p4750_p12)
}
  0x8f   : > { %4274 = dma.hbm_to_vmem [thread:$0]  (!%p5085_p6), %s5718_s7, 1024, %s447_s4, [#allocation15], %s5768_s28, %s5768_s28, %s5767_s16  }
  0x90   : > { %s4958_s8 = smov [#allocation19]   ;;  %s4959_s19 = smov [#allocation20]  }
  0x91   : > { %s472_s17 = sshll.u32 %s4958_s8, 4  ;;  %s489_s27 = sshll.u32 %s4959_s19, 4  ;;  %s473_s17 = int_to_ptr.vmem [resolvable:$true] %s472_s17  ;;  %s490_s27 = int_to_ptr.vmem [resolvable:$true] %s489_s27 }
  0x92   : > { %s4765_s10 = scalar_lea.vmem %s473_s17, 4096  ;;  %p4773_p10 = scmp.lt.s32.totalorder %s473_s17, %s473_s17 }
  0x93   : > { %p4766_p2 = scmp.ne.s32.totalorder %s473_s17, %s4765_s10  ;;  %p4774_p3 = scmp.lt.s32.totalorder %s4765_s10, %s4765_s10 }
  0x95   : > { %p4768_p11 = pnand %p4766_p2, %p5091_p7  ;;  %p4775_p1 = por %p4774_p3, %p4773_p10 }
  0x97   : > { %p4769_p5 = pneg %p4768_p11 }
  0x99   : > { %p4776_p0 = pnand %p4775_p1, %p4769_p5 }
  0x9b   : > { %4779 = shalt.err (!%p4776_p0)
}
  0x9c   : > { %4280 = dma.hbm_to_vmem [thread:$0]  (!%p5085_p6), %s5720_s9, 4096, %s473_s17, [#allocation18], %s5768_s28, %s5768_s28, %s5767_s16  }
  0x9d   : > { %s532_s10 = scalar_lea.hbm %s5713_s2, %s3965_s22  ;;  %s4791_s8 = scalar_lea.vmem %s490_s27, 32 }
  0x9e   : > { %p4792_p13 = scmp.ne.s32.totalorder %s490_s27, %s4791_s8  ;;  %p4799_p11 = scmp.lt.s32.totalorder %s490_s27, %s490_s27 }
  0x9f   : > { %p4800_p5 = scmp.lt.s32.totalorder %s4791_s8, %s4791_s8 }
  0xa0   : > { %p4794_p12 = pnand %p4792_p13, %p5091_p7 }
  0xa1   : > { %p4801_p10 = por %p4800_p5, %p4799_p11 }
  0xa2   : > { %p4795_p2 = pneg %p4794_p12 }
  0xa4   : > { %p4802_p3 = pnand %p4801_p10, %p4795_p2 }
  0xa6   : > { %4805 = shalt.err (!%p4802_p3)
}
  0xa7   : > { %4283 = dma.hbm_to_vmem [thread:$0]  (!%p5085_p6), %s5722_s11, 32, %s490_s27, [#allocation21]  }
  0xa8   : > { %s4819_s22 = scalar_lea.vmem %s5187_s13, 256  ;;  %p5769_p7 = pneg %p5172_p4 }
  0xa9   : > { %p4820_p1 = scmp.ne.s32.totalorder %s5187_s13, %s4819_s22  ;;  %s4960_s23 = smov [#allocation9]  }
  0xaa   : > { %s4824_s28 = sshll.u32 %s4960_s23, 4  ;;  %s4825_s28 = int_to_ptr.vmem [resolvable:$false] %s4824_s28 }
  0xab   : > { %p4822_p0 = pnand %p4820_p1, %p5769_p7  ;;  %s4826_s17 = scalar_lea.vmem %s4825_s28, 512 }
  0xac   : > { %p4827_p12 = scmp.lt.s32.totalorder %s5187_s13, %s4825_s28  ;;  %p4828_p2 = scmp.lt.s32.totalorder %s4826_s17, %s4819_s22 }
  0xad   : > { %p4823_p13 = pneg %p4822_p0 }
  0xae   : > { %p4829_p11 = por %p4828_p2, %p4827_p12 }
  0xb0   : > { %p4830_p5 = pnand %p4829_p11, %p4823_p13 }
  0xb2   : > { %4833 = shalt.err (!%p4830_p5)
}
  0xb3   : > { %s5770_s20 = smov 8   ;;  %s5771_s4 = smov 128  }
  0xb4   : > { %4290 = dma.hbm_to_vmem [thread:$0]  (!%p5172_p4), %s532_s10, 256, %s5187_s13, %s5177_s30, %s5771_s4, %s5771_s4, %s5770_s20  }
  0xb5   : > { %p5772_p6 = scmp.ne.s32.totalorder %s5752_s15, 0 }
  0xb6   : > { %s547_s27 = sand.u32 (!%p5772_p6), 1, %s5071_s14   ;;  %s5258_s6 = sand.u32 (!%p5772_p6), 1, %s4926_s26  }
  0xb7   : > { %545 = sbr.rel (%p5772_p6) target bundleno = 2847 (0xb1f), region = 72  ;;  %s3803_s12 = sshll.u32 (!%p5772_p6), %s5258_s6, 3 }
  0xb8   : > { %s548_s25 = scalar_lea.sflag (!%p5772_p6), [#allocation5], %s547_s27  ;;  %s5263_s24 = scalar_lea.vmem (!%p5772_p6), [#allocation4], %s3803_s12 }
  0xbc   : > { %4885 = dma.done.wait (%p5148_p8), %s548_s25, 128  }
  0xbd   : > { %4887 = vsyncadd (%p5148_p8), %s548_s25, 4294967168  ;;  %p5773_p4 = scmp.eq.s32.totalorder %s5071_s14, 0 }
  0xbf   : > { %4889 = dma.done.wait (%p5773_p4), [#allocation8], 128   ;;  %p5774_p10 = pmov %p5773_p4 }
  0xc0   : > { %s3805_s30 = sshll.u32 %s5258_s6, 4 }
  0xc1   : > { %4891 = vsyncadd (%p5774_p10), [#allocation8], 4294967168  ;;  %s564_s15 = scalar_lea.vmem [#allocation9], %s3805_s30 }
  0xc2   : > { %4893 = dma.done.wait (%p5148_p8), %s548_s25, 256  }
  0xc3   : > { %4895 = vsyncadd (%p5148_p8), %s548_s25, 4294967040  ;;  %p5775_p3 = pmov %p5773_p4 }
  0xc5   : > { %4897 = dma.done.wait (%p5775_p3), [#allocation8], 256   ;;  %p5776_p1 = pmov %p5775_p3 }
  0xc7   : > { %4899 = vsyncadd (%p5776_p1), [#allocation8], 4294967040  ;;  %p5777_p7 = pmov %p5776_p1 }
  0xc8   : > { %p5778_p0 = pmov %p5776_p1 }
  0xc9   : > { %4901 = dma.done.wait (%p5777_p7), [#allocation12], 2048  }
  0xca   : > { %4903 = vsyncadd (%p5778_p0), [#allocation12], 4294965248  ;;  %p5779_p13 = pmov %p5778_p0 }
  0xcb   : > { %p5780_p12 = pmov %p5778_p0 }
  0xcc   : > { %4905 = dma.done.wait (%p5779_p13), [#allocation15], 2048  }
  0xcd   : > { %4907 = vsyncadd (%p5780_p12), [#allocation15], 4294965248  ;;  %p5781_p8 = pmov %p5778_p0 }
  0xce   : > { %p5782_p2 = pmov %p5778_p0 }
  0xcf   : > { %4909 = dma.done.wait (%p5781_p8), [#allocation18], 8192  }
  0xd0   : > { %4911 = vsyncadd (%p5782_p2), [#allocation18], 4294959104  ;;  %p5783_p11 = pmov %p5778_p0 }
  0xd1   : > { %p5784_p5 = pmov %p5778_p0 }
  0xd2   : > { %4913 = dma.done.wait (%p5783_p11), [#allocation21], 32  }
  0xd3   : > { %4915 = vsyncadd (%p5784_p5), [#allocation21], 4294967264  ;;  %v5298_v0 = vld [vmem:[%s564_s15] sm:$0xff]  ;;  %v1609_v4 = vld [vmem:[#allocation7] sm:$0xff]  ;;  %v4961_v10 = vmov 0.0   ;;  %vm4962_vm0 = vmmov 0   ;;  %v681_v39 = vlaneseq }
  0xd4   : > { %v654_v1 = vld [vmem:[#allocation10] sm:$0xff]  ;;  %v1608_v2 = vld [vmem:[%s5263_s24] sm:$0xff]  ;;  %4082 = vmatprep.subr.bf16.mxu0 %v4961_v10  ;;  %4102 = vmatprep.subr.bf16.mxu1 %v4961_v10  ;;  %v4388_v24 = vld [vmem:[#allocation13 + $0x28] sm:$0xff]   ;;  %s5785_s13 = sld [smem:[#allocation42_spill]]  ;;  %s4963_s10 = smov 64   ;;  %vm1267_vm1 = vcmask 257024  }
  0xd5   : > { %v656_v3 = vadd.f32 %v654_v1, %v5298_v0  ;;  %v5302_v5 = vld [vmem:[%s564_s15 + $0x8] sm:$0xff]  ;;  %v1610_v7 = vadd.f32 %v1609_v4, %v1608_v2  ;;  %v4387_v23 = vld [vmem:[#allocation13 + $0x30] sm:$0xff]   ;;  %v4389_v25 = vld [vmem:[#allocation13 + $0x20] sm:$0xff]   ;;  %4098 = vmatprep.mubr.msk.bf16.mxu0 %vm4962_vm0, %v4961_v10  ;;  %4118 = vmatprep.mubr.msk.bf16.mxu1 %vm4962_vm0, %v4961_v10  ;;  %v5341_v46 = vshrl.u32 %v681_v39, 7  ;;  %s4964_s8 = smov 96   ;;  %s4965_s19 = smov 32  }
  0xd6   : > { %v655_v6 = vld [vmem:[#allocation10 + $0x8] sm:$0xff]  ;;  %v4391_v27 = vld [vmem:[#allocation13 + $0x10] sm:$0xff]   ;;  %v4392_v28 = vld [vmem:[#allocation13 + $0x8] sm:$0xff]   ;;  %vm1911_vm2 = vcmask 261120   ;;  %vm2111_vm3 = vcmask 130048   ;;  %vm2757_vm4 = vcmask 523264  }
  0xd7   : > { %658 = vadd.xlane.f32.xlu0 %v656_v3  ;;  %v657_v8 = vadd.f32 %v655_v6, %v5302_v5  ;;  %1611 = vadd.xlane.f32.xlu1 %v1610_v7  ;;  %v4386_v9 = vld [vmem:[#allocation13 + $0x38] sm:$0xff]   ;;  %v4393_v29 = vld [vmem:[#allocation13] sm:$0xff]   ;;  %v4403_v31 = vld [vmem:[#allocation14 + $0x30] sm:$0xff]   ;;  %v5348_v49 = vsub.s32 2, %v5341_v46  ;;  %v5359_v54 = vsub.s32 3, %v5341_v46  ;;  %vm2759_vm5 = vcmask 785408  }
  0xd8   : > { %4083 = vmatpush3.bf16.msra.mxu0 %v4386_v9  ;;  %v4390_v26 = vld [vmem:[#allocation13 + $0x18] sm:$0xff]   ;;  %v4404_v2 = vld [vmem:[#allocation14 + $0x28] sm:$0xff]   ;;  %v4395_v4 = vld [vmem:[#allocation11 + $0x30] sm:$0xff]   ;;  %s5786_s4 = sld [smem:[#allocation43_spill]]  ;;  %s4969_s16 = smov [#allocation22]  }
  0xd9   : > { %4084 = vmatprep.subr.bf16.mxu0 %v4961_v10  ;;  %v4402_v30 = vld [vmem:[#allocation14 + $0x38] sm:$0xff]   ;;  %v4396_v6 = vld [vmem:[#allocation11 + $0x28] sm:$0xff]   ;;  %s5787_s27 = sld [smem:[#allocation34_spill]]  ;;  %s4838_s22 = sshll.u32 %s4969_s16, 4  ;;  %s4839_s22 = int_to_ptr.vmem [resolvable:$false] %s4838_s22 }
  0xda   : > { %4103 = vmatpush3.bf16.msra.mxu1 %v4402_v30  ;;  %v5353_v50 = vld [vmem:[%s5785_s13] sm:$0xff]  ;;  %v4408_v9 = vld [vmem:[#allocation14 + $0x8] sm:$0xff]   ;;  %s5788_s18 = sld [smem:[#allocation44_spill]] }
  0xdb   : > { %660 = vadd.xlane.f32.xlu0 %v657_v8  ;;  %4104 = vmatprep.subr.bf16.mxu1 %v4961_v10  ;;  %v684_v53 = vrot.slane %v5353_v50, %v5348_v49  ;;  %v690_v58 = vrot.slane %v5353_v50, %v5359_v54  ;;  %v4394_v63 = vld [vmem:[#allocation11 + $0x38] sm:$0xff]  }
  0xdc   : > { %4085 = vmatpush3.bf16.msra.mxu0 %v4387_v23  ;;  %v4401_v23 = vld [vmem:[#allocation11] sm:$0xff]  }
  0xdd   : > { %4086 = vmatprep.subr.bf16.mxu0 %v4961_v10 }
  0xde   : > { %4105 = vmatpush3.bf16.msra.mxu1 %v4403_v31  ;;  %v717_v31 = vsub.s32 4, %v5341_v46 }
  0xdf   : > { %4106 = vmatprep.subr.bf16.mxu1 %v4961_v10  ;;  %s3962_s25 = sshll.u32 %s5787_s27, 7 }
  0xe0   : > { %4087 = vmatpush3.bf16.msra.mxu0 %v4388_v24 }
  0xe1   : > { %4088 = vmatprep.subr.bf16.mxu0 %v4961_v10 }
  0xe2   : > { %4107 = vmatpush3.bf16.msra.mxu1 %v4404_v2 }
  0xe3   : > { %4108 = vmatprep.subr.bf16.mxu1 %v4961_v10 }
  0xe4   : > { %4089 = vmatpush3.bf16.msra.mxu0 %v4389_v25 }
  0xe5   : > { %4090 = vmatprep.subr.bf16.mxu0 %v4961_v10 }
  0xe8   : > { %4091 = vmatpush3.bf16.msra.mxu0 %v4390_v26 }
  0xe9   : > { %4092 = vmatprep.subr.bf16.mxu0 %v4961_v10 }
  0xec   : > { %4093 = vmatpush3.bf16.msra.mxu0 %v4391_v27 }
  0xed   : > { %4094 = vmatprep.subr.bf16.mxu0 %v4961_v10 }
  0xf0   : > { %4095 = vmatpush3.bf16.msra.mxu0 %v4392_v28 }
  0xf1   : > { %4096 = vmatprep.subr.bf16.mxu0 %v4961_v10 }
  0xf4   : > { %4097 = vmatpush3.bf16.msra.mxu0 %v4393_v29 }
  0xf5   : > { %4122 = vmatprep.subr.bf16.mxu0 %v4961_v10 }
 0x160   : > { %v659_v11 = vpop.xlane.xlu0 %658  ;;  %v1612_v13 = vpop.xlane.xlu1 %1611 }
 0x161   : > { %v663_v12 = vmul.f32 0.0078125, %v659_v11  ;;  %v1614_v14 = vmul.f32 0.0078125, %v1612_v13  ;;  %v4398_v11 = vld [vmem:[#allocation11 + $0x18] sm:$0xff]  }
 0x163   : > { %v5308_v15 = vsub.f32 %v656_v3, %v663_v12  ;;  %v5310_v16 = vsub.f32 %v1610_v7, %v1614_v14  ;;  %v4405_v3 = vld [vmem:[#allocation14 + $0x20] sm:$0xff]   ;;  %v4407_v7 = vld [vmem:[#allocation14 + $0x10] sm:$0xff]   ;;  %v5375_v12 = vsub.s32 0, %v5341_v46 }
 0x164   : > { %v661_v17 = vpop.xlane.xlu0 %660  ;;  %4109 = vmatpush3.bf16.msra.mxu1 %v4405_v3  ;;  %v4409_v14 = vld [vmem:[#allocation14] sm:$0xff]  }
 0x165   : > { %v664_v18 = vmul.f32 0.0078125, %v661_v17  ;;  %v667_v19 = vmul.f32 %v5308_v15, %v5308_v15  ;;  %v1616_v21 = vmul.f32 %v5310_v16, %v5310_v16  ;;  %4110 = vmatprep.subr.bf16.mxu1 %v4961_v10  ;;  %v5380_v17 = vsub.s32 1, %v5341_v46 }
 0x167   : > { %v5314_v20 = vsub.f32 %v657_v8, %v664_v18  ;;  %669 = vadd.xlane.f32.xlu1 %v667_v19  ;;  %v4397_v8 = vld [vmem:[#allocation11 + $0x20] sm:$0xff]   ;;  %v1626_v19 = vrot.slane %v5353_v50, %v5375_v12 }
 0x169   : > { %v668_v22 = vmul.f32 %v5314_v20, %v5314_v20 }
 0x16b   : > { %1617 = vadd.xlane.f32.xlu1 %v1616_v21  ;;  %671 = vadd.xlane.f32.xlu0 %v668_v22  ;;  %v1631_v22 = vrot.slane %v5353_v50, %v5380_v17 }
 0x16f   : > { %695 = vadd.xlane.f32.xlu1 %v5302_v5  ;;  %693 = vadd.xlane.f32.xlu0 %v5298_v0 }
 0x1f0   : > { %v670_v32 = vpop.xlane.xlu1 %669 }
 0x1f1   : > { %v673_v33 = vmul.f32 0.0078125, %v670_v32  ;;  %v723_v32 = vsub.s32 5, %v5341_v46 }
 0x1f3   : > { %v675_v34 = vadd.f32 1e-06, %v673_v33  ;;  %v718_v33 = vrot.slane %v5353_v50, %v717_v31 }
 0x1f4   : > { %v1618_v35 = vpop.xlane.xlu1 %1617  ;;  %v672_v36 = vpop.xlane.xlu0 %671 }
 0x1f5   : > { %4506 = vrsqrt.f32 %v675_v34  ;;  %v674_v37 = vmul.f32 0.0078125, %v672_v36  ;;  %v1619_v59 = vmul.f32 0.0078125, %v1618_v35 }
 0x1f7   : > { %v676_v38 = vadd.f32 1e-06, %v674_v37  ;;  %v724_v37 = vrot.slane %v5353_v50, %v723_v32  ;;  %v5407_v50 = vld [vmem:[#allocation20] sm:$0x3] }
 0x1f8   : > { %v696_v40 = vpop.xlane.xlu1 %695  ;;  %v694_v41 = vpop.xlane.xlu0 %693 }
 0x1f9   : > { %v698_v42 = vmul.f32 0.0078125, %v696_v40  ;;  %v697_v43 = vmul.f32 0.0078125, %v694_v41  ;;  %4508 = vrsqrt.f32 %v676_v38 }
 0x1fb   : > { %v5336_v44 = vsub.f32 %v5302_v5, %v698_v42  ;;  %v5339_v45 = vsub.f32 %v5298_v0, %v697_v43  ;;  %v1620_v0 = vadd.f32 1e-06, %v1619_v59  ;;  %v4406_v5 = vld [vmem:[#allocation14 + $0x18] sm:$0xff]  }
 0x1fc   : > { %4111 = vmatpush3.bf16.msra.mxu1 %v4406_v5 }
 0x1fd   : > { %v702_v47 = vmul.f32 %v5336_v44, %v5336_v44  ;;  %v701_v48 = vmul.f32 %v5339_v45, %v5339_v45  ;;  %4510 = vrsqrt.f32 %v1620_v0  ;;  %4112 = vmatprep.subr.bf16.mxu1 %v4961_v10 }
 0x1ff   : > { %705 = vadd.xlane.f32.xlu1 %v702_v47  ;;  %703 = vadd.xlane.f32.xlu0 %v701_v48 }
 0x200   : > { %4113 = vmatpush3.bf16.msra.mxu1 %v4407_v7 }
 0x201   : > { %4114 = vmatprep.subr.bf16.mxu1 %v4961_v10 }
 0x202   : > { %v4507_v51 = vpop.eup %4506 }
 0x203   : > { %v679_v52 = vmul.f32 %v4507_v51, %v5308_v15  ;;  %v4399_v15 = vld [vmem:[#allocation11 + $0x10] sm:$0xff]   ;;  %v1653_v51 = vrot.slane %v5407_v50, %v5375_v12 }
 0x204   : > { %4115 = vmatpush3.bf16.msra.mxu1 %v4408_v9 }
 0x205   : > { %v685_v57 = vmul.f32 %v684_v53, %v679_v52  ;;  %4116 = vmatprep.subr.bf16.mxu1 %v4961_v10 }
 0x206   : > { %v4509_v55 = vpop.eup %4508 }
 0x207   : > { %v680_v56 = vmul.f32 %v4509_v55, %v5314_v20  ;;  %v691_v61 = vadd.f32 %v690_v58, %v685_v57  ;;  %v4400_v20 = vld [vmem:[#allocation11 + $0x8] sm:$0xff]  }
 0x208   : > { %4117 = vmatpush3.bf16.msra.mxu1 %v4409_v14 }
 0x209   : > { %v686_v60 = vmul.f32 %v684_v53, %v680_v56  ;;  %4142 = vmatprep.subr.bf16.mxu1 %v4961_v10 }
 0x20a   : > { %v4511_v13 = vpop.eup %4510 }
 0x20b   : > { %v692_v62 = vadd.f32 %v690_v58, %v686_v60  ;;  %v1622_v18 = vmul.f32 %v4511_v13, %v5310_v16  ;;  %v4966_v58 = vmov 1983009808   ;;  %v4967_v60 = vmov 1934713408  }
 0x20c   : > { %v966_v59 = vunpack.c.l.s4 %v4966_v58 }
 0x20d   : > { %v727_v1 = vpack.c.bf16 %v692_v62, %v691_v61  ;;  %v1627_v21 = vmul.f32 %v1626_v19, %v1622_v18  ;;  %v998_v61 = vunpack.c.l.s4 %v4967_v60 }
 0x20e   : > { %v967_v62 = vunpack.c.0.s8 %v966_v59 }
 0x20f   : > { %4099 = vmatmul.mubr.bf16.vlgmr.msra.gmra.mxu0 %v727_v1  ;;  %v1632_v24 = vadd.f32 %v1631_v22, %v1627_v21  ;;  %v999_v1 = vunpack.c.0.s8 %v998_v61 }
 0x210   : > { %4123 = vmatpush3.bf16.msra.mxu0 %v4394_v63  ;;  %4138 = vmatprep.mubr.msk.bf16.mxu0 %vm4962_vm0, %v4961_v10  ;;  %v5420_v2 = vsub.s32 %v967_v62, %v5341_v46 }
 0x211   : > { %4124 = vmatprep.subr.bf16.mxu0 %v4961_v10  ;;  %v1633_v16 = vpack.c.bf16 %v1632_v24, %v1632_v24  ;;  %v5423_v9 = vsub.s32 %v999_v1, %v5341_v46 }
 0x214   : > { %4125 = vmatpush3.bf16.msra.mxu0 %v4395_v4 }
 0x215   : > { %4126 = vmatprep.subr.bf16.mxu0 %v4961_v10 }
 0x218   : > { %4127 = vmatpush3.bf16.msra.mxu0 %v4396_v6 }
 0x219   : > { %4128 = vmatprep.subr.bf16.mxu0 %v4961_v10 }
 0x21c   : > { %4129 = vmatpush3.bf16.msra.mxu0 %v4397_v8 }
 0x21d   : > { %4130 = vmatprep.subr.bf16.mxu0 %v4961_v10 }
 0x220   : > { %4131 = vmatpush3.bf16.msra.mxu0 %v4398_v11 }
 0x221   : > { %4132 = vmatprep.subr.bf16.mxu0 %v4961_v10 }
 0x224   : > { %4133 = vmatpush3.bf16.msra.mxu0 %v4399_v15 }
 0x225   : > { %4134 = vmatprep.subr.bf16.mxu0 %v4961_v10 }
 0x228   : > { %4135 = vmatpush3.bf16.msra.mxu0 %v4400_v20 }
 0x229   : > { %4136 = vmatprep.subr.bf16.mxu0 %v4961_v10 }
 0x22c   : > { %4137 = vmatpush3.bf16.msra.mxu0 %v4401_v23 }
 0x22d   : > { %4190 = vmatprep.subr.bf16.mxu0 %v4961_v10 }
 0x22f   : > { %4139 = vmatmul.mubr.bf16.vlgmr.msra.gmra.mxu0 %v1633_v16 }
 0x230   : > { %4206 = vmatprep.mubr.msk.bf16.mxu0 %vm4962_vm0, %v4961_v10 }
 0x288   : > { %v706_v25 = vpop.xlane.xlu1 %705  ;;  %v704_v26 = vpop.xlane.xlu0 %703 }
 0x289   : > { %v708_v27 = vmul.f32 0.0078125, %v706_v25  ;;  %v707_v28 = vmul.f32 0.0078125, %v704_v26 }
 0x28b   : > { %v710_v29 = vadd.f32 1e-06, %v708_v27  ;;  %v709_v30 = vadd.f32 1e-06, %v707_v28 }
 0x28d   : > { %4512 = vrsqrt.f32 %v710_v29 }
 0x28e   : > { %4514 = vrsqrt.f32 %v709_v30 }
 0x29a   : > { %v4513_v34 = vpop.eup %4512 }
 0x29b   : > { %v4515_v35 = vpop.eup %4514  ;;  %v714_v36 = vmul.f32 %v4513_v34, %v5336_v44 }
 0x29c   : > { %v713_v38 = vmul.f32 %v4515_v35, %v5339_v45 }
 0x29d   : > { %v720_v39 = vmul.f32 %v718_v33, %v714_v36 }
 0x29e   : > { %v719_v40 = vmul.f32 %v718_v33, %v713_v38 }
 0x29f   : > { %v726_v41 = vadd.f32 %v724_v37, %v720_v39 }
 0x2a0   : > { %v725_v42 = vadd.f32 %v724_v37, %v719_v40 }
 0x2a2   : > { %v833_v43 = vpack.c.bf16 %v726_v41, %v725_v42 }
 0x2a4   : > { %4119 = vmatmul.mubr.bf16.vlgmr.msra.gmra.mxu1 %v833_v43 }
 0x2a5   : > { %4144 = vmatprep.mubr.msk.bf16.mxu1 %vm4962_vm0, %v4961_v10 }
 0x2cf   : > { %v826_v47 = vpop.f32.mrf.mxu0 }
 0x2d0   : > { %951 = vrot.lane.b32.xlu1 %v826_v47, %s4963_s10  ;;  %945 = vrot.lane.b32.xlu0 %v826_v47, %s4964_s8 }
 0x2d1   : > { %v4100_v44 = vpop.f32.mrf.mxu0 }
 0x2d3   : > { %v829_v48 = vpop.f32.mrf.mxu0 }
 0x2d4   : > { %957 = vrot.lane.b32.xlu0 %v826_v47, %s4965_s19  ;;  %947 = vrot.lane.b32.xlu1 %v829_v48, %s4964_s8 }
 0x2d5   : > { %v4101_v45 = vpop.f32.mrf.mxu0 }
 0x2d8   : > { %953 = vrot.lane.b32.xlu1 %v829_v48, %s4963_s10 }
 0x2dc   : > { %959 = vrot.lane.b32.xlu1 %v829_v48, %s4965_s19 }
 0x2ef   : > { %v1736_v52 = vpop.f32.mrf.mxu0 }
 0x2f0   : > { %v5411_v53 = vadd.f32 %v1736_v52, %v1653_v51 }
 0x2f1   : > { %v4140_v55 = vpop.f32.mrf.mxu0 }
 0x2f2   : > { %1746 = vrot.lane.b32.xlu1 %v5411_v53, %s4963_s10  ;;  %1743 = vrot.lane.b32.xlu0 %v5411_v53, %s4964_s8 }
 0x2f3   : > { %v1739_v56 = vpop.f32.mrf.mxu0 }
 0x2f5   : > { %v4141_v57 = vpop.f32.mrf.mxu0 }
 0x2f6   : > { %1749 = vrot.lane.b32.xlu0 %v5411_v53, %s4965_s19 }
 0x342   : > { %v952_v63 = vpop.permute.xlu1 %951  ;;  %v946_v0 = vpop.permute.xlu0 %945 }
 0x343   : > { %v963_v3 = vcombine.low %v826_v47, %v952_v63  ;;  %v964_v4 = vcombine.high %v826_v47, %v952_v63 }
 0x345   : > { %v971_v11 = vrot.slane %v963_v3, %v5420_v2  ;;  %v978_v13 = vrot.slane %v964_v4, %v5420_v2 }
 0x346   : > { %v958_v5 = vpop.permute.xlu0 %957  ;;  %v948_v6 = vpop.permute.xlu1 %947 }
 0x347   : > { %v979_v7 = vcombine.low %v946_v0, %v958_v5  ;;  %v980_v8 = vcombine.high %v946_v0, %v958_v5 }
 0x349   : > { %v987_v14 = vrot.slane %v979_v7, %v5420_v2  ;;  %v994_v15 = vrot.slane %v980_v8, %v5420_v2 }
 0x34a   : > { %v954_v18 = vpop.permute.xlu1 %953 }
 0x34b   : > { %v995_v19 = vcombine.low %v971_v11, %v987_v14  ;;  %v996_v20 = vcombine.high %v971_v11, %v987_v14  ;;  %v1011_v21 = vcombine.low %v978_v13, %v994_v15  ;;  %v1012_v22 = vcombine.high %v978_v13, %v994_v15 }
 0x34c   : > { %v1031_v26 = vcombine.low %v829_v48, %v954_v18  ;;  %v1032_v27 = vcombine.high %v829_v48, %v954_v18 }
 0x34d   : > { %v1003_v23 = vrot.slane %v995_v19, %v5423_v9  ;;  %v1010_v24 = vrot.slane %v996_v20, %v5423_v9  ;;  %v1019_v16 = vrot.slane %v1011_v21, %v5423_v9  ;;  %v1026_v25 = vrot.slane %v1012_v22, %v5423_v9 }
 0x34e   : > { %v960_v28 = vpop.permute.xlu1 %959  ;;  %v1039_v39 = vrot.slane %v1031_v26, %v5420_v2  ;;  %v1046_v40 = vrot.slane %v1032_v27, %v5420_v2 }
 0x34f   : > { %v1099_v29 = vcombine.low %v1003_v23, %v1010_v24  ;;  %v3831_v30 = vcombine.high %v1003_v23, %v1010_v24  ;;  %v1115_v31 = vcombine.low %v1019_v16, %v1026_v25  ;;  %v3832_v32 = vcombine.high %v1019_v16, %v1026_v25 }
 0x350   : > { %v1047_v33 = vcombine.low %v948_v6, %v960_v28  ;;  %v1048_v34 = vcombine.high %v948_v6, %v960_v28 }
 0x351   : > { %v1106_v35 = vrot.slane %v1099_v29, %v5420_v2  ;;  %v1114_v36 = vrot.slane %v3831_v30, %v5420_v2  ;;  %v1122_v37 = vrot.slane %v1115_v31, %v5420_v2  ;;  %v1130_v38 = vrot.slane %v3832_v32, %v5420_v2 }
 0x352   : > { %v1055_v41 = vrot.slane %v1047_v33, %v5420_v2  ;;  %v1062_v42 = vrot.slane %v1048_v34, %v5420_v2 }
 0x353   : > { %v1131_v43 = vcombine.low %v1106_v35, %v1114_v36  ;;  %v1132_v47 = vcombine.high %v1106_v35, %v1114_v36  ;;  %v1147_v44 = vcombine.low %v1122_v37, %v1130_v38  ;;  %v1148_v48 = vcombine.high %v1122_v37, %v1130_v38 }
 0x354   : > { %v1063_v45 = vcombine.low %v1039_v39, %v1055_v41  ;;  %v1064_v51 = vcombine.high %v1039_v39, %v1055_v41  ;;  %v1079_v52 = vcombine.low %v1046_v40, %v1062_v42  ;;  %v1080_v55 = vcombine.high %v1046_v40, %v1062_v42 }
 0x355   : > { %v1139_v56 = vrot.slane %v1131_v43, %v5423_v9  ;;  %v1146_v57 = vrot.slane %v1132_v47, %v5423_v9  ;;  %v1155_v58 = vrot.slane %v1147_v44, %v5423_v9  ;;  %v1162_v59 = vrot.slane %v1148_v48, %v5423_v9 }
 0x356   : > { %v1071_v60 = vrot.slane %v1063_v45, %v5423_v9  ;;  %v1078_v61 = vrot.slane %v1064_v51, %v5423_v9  ;;  %v1087_v62 = vrot.slane %v1079_v52, %v5423_v9  ;;  %v1094_v63 = vrot.slane %v1080_v55, %v5423_v9 }
 0x357   : > { %v1163_v0 = vcombine.low %v1139_v56, %v1155_v58  ;;  %v1164_v1 = vcombine.high %v1139_v56, %v1155_v58  ;;  %v1165_v3 = vcombine.low %v1146_v57, %v1162_v59  ;;  %v1166_v4 = vcombine.high %v1146_v57, %v1162_v59 }
 0x358   : > { %v1167_v5 = vcombine.low %v1071_v60, %v1078_v61  ;;  %v3833_v6 = vcombine.high %v1071_v60, %v1078_v61  ;;  %v1183_v7 = vcombine.low %v1087_v62, %v1094_v63  ;;  %v3834_v8 = vcombine.high %v1087_v62, %v1094_v63 }
 0x359   : > { %v3966_v11 = vpack.c.bf16 %v1163_v0, %v1163_v0  ;;  %v3968_v13 = vpack.c.bf16 %v1164_v1, %v1164_v1  ;;  %v3970_v14 = vpack.c.bf16 %v1165_v3, %v1165_v3  ;;  %v3972_v15 = vpack.c.bf16 %v1166_v4, %v1166_v4 }
 0x35a   : > { %v1174_v18 = vrot.slane %v1167_v5, %v5420_v2  ;;  %v1182_v19 = vrot.slane %v3833_v6, %v5420_v2  ;;  %v1190_v20 = vrot.slane %v1183_v7, %v5420_v2  ;;  %v1198_v21 = vrot.slane %v3834_v8, %v5420_v2 }
 0x35b   : > { %1268 = vst.msk [vmem:[#allocation2] sm:$0xf] %vm1267_vm1, %v3966_v11  ;;  %1270 = vst.msk [vmem:[#allocation2 + $0x8] sm:$0xf] %vm1267_vm1, %v3968_v13 }
 0x35c   : > { %1272 = vst.msk [vmem:[#allocation2 + $0x10] sm:$0xf] %vm1267_vm1, %v3970_v14  ;;  %1274 = vst.msk [vmem:[#allocation2 + $0x18] sm:$0xf] %vm1267_vm1, %v3972_v15  ;;  %v1199_v22 = vcombine.low %v1174_v18, %v1182_v19  ;;  %v1200_v23 = vcombine.high %v1174_v18, %v1182_v19  ;;  %v1215_v24 = vcombine.low %v1190_v20, %v1198_v21 }
 0x35d   : > { %v1216_v16 = vcombine.high %v1190_v20, %v1198_v21 }
 0x35e   : > { %v1207_v25 = vrot.slane %v1199_v22, %v5423_v9  ;;  %v1214_v26 = vrot.slane %v1200_v23, %v5423_v9  ;;  %v1223_v27 = vrot.slane %v1215_v24, %v5423_v9 }
 0x35f   : > { %v1230_v28 = vrot.slane %v1216_v16, %v5423_v9 }
 0x360   : > { %v1231_v29 = vcombine.low %v1207_v25, %v1223_v27  ;;  %v1232_v30 = vcombine.high %v1207_v25, %v1223_v27 }
 0x361   : > { %v1233_v31 = vcombine.low %v1214_v26, %v1230_v28  ;;  %v1234_v32 = vcombine.high %v1214_v26, %v1230_v28 }
 0x362   : > { %v3967_v33 = vpack.c.bf16 %v1231_v29, %v1231_v29  ;;  %v3969_v34 = vpack.c.bf16 %v1232_v30, %v1232_v30 }
 0x363   : > { %v3971_v35 = vpack.c.bf16 %v1233_v31, %v1233_v31  ;;  %v3973_v36 = vpack.c.bf16 %v1234_v32, %v1234_v32  ;;  %v4968_v31 = vmov 0  }
 0x364   : > { %v5461_v37 = vpop.f32.mrf.mxu1  ;;  %1269 = vst.msk [vmem:[#allocation2 + $0x4] sm:$0xf] %vm1267_vm1, %v3967_v33  ;;  %1271 = vst.msk [vmem:[#allocation2 + $0xc] sm:$0xf] %vm1267_vm1, %v3969_v34  ;;  %v1747_v38 = vpop.permute.xlu1 %1746 }
 0x365   : > { %1273 = vst.msk [vmem:[#allocation2 + $0x14] sm:$0xf] %vm1267_vm1, %v3971_v35  ;;  %1275 = vst.msk [vmem:[#allocation2 + $0x1c] sm:$0xf] %vm1267_vm1, %v3973_v36  ;;  %v1744_v39 = vpop.permute.xlu0 %1743  ;;  %v1752_v41 = vcombine.low %v5411_v53, %v1747_v38  ;;  %v1753_v42 = vcombine.high %v5411_v53, %v1747_v38 }
 0x366   : > { %v4120_v40 = vpop.f32.mrf.mxu1 }
 0x367   : > { %v1760_v51 = vrot.slane %v1752_v41, %v5420_v2  ;;  %v1767_v52 = vrot.slane %v1753_v42, %v5420_v2 }
 0x368   : > { %v5469_v43 = vpop.f32.mrf.mxu1 }
 0x369   : > { %v1750_v47 = vpop.permute.xlu0 %1749 }
 0x36a   : > { %v1768_v44 = vcombine.low %v1744_v39, %v1750_v47  ;;  %v1769_v48 = vcombine.high %v1744_v39, %v1750_v47  ;;  %v4121_v45 = vpop.f32.mrf.mxu1 }
 0x36b   : > { %v4410_v57 = vld [vmem:[#allocation2] sm:$0xff]   ;;  %v4411_v24 = vld [vmem:[#allocation2 + $0x8] sm:$0xff]  }
 0x36c   : > { %v1776_v55 = vrot.slane %v1768_v44, %v5420_v2  ;;  %v1783_v56 = vrot.slane %v1769_v48, %v5420_v2  ;;  %v1916_v61 = vsel %vm1911_vm2, %v4410_v57, 0  ;;  %v1967_v25 = vsel %vm1911_vm2, %v4411_v24, 0  ;;  %v4412_v28 = vld [vmem:[#allocation2 + $0x10] sm:$0xff]   ;;  %v4413_v34 = vld [vmem:[#allocation2 + $0x18] sm:$0xff]  }
 0x36d   : > { %4143 = vmatpush3.bf16.xpose.msra.mxu1 %v1916_v61  ;;  %v2018_v30 = vsel %vm1911_vm2, %v4412_v28, 0  ;;  %v2069_v36 = vsel %vm1911_vm2, %v4413_v34, 0 }
 0x36e   : > { %v1784_v58 = vcombine.low %v1760_v51, %v1776_v55  ;;  %v1785_v59 = vcombine.high %v1760_v51, %v1776_v55  ;;  %v1800_v60 = vcombine.low %v1767_v52, %v1783_v56  ;;  %v1801_v53 = vcombine.high %v1767_v52, %v1783_v56  ;;  %4148 = vmatprep.subr.bf16.mxu1 %v4961_v10 }
 0x36f   : > { %v853_v56 = vrot.slane %v5407_v50, %v5380_v17 }
 0x370   : > { %v1792_v62 = vrot.slane %v1784_v58, %v5423_v9  ;;  %v1799_v63 = vrot.slane %v1785_v59, %v5423_v9  ;;  %v1808_v0 = vrot.slane %v1800_v60, %v5423_v9  ;;  %v1815_v1 = vrot.slane %v1801_v53, %v5423_v9 }
 0x371   : > { %v937_v59 = vadd.f32 %v5461_v37, %v853_v56 }
 0x372   : > { %v1816_v3 = vcombine.high %v1792_v62, %v4961_v10  ;;  %v1817_v4 = vcombine.high %v1799_v63, %v4961_v10  ;;  %v1818_v5 = vcombine.high %v1808_v0, %v4961_v10  ;;  %v1819_v6 = vcombine.high %v1815_v1, %v4961_v10 }
 0x373   : > { %v3863_v7 = vpack.c.bf16 %v1808_v0, %v1792_v62  ;;  %v3864_v8 = vpack.c.bf16 %v1815_v1, %v1799_v63  ;;  %v5517_v0 = vadd.f32 %v5469_v43, %v853_v56 }
 0x374   : > { %v3865_v11 = vpack.c.bf16 %v1818_v5, %v1816_v3  ;;  %v3866_v13 = vpack.c.bf16 %v1819_v6, %v1817_v4 }
 0x375   : > { %v1851_v14 = vrot.slane %v3863_v7, %v5420_v2  ;;  %v1859_v15 = vrot.slane %v3864_v8, %v5420_v2 }
 0x376   : > { %v1876_v18 = vrot.slane %v3865_v11, %v5420_v2  ;;  %v1884_v19 = vrot.slane %v3866_v13, %v5420_v2 }
 0x377   : > { %v1860_v20 = vcombine.low %v1851_v14, %v1859_v15 }
 0x378   : > { %v1885_v21 = vcombine.low %v1876_v18, %v1884_v19 }
 0x379   : > { %v1867_v22 = vrot.slane %v1860_v20, %v5423_v9 }
 0x37a   : > { %v1892_v23 = vrot.slane %v1885_v21, %v5423_v9 }
 0x37b   : > { %v1897_v27 = vshrl.u32 %v1867_v22, 16  ;;  %v1868_v33 = vcombine.high %v1867_v22, %v4968_v31 }
 0x37c   : > { %v1896_v16 = vpack.i.b16 %v1892_v23, %v1867_v22  ;;  %v1898_v26 = vshrl.u32 %v1892_v23, 16  ;;  %v1893_v32 = vcombine.high %v1892_v23, %v4968_v31 }
 0x37d   : > { %v1903_v39 = vshrl.u32 %v1868_v33, 16 }
 0x37e   : > { %4145 = vmatmul.mubr.msk.bf16.vlgmr.msra.gmra.mxu1 %vm1911_vm2, %v1896_v16  ;;  %v1899_v29 = vpack.i.b16 %v1898_v26, %v1897_v27  ;;  %v1902_v35 = vpack.i.b16 %v1893_v32, %v1868_v33  ;;  %v1904_v38 = vshrl.u32 %v1893_v32, 16 }
 0x37f   : > { %4149 = vmatpush3.bf16.xpose.msra.mxu1 %v1967_v25  ;;  %4150 = vmatprep.mubr.msk.bf16.mxu1 %vm4962_vm0, %v4961_v10 }
 0x380   : > { %4154 = vmatprep.subr.bf16.mxu1 %v4961_v10  ;;  %v1905_v40 = vpack.i.b16 %v1904_v38, %v1903_v39 }
 0x386   : > { %4151 = vmatmul.mubr.msk.bf16.vlgmr.msra.gmra.mxu1 %vm1911_vm2, %v1899_v29 }
 0x387   : > { %4155 = vmatpush3.bf16.xpose.msra.mxu1 %v2018_v30  ;;  %4156 = vmatprep.mubr.msk.bf16.mxu1 %vm4962_vm0, %v4961_v10 }
 0x388   : > { %4160 = vmatprep.subr.bf16.mxu1 %v4961_v10 }
 0x38e   : > { %4157 = vmatmul.mubr.msk.bf16.vlgmr.msra.gmra.mxu1 %vm1911_vm2, %v1902_v35 }
 0x38f   : > { %4161 = vmatpush3.bf16.xpose.msra.mxu1 %v2069_v36  ;;  %4162 = vmatprep.mubr.msk.bf16.mxu1 %vm4962_vm0, %v4961_v10 }
 0x396   : > { %4163 = vmatmul.mubr.msk.bf16.vlgmr.msra.gmra.mxu1 %vm1911_vm2, %v1905_v40 }
 0x43e   : > { %v1952_v41 = vpop.f32.mrf.mxu1 }
 0x43f   : > { %v2112_v42 = vsel %vm2111_vm3, %v1952_v41, -inf }
 0x440   : > { %2113 = vmax.xlane.f32.xlu1 %v2112_v42  ;;  %v4146_v47 = vpop.f32.mrf.mxu1 }
 0x442   : > { %v1955_v44 = vpop.f32.mrf.mxu1 }
 0x444   : > { %v4147_v48 = vpop.f32.mrf.mxu1 }
 0x446   : > { %v2003_v45 = vpop.f32.mrf.mxu1 }
 0x447   : > { %v2115_v51 = vsel %vm2111_vm3, %v2003_v45, -inf }
 0x448   : > { %2116 = vmax.xlane.f32.xlu0 %v2115_v51  ;;  %v4152_v52 = vpop.f32.mrf.mxu1 }
 0x44a   : > { %v2006_v55 = vpop.f32.mrf.mxu1 }
 0x44c   : > { %v4153_v57 = vpop.f32.mrf.mxu1 }
 0x44e   : > { %v2054_v58 = vpop.f32.mrf.mxu1 }
 0x44f   : > { %v2118_v60 = vsel %vm2111_vm3, %v2054_v58, -inf }
 0x450   : > { %2119 = vmax.xlane.f32.xlu0 %v2118_v60  ;;  %v4158_v53 = vpop.f32.mrf.mxu1 }
 0x451   : > { %1278 = vrot.lane.b32.xlu1 %v937_v59, %s4964_s8 }
 0x452   : > { %v2057_v61 = vpop.f32.mrf.mxu1 }
 0x454   : > { %v4159_v62 = vpop.f32.mrf.mxu1 }
 0x455   : > { %1284 = vrot.lane.b32.xlu1 %v937_v59, %s4963_s10 }
 0x456   : > { %v2105_v63 = vpop.f32.mrf.mxu1 }
 0x457   : > { %v2121_v50 = vsel %vm2111_vm3, %v2105_v63, -inf }
 0x458   : > { %2122 = vmax.xlane.f32.xlu0 %v2121_v50  ;;  %v4164_v1 = vpop.f32.mrf.mxu1 }
 0x459   : > { %1286 = vrot.lane.b32.xlu1 %v5517_v0, %s4963_s10 }
 0x45a   : > { %v2108_v37 = vpop.f32.mrf.mxu1 }
 0x45c   : > { %v4165_v3 = vpop.f32.mrf.mxu1 }
 0x45d   : > { %1290 = vrot.lane.b32.xlu1 %v937_v59, %s4965_s19 }
 0x46e   : > { %1280 = vrot.lane.b32.xlu0 %v5517_v0, %s4964_s8 }
 0x472   : > { %1292 = vrot.lane.b32.xlu0 %v5517_v0, %s4965_s19 }
 0x4c9   : > { %v2114_v4 = vpop.xlane.xlu1 %2113 }
 0x4ca   : > { %v2124_v43 = vsub.f32 %v1952_v41, %v2114_v4 }
 0x4cc   : > { %v2128_v5 = vmul.f32 1.442695, %v2124_v43 }
 0x4cd   : > { %v1279_v6 = vpop.permute.xlu1 %1278 }
 0x4ce   : > { %4516 = vpow2.f32 %v2128_v5 }
 0x4d1   : > { %v1285_v7 = vpop.permute.xlu1 %1284  ;;  %v2117_v8 = vpop.xlane.xlu0 %2116 }
 0x4d2   : > { %v2125_v11 = vsub.f32 %v2003_v45, %v2117_v8  ;;  %v1296_v15 = vcombine.low %v937_v59, %v1285_v7  ;;  %v1297_v18 = vcombine.high %v937_v59, %v1285_v7 }
 0x4d4   : > { %v2130_v13 = vmul.f32 1.442695, %v2125_v11  ;;  %v1304_v16 = vrot.slane %v1296_v15, %v5420_v2  ;;  %v1311_v25 = vrot.slane %v1297_v18, %v5420_v2 }
 0x4d5   : > { %v5527_v14 = vpop.permute.xlu1 %1286 }
 0x4d6   : > { %4518 = vpow2.f32 %v2130_v13  ;;  %v1365_v4 = vcombine.high %v5517_v0, %v5527_v14 }
 0x4d9   : > { %v1291_v19 = vpop.permute.xlu1 %1290  ;;  %v2120_v20 = vpop.xlane.xlu0 %2119 }
 0x4da   : > { %v1312_v21 = vcombine.low %v1279_v6, %v1291_v19  ;;  %v1313_v22 = vcombine.high %v1279_v6, %v1291_v19  ;;  %v2126_v23 = vsub.f32 %v2054_v58, %v2120_v20 }
 0x4db   : > { %v5529_v24 = vpop.eup %4516 }
 0x4dc   : > { %v1320_v26 = vrot.slane %v1312_v21, %v5420_v2  ;;  %v1327_v27 = vrot.slane %v1313_v22, %v5420_v2  ;;  %v2132_v28 = vmul.f32 1.442695, %v2126_v23  ;;  %v2136_v29 = vsel %vm2111_vm3, %v5529_v24, 0.0 }
 0x4dd   : > { %2137 = vadd.xlane.f32.xlu1 %v2136_v29  ;;  %v1379_v23 = vrot.slane %v1365_v4, %v5420_v2 }
 0x4de   : > { %v1328_v30 = vcombine.low %v1304_v16, %v1320_v26  ;;  %v1329_v32 = vcombine.high %v1304_v16, %v1320_v26  ;;  %v1344_v33 = vcombine.low %v1311_v25, %v1327_v27  ;;  %v1345_v34 = vcombine.high %v1311_v25, %v1327_v27 }
 0x4df   : > { %4520 = vpow2.f32 %v2132_v28 }
 0x4e0   : > { %v1336_v35 = vrot.slane %v1328_v30, %v5423_v9  ;;  %v1343_v36 = vrot.slane %v1329_v32, %v5423_v9  ;;  %v1352_v38 = vrot.slane %v1344_v33, %v5423_v9  ;;  %v1359_v39 = vrot.slane %v1345_v34, %v5423_v9 }
 0x4e1   : > { %v2123_v40 = vpop.xlane.xlu0 %2122 }
 0x4e2   : > { %v1432_v41 = vcombine.low %v1336_v35, %v1343_v36  ;;  %v3843_v42 = vcombine.high %v1336_v35, %v1343_v36  ;;  %v1448_v47 = vcombine.low %v1352_v38, %v1359_v39  ;;  %v3844_v44 = vcombine.high %v1352_v38, %v1359_v39 }
 0x4e3   : > { %v5541_v48 = vpop.eup %4518  ;;  %v2127_v45 = vsub.f32 %v2105_v63, %v2123_v40  ;;  %v1364_v63 = vcombine.low %v5517_v0, %v5527_v14 }
 0x4e4   : > { %v1439_v51 = vrot.slane %v1432_v41, %v5420_v2  ;;  %v1447_v52 = vrot.slane %v3843_v42, %v5420_v2  ;;  %v1455_v55 = vrot.slane %v1448_v47, %v5420_v2  ;;  %v1463_v56 = vrot.slane %v3844_v44, %v5420_v2 }
 0x4e5   : > { %v2134_v57 = vmul.f32 1.442695, %v2127_v45  ;;  %v2139_v58 = vsel %vm2111_vm3, %v5541_v48, 0.0  ;;  %v1281_v59 = vpop.permute.xlu0 %1280  ;;  %v1372_v11 = vrot.slane %v1364_v63, %v5420_v2 }
 0x4e6   : > { %v1464_v60 = vcombine.low %v1439_v51, %v1447_v52  ;;  %v1465_v53 = vcombine.high %v1439_v51, %v1447_v52  ;;  %v1480_v61 = vcombine.low %v1455_v55, %v1463_v56  ;;  %v1481_v62 = vcombine.high %v1455_v55, %v1463_v56  ;;  %2140 = vadd.xlane.f32.xlu0 %v2139_v58 }
 0x4e7   : > { %4522 = vpow2.f32 %v2134_v57 }
 0x4e8   : > { %v1472_v50 = vrot.slane %v1464_v60, %v5423_v9  ;;  %v1479_v1 = vrot.slane %v1465_v53, %v5423_v9  ;;  %v1488_v37 = vrot.slane %v1480_v61, %v5423_v9  ;;  %v1495_v3 = vrot.slane %v1481_v62, %v5423_v9 }
 0x4e9   : > { %v1293_v43 = vpop.permute.xlu0 %1292 }
 0x4ea   : > { %v1496_v5 = vcombine.low %v1472_v50, %v1488_v37  ;;  %v1497_v6 = vcombine.high %v1472_v50, %v1488_v37  ;;  %v1498_v7 = vcombine.low %v1479_v1, %v1495_v3  ;;  %v1499_v8 = vcombine.high %v1479_v1, %v1495_v3 }
 0x4eb   : > { %v1380_v13 = vcombine.low %v1281_v59, %v1293_v43  ;;  %v1381_v15 = vcombine.high %v1281_v59, %v1293_v43 }
 0x4ec   : > { %v5558_v18 = vpop.eup %4520  ;;  %v3974_v19 = vpack.c.bf16 %v1496_v5, %v1496_v5  ;;  %v3976_v20 = vpack.c.bf16 %v1497_v6, %v1497_v6  ;;  %v3978_v21 = vpack.c.bf16 %v1498_v7, %v1498_v7  ;;  %v3980_v22 = vpack.c.bf16 %v1499_v8, %v1499_v8 }
 0x4ed   : > { %v1388_v16 = vrot.slane %v1380_v13, %v5420_v2  ;;  %v1395_v0 = vrot.slane %v1381_v15, %v5420_v2  ;;  %v2142_v14 = vsel %vm2111_vm3, %v5558_v18, 0.0 }
 0x4ee   : > { %1600 = vst.msk [vmem:[#allocation3] sm:$0xf] %vm1267_vm1, %v3974_v19  ;;  %1602 = vst.msk [vmem:[#allocation3 + $0x8] sm:$0xf] %vm1267_vm1, %v3976_v20  ;;  %2143 = vadd.xlane.f32.xlu0 %v2142_v14 }
 0x4ef   : > { %1604 = vst.msk [vmem:[#allocation3 + $0x10] sm:$0xf] %vm1267_vm1, %v3978_v21  ;;  %1606 = vst.msk [vmem:[#allocation3 + $0x18] sm:$0xf] %vm1267_vm1, %v3980_v22  ;;  %v1396_v25 = vcombine.low %v1372_v11, %v1388_v16  ;;  %v1397_v26 = vcombine.high %v1372_v11, %v1388_v16  ;;  %v1412_v27 = vcombine.low %v1379_v23, %v1395_v0 }
 0x4f0   : > { %v1413_v28 = vcombine.high %v1379_v23, %v1395_v0 }
 0x4f1   : > { %v1404_v29 = vrot.slane %v1396_v25, %v5423_v9  ;;  %v1411_v30 = vrot.slane %v1397_v26, %v5423_v9  ;;  %v1420_v32 = vrot.slane %v1412_v27, %v5423_v9 }
 0x4f2   : > { %v1427_v33 = vrot.slane %v1413_v28, %v5423_v9 }
 0x4f3   : > { %v1500_v34 = vcombine.low %v1404_v29, %v1411_v30  ;;  %v3845_v35 = vcombine.high %v1404_v29, %v1411_v30 }
 0x4f4   : > { %v1516_v36 = vcombine.low %v1420_v32, %v1427_v33  ;;  %v3846_v38 = vcombine.high %v1420_v32, %v1427_v33  ;;  %v5573_v39 = vpop.eup %4522 }
 0x4f5   : > { %v1507_v40 = vrot.slane %v1500_v34, %v5420_v2  ;;  %v1515_v41 = vrot.slane %v3845_v35, %v5420_v2  ;;  %v2145_v44 = vsel %vm2111_vm3, %v5573_v39, 0.0 }
 0x4f6   : > { %v1523_v42 = vrot.slane %v1516_v36, %v5420_v2  ;;  %v1531_v47 = vrot.slane %v3846_v38, %v5420_v2  ;;  %2146 = vadd.xlane.f32.xlu0 %v2145_v44 }
 0x4f7   : > { %v1532_v45 = vcombine.low %v1507_v40, %v1515_v41  ;;  %v1533_v51 = vcombine.high %v1507_v40, %v1515_v41 }
 0x4f8   : > { %v1548_v52 = vcombine.low %v1523_v42, %v1531_v47  ;;  %v1549_v55 = vcombine.high %v1523_v42, %v1531_v47 }
 0x4f9   : > { %v1540_v56 = vrot.slane %v1532_v45, %v5423_v9  ;;  %v1547_v57 = vrot.slane %v1533_v51, %v5423_v9 }
 0x4fa   : > { %v1556_v58 = vrot.slane %v1548_v52, %v5423_v9  ;;  %v1563_v59 = vrot.slane %v1549_v55, %v5423_v9 }
 0x4fc   : > { %v1564_v60 = vcombine.low %v1540_v56, %v1556_v58  ;;  %v1565_v53 = vcombine.high %v1540_v56, %v1556_v58  ;;  %v1566_v61 = vcombine.low %v1547_v57, %v1563_v59  ;;  %v1567_v62 = vcombine.high %v1547_v57, %v1563_v59 }
 0x4fe   : > { %v3975_v63 = vpack.c.bf16 %v1564_v60, %v1564_v60  ;;  %v3977_v50 = vpack.c.bf16 %v1565_v53, %v1565_v53  ;;  %v3979_v1 = vpack.c.bf16 %v1566_v61, %v1566_v61  ;;  %v3981_v37 = vpack.c.bf16 %v1567_v62, %v1567_v62  ;;  %v4418_v53 = vld [vmem:[#allocation16 + $0x38] sm:$0xff]   ;;  %v4419_v61 = vld [vmem:[#allocation16 + $0x30] sm:$0xff]   ;;  %v4420_v62 = vld [vmem:[#allocation16 + $0x28] sm:$0xff]  }
 0x4ff   : > { %4191 = vmatpush3.bf16.msra.mxu0 %v4418_v53 }
 0x500   : > { %1601 = vst.msk [vmem:[#allocation3 + $0x4] sm:$0xf] %vm1267_vm1, %v3975_v63  ;;  %1603 = vst.msk [vmem:[#allocation3 + $0xc] sm:$0xf] %vm1267_vm1, %v3977_v50  ;;  %4192 = vmatprep.subr.bf16.mxu0 %v4961_v10  ;;  %v4421_v63 = vld [vmem:[#allocation16 + $0x20] sm:$0xff]   ;;  %v4422_v50 = vld [vmem:[#allocation16 + $0x18] sm:$0xff]  }
 0x501   : > { %1605 = vst.msk [vmem:[#allocation3 + $0x14] sm:$0xf] %vm1267_vm1, %v3979_v1  ;;  %1607 = vst.msk [vmem:[#allocation3 + $0x1c] sm:$0xf] %vm1267_vm1, %v3981_v37  ;;  %v4423_v1 = vld [vmem:[#allocation16 + $0x10] sm:$0xff]  }
 0x503   : > { %4193 = vmatpush3.bf16.msra.mxu0 %v4419_v61 }
 0x504   : > { %4194 = vmatprep.subr.bf16.mxu0 %v4961_v10 }
 0x507   : > { %v4414_v3 = vld [vmem:[#allocation3] sm:$0xff]   ;;  %v4416_v43 = vld [vmem:[#allocation3 + $0x8] sm:$0xff]   ;;  %4195 = vmatpush3.bf16.msra.mxu0 %v4420_v62 }
 0x508   : > { %v4415_v4 = vld [vmem:[#allocation3 + $0x10] sm:$0xff]   ;;  %v4417_v5 = vld [vmem:[#allocation3 + $0x18] sm:$0xff]   ;;  %4196 = vmatprep.subr.bf16.mxu0 %v4961_v10 }
 0x50a   : > { %2166 = vxpose.xlu1.c.b16.start.end [1/1] (short) (narrow) %v4414_v3, 32 }
 0x50b   : > { %4197 = vmatpush3.bf16.msra.mxu0 %v4421_v63 }
 0x50c   : > { %4198 = vmatprep.subr.bf16.mxu0 %v4961_v10 }
 0x50f   : > { %2326 = vxpose.xlu1.c.b16.start.end [1/1] (short) (narrow) %v4415_v4, 32  ;;  %4199 = vmatpush3.bf16.msra.mxu0 %v4422_v50 }
 0x510   : > { %4200 = vmatprep.subr.bf16.mxu0 %v4961_v10 }
 0x513   : > { %4201 = vmatpush3.bf16.msra.mxu0 %v4423_v1  ;;  %v4542_v1 = vld [vmem:[%s5263_s24] sm:$0xff]  ;;  %s643_s24 = scalar_lea.vmem [#allocation22], %s3803_s12  ;;  %s4840_s12 = scalar_lea.vmem %s4839_s22, 256 }
 0x514   : > { %4202 = vmatprep.subr.bf16.mxu0 %v4961_v10  ;;  %s3596_s30 = sshll.u32 %s643_s24, 4  ;;  %s3597_s30 = int_to_ptr.vmem [resolvable:$true] %s3596_s30 }
 0x515   : > { %p4841_p3 = scmp.lt.s32.totalorder %s3597_s30, %s4839_s22 }
 0x523   : > { %2246 = vxpose.xlu0.c.b16.start.end [1/1] (short) (narrow) %v4416_v43, 32 }
 0x528   : > { %2406 = vxpose.xlu0.c.b16.start.end [1/1] (short) (narrow) %v4417_v5, 32 }
 0x566   : > { %v2138_v6 = vpop.xlane.xlu1 %2137 }
 0x567   : > { %4524 = vrcp.f32 %v2138_v6 }
 0x56c   : > { %v2174_v7 = vpop.trf.xlu1 }
 0x56d   : > { %4168 = vmatprep.mubr.msk.bf16.mxu1 %vm2111_vm3, %v2174_v7 }
 0x56f   : > { %v2141_v8 = vpop.xlane.xlu0 %2140 }
 0x570   : > { %4526 = vrcp.f32 %v2141_v8  ;;  %v2175_v22 = vpop.trf.xlu1 }
 0x574   : > { %v4525_v11 = vpop.eup %4524  ;;  %v2334_v28 = vpop.trf.xlu1 }
 0x575   : > { %v2152_v13 = vmul.f32 %v4525_v11, %v5529_v24 }
 0x577   : > { %v2144_v15 = vpop.xlane.xlu0 %2143  ;;  %v2156_v19 = vpack.c.bf16 %v2152_v13, %v2152_v13 }
 0x578   : > { %4528 = vrcp.f32 %v2144_v15  ;;  %v2335_v33 = vpop.trf.xlu1 }
 0x579   : > { %4210 = vmatprep.subr.msk.bf16.mxu1 %vm2111_vm3, %v2156_v19  ;;  %v2189_v20 = vsel %vm2111_vm3, %v2156_v19, 0 }
 0x57a   : > { %4167 = vmatpush3.bf16.xpose.msra.mxu1 %v2189_v20 }
 0x57d   : > { %v4527_v21 = vpop.eup %4526 }
 0x57e   : > { %v2153_v23 = vmul.f32 %v4527_v21, %v5541_v48 }
 0x57f   : > { %v2147_v16 = vpop.xlane.xlu0 %2146 }
 0x580   : > { %v2157_v0 = vpack.c.bf16 %v2153_v23, %v2153_v23  ;;  %4530 = vrcp.f32 %v2147_v16  ;;  %v4424_v16 = vld [vmem:[#allocation16 + $0x8] sm:$0xff]  }
 0x581   : > { %4169 = vmatmul.mubr.msk.bf16.vlgmr.msra.gmra.mxu1 %vm2111_vm3, %v2175_v22  ;;  %4203 = vmatpush3.bf16.msra.mxu0 %v4424_v16  ;;  %v4441_v16 = vld [vmem:[#allocation17 + $0xa8] ss:$16 sps:$4 sm:$0xff]  }
 0x582   : > { %4211 = vmatprep.subr.msk.bf16.mxu1 %vm2111_vm3, %v2157_v0  ;;  %v2269_v24 = vsel %vm2111_vm3, %v2157_v0, 0  ;;  %4204 = vmatprep.subr.bf16.mxu0 %v4961_v10 }
 0x583   : > { %4173 = vmatpush3.bf16.xpose.msra.mxu1 %v2269_v24 }
 0x585   : > { %v4529_v14 = vpop.eup %4528  ;;  %v2254_v25 = vpop.trf.xlu0 }
 0x586   : > { %v2154_v26 = vmul.f32 %v4529_v14, %v5558_v18  ;;  %4174 = vmatprep.mubr.msk.bf16.mxu1 %vm2111_vm3, %v2254_v25 }
 0x588   : > { %v2158_v27 = vpack.c.bf16 %v2154_v26, %v2154_v26 }
 0x589   : > { %v2255_v29 = vpop.trf.xlu0 }
 0x58a   : > { %4212 = vmatprep.subr.msk.bf16.mxu1 %vm2111_vm3, %v2158_v27  ;;  %v2349_v48 = vsel %vm2111_vm3, %v2158_v27, 0  ;;  %4175 = vmatmul.mubr.msk.bf16.vlgmr.msra.gmra.mxu1 %vm2111_vm3, %v2255_v29 }
 0x58b   : > { %4179 = vmatpush3.bf16.xpose.msra.mxu1 %v2349_v48  ;;  %4180 = vmatprep.mubr.msk.bf16.mxu1 %vm2111_vm3, %v2334_v28  ;;  %v4425_v48 = vld [vmem:[#allocation16] sm:$0xff]  }
 0x58c   : > { %4205 = vmatpush3.bf16.msra.mxu0 %v4425_v48  ;;  %v4458_v48 = vld [vmem:[#allocation17 + $0x44] ss:$16 sps:$4 sm:$0xff]  }
 0x58d   : > { %v4531_v30 = vpop.eup %4530  ;;  %v2414_v18 = vpop.trf.xlu0 }
 0x58e   : > { %v2155_v32 = vmul.f32 %v4531_v30, %v5573_v39 }
 0x590   : > { %v2159_v34 = vpack.c.bf16 %v2155_v32, %v2155_v32 }
 0x591   : > { %v2415_v36 = vpop.trf.xlu0 }
 0x592   : > { %4181 = vmatmul.mubr.msk.bf16.vlgmr.msra.gmra.mxu1 %vm2111_vm3, %v2335_v33  ;;  %4213 = vmatprep.subr.msk.bf16.mxu1 %vm2111_vm3, %v2159_v34  ;;  %v2429_v35 = vsel %vm2111_vm3, %v2159_v34, 0 }
 0x593   : > { %4185 = vmatpush3.bf16.xpose.msra.mxu1 %v2429_v35  ;;  %4186 = vmatprep.mubr.msk.bf16.mxu1 %vm2111_vm3, %v2414_v18 }
 0x59a   : > { %4187 = vmatmul.mubr.msk.bf16.vlgmr.msra.gmra.mxu1 %vm2111_vm3, %v2415_v36 }
 0x59b   : > { %3144 = vmatprep.mubr.bf16.mxu1 %v4968_v31 }
 0x641   : > { %v4170_v38 = vpop.f32.mrf.mxu1 }
 0x643   : > { %v2225_v40 = vpop.f32.mrf.mxu1 }
 0x644   : > { %2480 = vxpose.xlu1.b32.start [1/4] (short) (narrow) %v2225_v40, 8 }
 0x645   : > { %v4171_v39 = vpop.f32.mrf.mxu1 }
 0x647   : > { %v2228_v41 = vpop.f32.mrf.mxu1 }
 0x648   : > { %2481 = vxpose.xlu1.b32.cont [2/4] (short) (narrow) %v2228_v41, 8 }
 0x64a   : > { %v4176_v42 = vpop.f32.mrf.mxu1 }
 0x64c   : > { %2482 = vxpose.xlu1.b32.cont [3/4] (short) (narrow) %v4170_v38, 8  ;;  %v2305_v47 = vpop.f32.mrf.mxu1 }
 0x64d   : > { %2512 = vxpose.xlu0.b32.start [1/4] (short) (narrow) %v2305_v47, 8 }
 0x64e   : > { %v4177_v44 = vpop.f32.mrf.mxu1 }
 0x650   : > { %2483 = vxpose.xlu1.b32.end [4/4] (short) (narrow) %v4171_v39, 8  ;;  %v2308_v45 = vpop.f32.mrf.mxu1 }
 0x651   : > { %2513 = vxpose.xlu0.b32.cont [2/4] (short) (narrow) %v2308_v45, 8 }
 0x652   : > { %v4182_v51 = vpop.f32.mrf.mxu1 }
 0x654   : > { %v2385_v52 = vpop.f32.mrf.mxu1 }
 0x655   : > { %2514 = vxpose.xlu0.b32.cont [3/4] (short) (narrow) %v4176_v42, 8 }
 0x656   : > { %v4183_v55 = vpop.f32.mrf.mxu1 }
 0x658   : > { %v2388_v56 = vpop.f32.mrf.mxu1 }
 0x659   : > { %2515 = vxpose.xlu0.b32.end [4/4] (short) (narrow) %v4177_v44, 8 }
 0x65a   : > { %v4188_v57 = vpop.f32.mrf.mxu1 }
 0x65c   : > { %v2465_v58 = vpop.f32.mrf.mxu1 }
 0x65d   : > { %2544 = vxpose.xlu0.b32.start [1/4] (short) (narrow) %v2385_v52, 8  ;;  %2576 = vxpose.xlu1.b32.start [1/4] (short) (narrow) %v2465_v58, 8  ;;  %v5641_v58 = vld [vmem:[%s5785_s13 + $0x8] sm:$0xf] }
 0x65e   : > { %v4189_v59 = vpop.f32.mrf.mxu1 }
 0x660   : > { %v2468_v60 = vpop.f32.mrf.mxu1 }
 0x661   : > { %2545 = vxpose.xlu0.b32.cont [2/4] (short) (narrow) %v2388_v56, 8  ;;  %2577 = vxpose.xlu1.b32.cont [2/4] (short) (narrow) %v2468_v60, 8  ;;  %v2873_v60 = vrot.slane %v5641_v58, %v5380_v17 }
 0x665   : > { %2546 = vxpose.xlu0.b32.cont [3/4] (short) (narrow) %v4182_v51, 8  ;;  %2578 = vxpose.xlu1.b32.cont [3/4] (short) (narrow) %v4188_v57, 8 }
 0x669   : > { %2547 = vxpose.xlu0.b32.end [4/4] (short) (narrow) %v4183_v55, 8  ;;  %2579 = vxpose.xlu1.b32.end [4/4] (short) (narrow) %v4189_v59, 8  ;;  %v2781_v59 = vrot.slane %v5641_v58, %v5375_v12 }
 0x6c0   : > { %v2496_v37 = vpop.trf.xlu1 }
 0x6c9   : > { %v2528_v3 = vpop.trf.xlu0 }
 0x6d9   : > { %v2560_v4 = vpop.trf.xlu0  ;;  %v2592_v43 = vpop.trf.xlu1 }
 0x6da   : > { %v2608_v5 = vcombine.low %v2496_v37, %v2560_v4  ;;  %v2609_v6 = vcombine.high %v2496_v37, %v2560_v4  ;;  %v2624_v7 = vcombine.low %v2528_v3, %v2592_v43  ;;  %v2625_v8 = vcombine.high %v2528_v3, %v2592_v43  ;;  %v4428_v4 = vld [vmem:[#allocation17 + $0xe4] ss:$16 sps:$4 sm:$0xff]   ;;  %v4429_v43 = vld [vmem:[#allocation17 + $0xe8] ss:$16 sps:$4 sm:$0xff]  }
 0x6db   : > { %3112 = vmatprep.subr.bf16.mxu1 %v4428_v4  ;;  %v4485_v4 = vld [vmem:[#allocation19 + $0xa8] sm:$0xff]  }
 0x6dc   : > { %v2616_v11 = vrot.slane %v2608_v5, %v5420_v2  ;;  %v2623_v13 = vrot.slane %v2609_v6, %v5420_v2  ;;  %v2632_v15 = vrot.slane %v2624_v7, %v5420_v2  ;;  %v2639_v19 = vrot.slane %v2625_v8, %v5420_v2  ;;  %v4431_v5 = vld [vmem:[#allocation17 + $0xec] ss:$16 sps:$4 sm:$0xff]   ;;  %v4434_v6 = vld [vmem:[#allocation17 + $0xc4] ss:$16 sps:$4 sm:$0xff]   ;;  %v4432_v8 = vld [vmem:[#allocation17 + $0xc0] ss:$16 sps:$4 sm:$0xff]  }
 0x6dd   : > { %v4437_v7 = vld [vmem:[#allocation17 + $0xcc] ss:$16 sps:$4 sm:$0xff]   ;;  %3153 = vmatprep.subr.bf16.mxu0 %v4431_v5  ;;  %v4487_v5 = vld [vmem:[#allocation19 + $0xe0] sm:$0xff]  }
 0x6de   : > { %v2640_v20 = vcombine.low %v2616_v11, %v2632_v15  ;;  %v2641_v21 = vcombine.high %v2616_v11, %v2632_v15  ;;  %v2656_v22 = vcombine.low %v2623_v13, %v2639_v19  ;;  %v2657_v23 = vcombine.high %v2623_v13, %v2639_v19  ;;  %v4435_v11 = vld [vmem:[#allocation17 + $0xc8] ss:$16 sps:$4 sm:$0xff]  }
 0x6e0   : > { %v2648_v0 = vrot.slane %v2640_v20, %v5423_v9  ;;  %v2655_v24 = vrot.slane %v2641_v21, %v5423_v9  ;;  %v2664_v14 = vrot.slane %v2656_v22, %v5423_v9  ;;  %v2671_v25 = vrot.slane %v2657_v23, %v5423_v9  ;;  %v4440_v21 = vld [vmem:[#allocation17 + $0xa4] ss:$16 sps:$4 sm:$0xff]   ;;  %v4443_v22 = vld [vmem:[#allocation17 + $0xac] ss:$16 sps:$4 sm:$0xff]   ;;  %v4438_v23 = vld [vmem:[#allocation17 + $0xa0] ss:$16 sps:$4 sm:$0xff]  }
 0x6e2   : > { %v2676_v26 = vcombine.low %v2648_v0, %v2655_v24  ;;  %v3887_v27 = vcombine.high %v2648_v0, %v2655_v24  ;;  %v2692_v28 = vcombine.low %v2664_v14, %v2671_v25  ;;  %v3888_v29 = vcombine.high %v2664_v14, %v2671_v25  ;;  %v4444_v0 = vld [vmem:[#allocation17 + $0x80] ss:$16 sps:$4 sm:$0xff]   ;;  %v4446_v24 = vld [vmem:[#allocation17 + $0x84] ss:$16 sps:$4 sm:$0xff]   ;;  %v4447_v14 = vld [vmem:[#allocation17 + $0x88] ss:$16 sps:$4 sm:$0xff]  }
 0x6e3   : > { %v4449_v25 = vld [vmem:[#allocation17 + $0x8c] ss:$16 sps:$4 sm:$0xff]  }
 0x6e4   : > { %v2683_v30 = vrot.slane %v2676_v26, %v5420_v2  ;;  %v2691_v32 = vrot.slane %v3887_v27, %v5420_v2  ;;  %v2699_v33 = vrot.slane %v2692_v28, %v5420_v2  ;;  %v2707_v34 = vrot.slane %v3888_v29, %v5420_v2  ;;  %v4452_v26 = vld [vmem:[#allocation17 + $0x64] ss:$16 sps:$4 sm:$0xff]   ;;  %v4455_v27 = vld [vmem:[#allocation17 + $0x6c] ss:$16 sps:$4 sm:$0xff]   ;;  %v4450_v28 = vld [vmem:[#allocation17 + $0x60] ss:$16 sps:$4 sm:$0xff]  }
 0x6e5   : > { %v4453_v29 = vld [vmem:[#allocation17 + $0x68] ss:$16 sps:$4 sm:$0xff]  }
 0x6e6   : > { %v2709_v18 = vcombine.high %v2683_v30, %v2691_v32  ;;  %v2725_v35 = vcombine.high %v2699_v33, %v2707_v34  ;;  %v2708_v36 = vcombine.low %v2683_v30, %v2691_v32  ;;  %v2724_v38 = vcombine.low %v2699_v33, %v2707_v34  ;;  %v4461_v30 = vld [vmem:[#allocation17 + $0x4c] ss:$16 sps:$4 sm:$0xff]   ;;  %v4456_v32 = vld [vmem:[#allocation17 + $0x40] ss:$16 sps:$4 sm:$0xff]   ;;  %v4459_v33 = vld [vmem:[#allocation17 + $0x48] ss:$16 sps:$4 sm:$0xff]  }
 0x6e7   : > { %v4464_v34 = vld [vmem:[#allocation17 + $0x24] ss:$16 sps:$4 sm:$0xff]  }
 0x6e8   : > { %v2723_v10 = vrot.slane %v2709_v18, %v5423_v9  ;;  %v2739_v40 = vrot.slane %v2725_v35, %v5423_v9  ;;  %v2716_v39 = vrot.slane %v2708_v36, %v5423_v9  ;;  %v2732_v41 = vrot.slane %v2724_v38, %v5423_v9  ;;  %v4467_v18 = vld [vmem:[#allocation17 + $0x2c] ss:$16 sps:$4 sm:$0xff]   ;;  %v4462_v35 = vld [vmem:[#allocation17 + $0x20] ss:$16 sps:$4 sm:$0xff]   ;;  %v4465_v36 = vld [vmem:[#allocation17 + $0x28] ss:$16 sps:$4 sm:$0xff]  }
 0x6e9   : > { %v4470_v38 = vld [vmem:[#allocation17 + $0x4] ss:$16 sps:$4 sm:$0xff]  }
 0x6ea   : > { %v2742_v42 = vcombine.low %v2723_v10, %v2739_v40  ;;  %v2741_v47 = vcombine.high %v2716_v39, %v2732_v41  ;;  %v2740_v44 = vcombine.low %v2716_v39, %v2732_v41  ;;  %v2743_v2 = vcombine.high %v2723_v10, %v2739_v40  ;;  %v4473_v10 = vld [vmem:[#allocation17 + $0xc] ss:$16 sps:$4 sm:$0xff]   ;;  %v4468_v40 = vld [vmem:[#allocation17] ss:$16 sps:$4 sm:$0xff]   ;;  %v4471_v39 = vld [vmem:[#allocation17 + $0x8] ss:$16 sps:$4 sm:$0xff]  }
 0x6ec   : > { %2749 = vrot.lane.b32.xlu1 %v2742_v42, %s4963_s10  ;;  %2745 = vrot.lane.b32.xlu0 %v2741_v47, %s4965_s19  ;;  %s3594_s10 = scalar_lea.hbm %s5788_s18, %s3962_s25  ;;  %s4834_s19 = scalar_lea.vmem %s3597_s30, 128 }
 0x6ed   : > { %p4835_p6 = scmp.ne.s32.totalorder %s3597_s30, %s4834_s19  ;;  %p4842_p1 = scmp.lt.s32.totalorder %s4840_s12, %s4834_s19 }
 0x6ef   : > { %p4836_p4 = pnand %p4835_p6, %p5152_p9  ;;  %p4843_p7 = por %p4842_p1, %p4841_p3 }
 0x6f0   : > { %2753 = vrot.lane.b32.xlu1 %v2743_v2, %s4964_s8  ;;  %v2894_v2 = vsub.s32 7, %v5341_v46  ;;  %s3582_s8 = scalar_lea.sflag [#allocation6], %s5258_s6 }
 0x6f1   : > { %p4837_p10 = pneg %p4836_p4 }
 0x6f3   : > { %p4844_p0 = pnand %p4843_p7, %p4837_p10 }
 0x75e   : > { %v2750_v45 = vpop.permute.xlu1 %2749  ;;  %v2746_v51 = vpop.permute.xlu0 %2745 }
 0x75f   : > { %v2756_v52 = vsel %vm1911_vm2, %v2740_v44, %v2746_v51  ;;  %v2889_v44 = vsub.s32 6, %v5341_v46  ;;  %v4477_v46 = vld [vmem:[#allocation19 + $0xb8] sm:$0xff]  }
 0x760   : > { %v2758_v56 = vsel %vm2757_vm4, %v2756_v52, %v2750_v45  ;;  %v4543_v45 = vld [vmem:[%s5785_s13] sm:$0xff] }
 0x761   : > { %v2890_v51 = vrot.slane %v4543_v45, %v2889_v44 }
 0x762   : > { %v2754_v55 = vpop.permute.xlu1 %2753 }
 0x763   : > { %v2760_v9 = vsel %vm2759_vm5, %v2758_v56, %v2754_v55  ;;  %v2895_v56 = vrot.slane %v4543_v45, %v2894_v2 }
 0x764   : > { %v2761_v57 = vpack.c.bf16 %v2760_v9, %v2760_v9 }
 0x766   : > { %4207 = vmatmul.mubr.bf16.vlgmr.msra.gmra.mxu0 %v2761_v57 }
 0x767   : > { %3185 = vmatprep.mubr.bf16.mxu0 %v4968_v31  ;;  %v4426_v31 = vld [vmem:[#allocation17 + $0xe0] ss:$16 sps:$4 sm:$0xff]   ;;  %3154 = vmatpush1.bf16.msra.mxu0 %v4429_v43 }
 0x768   : > { %3113 = vmatpush1.bf16.msra.mxu1 %v4426_v31  ;;  %3155 = vmatprep.subr.bf16.mxu0 %v4437_v7  ;;  %v4484_v31 = vld [vmem:[#allocation19 + $0x28] sm:$0xff]   ;;  %v4486_v43 = vld [vmem:[#allocation19 + $0x60] sm:$0xff]  }
 0x769   : > { %3114 = vmatprep.subr.bf16.mxu1 %v4434_v6  ;;  %v4488_v6 = vld [vmem:[#allocation19 + $0x20] sm:$0xff]  }
 0x76a   : > { %v4489_v7 = vld [vmem:[#allocation19 + $0xa0] sm:$0xff]  }
 0x76b   : > { %3156 = vmatpush1.bf16.msra.mxu0 %v4435_v11  ;;  %v4491_v11 = vld [vmem:[#allocation19 + $0xd8] sm:$0xff]  }
 0x76c   : > { %3115 = vmatpush1.bf16.msra.mxu1 %v4432_v8  ;;  %3157 = vmatprep.subr.bf16.mxu0 %v4443_v22  ;;  %v4490_v8 = vld [vmem:[#allocation19 + $0x58] sm:$0xff]   ;;  %v4497_v22 = vld [vmem:[#allocation19 + $0x90] sm:$0xff]  }
 0x76d   : > { %3116 = vmatprep.subr.bf16.mxu1 %v4440_v21  ;;  %v4496_v21 = vld [vmem:[#allocation19 + $0x10] sm:$0xff]  }
 0x76f   : > { %3158 = vmatpush1.bf16.msra.mxu0 %v4441_v16  ;;  %v4499_v16 = vld [vmem:[#allocation19 + $0xc8] sm:$0xff]  }
 0x770   : > { %3117 = vmatpush1.bf16.msra.mxu1 %v4438_v23  ;;  %3159 = vmatprep.subr.bf16.mxu0 %v4449_v25  ;;  %v4498_v23 = vld [vmem:[#allocation19 + $0x48] sm:$0xff]   ;;  %v4503_v25 = vld [vmem:[#allocation19 + $0xc0] sm:$0xff]  }
 0x771   : > { %3118 = vmatprep.subr.bf16.mxu1 %v4446_v24  ;;  %v4501_v24 = vld [vmem:[#allocation19 + $0x88] sm:$0xff]  }
 0x773   : > { %3160 = vmatpush1.bf16.msra.mxu0 %v4447_v14  ;;  %v4502_v14 = vld [vmem:[#allocation19 + $0x40] sm:$0xff]  }
 0x774   : > { %3119 = vmatpush1.bf16.msra.mxu1 %v4444_v0  ;;  %3161 = vmatprep.subr.bf16.mxu0 %v4455_v27  ;;  %v4500_v0 = vld [vmem:[#allocation19 + $0x8] sm:$0xff]   ;;  %v4505_v27 = vld [vmem:[#allocation19 + $0x80] sm:$0xff]  }
 0x775   : > { %3120 = vmatprep.subr.bf16.mxu1 %v4452_v26  ;;  %v4504_v26 = vld [vmem:[#allocation19] sm:$0xff]  }
 0x777   : > { %3162 = vmatpush1.bf16.msra.mxu0 %v4453_v29 }
 0x778   : > { %3121 = vmatpush1.bf16.msra.mxu1 %v4450_v28  ;;  %3163 = vmatprep.subr.bf16.mxu0 %v4461_v30  ;;  %v2930_v28 = vld [vmem:[%s5786_s4] sm:$0xf] }
 0x779   : > { %3122 = vmatprep.subr.bf16.mxu1 %v4458_v48  ;;  %v2935_v29 = vrot.slane %v2930_v28, %v5375_v12  ;;  %v2943_v48 = vrot.slane %v2930_v28, %v5348_v49  ;;  %v2939_v30 = vrot.slane %v2930_v28, %v5380_v17 }
 0x77b   : > { %3164 = vmatpush1.bf16.msra.mxu0 %v4459_v33 }
 0x77c   : > { %3123 = vmatpush1.bf16.msra.mxu1 %v4456_v32  ;;  %3165 = vmatprep.subr.bf16.mxu0 %v4467_v18  ;;  %v2947_v32 = vrot.slane %v2930_v28, %v5359_v54 }
 0x77d   : > { %3124 = vmatprep.subr.bf16.mxu1 %v4464_v34 }
 0x77f   : > { %3166 = vmatpush1.bf16.msra.mxu0 %v4465_v36 }
 0x780   : > { %3125 = vmatpush1.bf16.msra.mxu1 %v4462_v35  ;;  %3167 = vmatprep.subr.bf16.mxu0 %v4473_v10 }
 0x781   : > { %3126 = vmatprep.subr.bf16.mxu1 %v4470_v38 }
 0x783   : > { %3168 = vmatpush1.bf16.msra.mxu0 %v4471_v39 }
 0x784   : > { %3127 = vmatpush1.bf16.msra.mxu1 %v4468_v40 }
 0x826   : > { %v2864_v53 = vpop.f32.mrf.mxu0 }
 0x827   : > { %v2865_v61 = vadd.f32 %v2864_v53, %v2781_v59  ;;  %v4475_v53 = vld [vmem:[#allocation19 + $0xf8] sm:$0xff]  }
 0x828   : > { %v4208_v62 = vpop.f32.mrf.mxu0  ;;  %4060 = vmatprep.subr.bf16.mxu0 %v4475_v53 }
 0x829   : > { %v2874_v63 = vmul.f32 %v2873_v60, %v2865_v61  ;;  %v4474_v60 = vld [vmem:[#allocation19 + $0x78] sm:$0xff]   ;;  %v4478_v62 = vld [vmem:[#allocation19 + $0x70] sm:$0xff]  }
 0x82a   : > { %v2867_v50 = vpop.f32.mrf.mxu0  ;;  %v4476_v61 = vld [vmem:[#allocation19 + $0x38] sm:$0xff]   ;;  %4038 = vmatprep.subr.bf16.mxu1 %v4474_v60 }
 0x82b   : > { %v2875_v37 = vadd.f32 %v4542_v1, %v2874_v63  ;;  %v4479_v63 = vld [vmem:[#allocation19 + $0xf0] sm:$0xff]  }
 0x82c   : > { %v4209_v3 = vpop.f32.mrf.mxu0  ;;  %v4480_v50 = vld [vmem:[#allocation19 + $0x30] sm:$0xff]  }
 0x82d   : > { %2876 = vadd.xlane.f32.xlu1 %v2875_v37  ;;  %v4481_v1 = vld [vmem:[#allocation19 + $0xb0] sm:$0xff]   ;;  %v4483_v3 = vld [vmem:[#allocation19 + $0xe8] sm:$0xff]  }
 0x8b6   : > { %v2877_v13 = vpop.xlane.xlu1 %2876 }
 0x8b7   : > { %v2878_v15 = vmul.f32 0.0078125, %v2877_v13  ;;  %v4492_v13 = vld [vmem:[#allocation19 + $0x18] sm:$0xff]  }
 0x8b9   : > { %v2879_v19 = vsub.f32 %v2875_v37, %v2878_v15  ;;  %v4482_v37 = vld [vmem:[#allocation19 + $0x68] sm:$0xff]   ;;  %v4493_v15 = vld [vmem:[#allocation19 + $0x98] sm:$0xff]  }
 0x8bb   : > { %v2880_v20 = vmul.f32 %v2879_v19, %v2879_v19 }
 0x8bd   : > { %2881 = vadd.xlane.f32.xlu0 %v2880_v20  ;;  %v4495_v20 = vld [vmem:[#allocation19 + $0xd0] sm:$0xff]  }
 0x946   : > { %v2882_v41 = vpop.xlane.xlu0 %2881 }
 0x947   : > { %v2883_v42 = vmul.f32 0.0078125, %v2882_v41 }
 0x949   : > { %v2884_v47 = vadd.f32 1e-06, %v2883_v42 }
 0x94b   : > { %4532 = vrsqrt.f32 %v2884_v47 }
 0x958   : > { %v4533_v52 = vpop.eup %4532 }
 0x959   : > { %v2886_v55 = vmul.f32 %v4533_v52, %v2879_v19  ;;  %v4494_v19 = vld [vmem:[#allocation19 + $0x50] sm:$0xff]  }
 0x95b   : > { %v2891_v9 = vmul.f32 %v2890_v51, %v2886_v55 }
 0x95d   : > { %v5653_v57 = vadd.f32 %v2895_v56, %v2891_v9 }
 0x95f   : > { %v2897_v59 = vpack.c.bf16 %v5653_v57, %v5653_v57 }
 0x961   : > { %3145 = vmatmul.mubr.bf16.vlgmr.msra.gmra.mxu1 %v2897_v59  ;;  %3186 = vmatmul.mubr.bf16.vlgmr.msra.gmra.mxu0 %v2897_v59 }
 0x962   : > { %4039 = vmatpush3.bf16.msra.mxu1 %v4476_v61  ;;  %4061 = vmatpush3.bf16.msra.mxu0 %v4477_v46 }
 0x963   : > { %4040 = vmatprep.subr.bf16.mxu1 %v4478_v62  ;;  %4062 = vmatprep.subr.bf16.mxu0 %v4479_v63 }
 0x966   : > { %4041 = vmatpush3.bf16.msra.mxu1 %v4480_v50  ;;  %4063 = vmatpush3.bf16.msra.mxu0 %v4481_v1 }
 0x967   : > { %4042 = vmatprep.subr.bf16.mxu1 %v4482_v37  ;;  %4064 = vmatprep.subr.bf16.mxu0 %v4483_v3 }
 0x96a   : > { %4043 = vmatpush3.bf16.msra.mxu1 %v4484_v31  ;;  %4065 = vmatpush3.bf16.msra.mxu0 %v4485_v4 }
 0x96b   : > { %4044 = vmatprep.subr.bf16.mxu1 %v4486_v43  ;;  %4066 = vmatprep.subr.bf16.mxu0 %v4487_v5 }
 0x96e   : > { %4045 = vmatpush3.bf16.msra.mxu1 %v4488_v6  ;;  %4067 = vmatpush3.bf16.msra.mxu0 %v4489_v7 }
 0x96f   : > { %4046 = vmatprep.subr.bf16.mxu1 %v4490_v8  ;;  %4068 = vmatprep.subr.bf16.mxu0 %v4491_v11 }
 0x972   : > { %4047 = vmatpush3.bf16.msra.mxu1 %v4492_v13  ;;  %4069 = vmatpush3.bf16.msra.mxu0 %v4493_v15 }
 0x973   : > { %4048 = vmatprep.subr.bf16.mxu1 %v4494_v19  ;;  %4070 = vmatprep.subr.bf16.mxu0 %v4495_v20 }
 0x976   : > { %4049 = vmatpush3.bf16.msra.mxu1 %v4496_v21  ;;  %4071 = vmatpush3.bf16.msra.mxu0 %v4497_v22 }
 0x977   : > { %4050 = vmatprep.subr.bf16.mxu1 %v4498_v23  ;;  %4072 = vmatprep.subr.bf16.mxu0 %v4499_v16 }
 0x97a   : > { %4051 = vmatpush3.bf16.msra.mxu1 %v4500_v0  ;;  %4073 = vmatpush3.bf16.msra.mxu0 %v4501_v24 }
 0x97b   : > { %4052 = vmatprep.subr.bf16.mxu1 %v4502_v14  ;;  %4074 = vmatprep.subr.bf16.mxu0 %v4503_v25 }
 0x97e   : > { %4053 = vmatpush3.bf16.msra.mxu1 %v4504_v26  ;;  %4075 = vmatpush3.bf16.msra.mxu0 %v4505_v27  ;;  %v3301_v27 = vrot.slane %v5641_v58, %v5359_v54 }
 0xa21   : > { %v3146_v33 = vpop.f32.mrf.mxu1  ;;  %v3187_v34 = vpop.f32.mrf.mxu0 }
 0xa22   : > { %v3147_v18 = vadd.f32 %v3146_v33, %v2935_v29  ;;  %v3188_v35 = vadd.f32 %v3187_v34, %v2943_v48  ;;  %v3577_v34 = vrot.slane %v5641_v58, %v5348_v49 }
 0xa23   : > { %v3148_v36 = vpop.f32.mrf.mxu1  ;;  %v3189_v38 = vpop.f32.mrf.mxu0 }
 0xa24   : > { %v3198_v10 = vmul.f32 0.044715, %v3147_v18  ;;  %v3200_v40 = vmul.f32 0.044715, %v3188_v35  ;;  %v3149_v39 = vadd.f32 %v3148_v36, %v2939_v30  ;;  %v3190_v41 = vadd.f32 %v3189_v38, %v2947_v32 }
 0xa25   : > { %v3150_v42 = vpop.f32.mrf.mxu1  ;;  %v3191_v47 = vpop.f32.mrf.mxu0  ;;  %v3194_v5 = vmul.f32 0.5, %v3147_v18  ;;  %v3196_v13 = vmul.f32 0.5, %v3188_v35 }
 0xa26   : > { %v3202_v44 = vmul.f32 %v3198_v10, %v3147_v18  ;;  %v3204_v12 = vmul.f32 %v3200_v40, %v3188_v35  ;;  %v3199_v2 = vmul.f32 0.044715, %v3149_v39  ;;  %v3201_v45 = vmul.f32 0.044715, %v3190_v41 }
 0xa27   : > { %v3151_v51 = vpop.f32.mrf.mxu1  ;;  %v3192_v17 = vpop.f32.mrf.mxu0  ;;  %v3195_v8 = vmul.f32 0.5, %v3149_v39  ;;  %v3197_v15 = vmul.f32 0.5, %v3190_v41 }
 0xa28   : > { %v3206_v52 = vmul.f32 %v3202_v44, %v3147_v18  ;;  %v3208_v55 = vmul.f32 %v3204_v12, %v3188_v35  ;;  %v3203_v56 = vmul.f32 %v3199_v2, %v3149_v39  ;;  %v3205_v9 = vmul.f32 %v3201_v45, %v3190_v41 }
 0xa2a   : > { %v3210_v59 = vadd.f32 %v3206_v52, %v3147_v18  ;;  %v3212_v60 = vadd.f32 %v3208_v55, %v3188_v35  ;;  %v3207_v53 = vmul.f32 %v3203_v56, %v3149_v39  ;;  %v3209_v61 = vmul.f32 %v3205_v9, %v3190_v41 }
 0xa2c   : > { %v3214_v46 = vmul.f32 0.7978846, %v3210_v59  ;;  %v3216_v62 = vmul.f32 0.7978846, %v3212_v60  ;;  %v3211_v63 = vadd.f32 %v3207_v53, %v3149_v39  ;;  %v3213_v50 = vadd.f32 %v3209_v61, %v3190_v41 }
 0xa2e   : > { %v3215_v1 = vmul.f32 0.7978846, %v3211_v63  ;;  %v3217_v37 = vmul.f32 0.7978846, %v3213_v50  ;;  %4534 = vtanh.f32 %v3214_v46 }
 0xa2f   : > { %4536 = vtanh.f32 %v3216_v62 }
 0xa30   : > { %4538 = vtanh.f32 %v3215_v1 }
 0xa31   : > { %4540 = vtanh.f32 %v3217_v37 }
 0xa3b   : > { %v4535_v3 = vpop.eup %4534 }
 0xa3c   : > { %v4537_v31 = vpop.eup %4536  ;;  %v3222_v4 = vadd.f32 1.0, %v4535_v3 }
 0xa3d   : > { %v4539_v43 = vpop.eup %4538  ;;  %v3224_v6 = vadd.f32 1.0, %v4537_v31 }
 0xa3e   : > { %v4541_v7 = vpop.eup %4540  ;;  %v3223_v11 = vadd.f32 1.0, %v4539_v43  ;;  %v3226_v20 = vmul.f32 %v3222_v4, %v3194_v5 }
 0xa3f   : > { %v3225_v19 = vadd.f32 1.0, %v4541_v7  ;;  %v3228_v22 = vmul.f32 %v3224_v6, %v3196_v13 }
 0xa40   : > { %v3227_v21 = vmul.f32 %v3223_v11, %v3195_v8  ;;  %v3230_v24 = vpack.c.bf16 %v3226_v20, %v3226_v20 }
 0xa41   : > { %v3229_v23 = vmul.f32 %v3225_v19, %v3197_v15  ;;  %v3232_v14 = vpack.c.bf16 %v3228_v22, %v3228_v22 }
 0xa42   : > { %v3231_v16 = vpack.c.bf16 %v3227_v21, %v3227_v21 }
 0xa43   : > { %v3233_v0 = vpack.c.bf16 %v3229_v23, %v3229_v23 }
 0xa44   : > { %3526 = vmatprep.mubr.bf16.mxu1 %v3231_v16 }
 0xa45   : > { %3566 = vmatprep.mubr.bf16.mxu0 %v3233_v0  ;;  %3527 = vmatmul.mubr.bf16.vlgmr.msra.gmra.mxu1 %v3230_v24 }
 0xa46   : > { %3567 = vmatmul.mubr.bf16.vlgmr.msra.gmra.mxu0 %v3232_v14 }
 0xb05   : > { %v4054_v25 = vpop.f32.mrf.mxu1 }
 0xb06   : > { %v4076_v26 = vpop.f32.mrf.mxu0 }
 0xb07   : > { %v4055_v28 = vpop.f32.mrf.mxu1 }
 0xb08   : > { %v4056_v29 = vadd.f32 %v4055_v28, %v4054_v25  ;;  %v4077_v48 = vpop.f32.mrf.mxu0 }
 0xb09   : > { %v4057_v30 = vpop.f32.mrf.mxu1  ;;  %v4078_v33 = vadd.f32 %v4077_v48, %v4076_v26 }
 0xb0a   : > { %v3529_v32 = vadd.f32 %v4056_v29, %v3301_v27  ;;  %v4079_v18 = vpop.f32.mrf.mxu0 }
 0xb0b   : > { %v4058_v35 = vpop.f32.mrf.mxu1 }
 0xb0c   : > { %v3569_v36 = vadd.f32 %v4078_v33, %v3529_v32  ;;  %v4080_v38 = vpop.f32.mrf.mxu0 }
 0xb0e   : > { %v3578_v54 = vmul.f32 %v3577_v34, %v3569_v36 }
 0xb10   : > { %v3579_v10 = vadd.f32 %v3578_v54, %v5653_v57 }
 0xb12   : > { %3580 = vst [vmem:[%s643_s24] sm:$0xff] %v3579_v10 }
 0xb13   : > { %4847 = shalt.err (!%p4844_p0)
}
 0xb14   : > { %s4848_s23 = scalar_lea.hbm %s3594_s10, 128  ;;  %s4852_s17 = scalar_lea.hbm %s5788_s18, 256 }
 0xb15   : > { %p4849_p13 = scmp.ne.s32.totalorder %s3594_s10, %s4848_s23  ;;  %p4853_p2 = scmp.lt.s32.totalorder %s3594_s10, %s5788_s18 }
 0xb16   : > { %p4854_p11 = scmp.lt.s32.totalorder %s4852_s17, %s4848_s23 }
 0xb17   : > { %p4850_p12 = pnand %p4849_p13, %p5152_p9 }
 0xb18   : > { %p4855_p5 = por %p4854_p11, %p4853_p2 }
 0xb19   : > { %p4851_p8 = pneg %p4850_p12 }
 0xb1b   : > { %p4856_p6 = pnand %p4855_p5, %p4851_p8 }
 0xb1d   : > { %4859 = shalt.err (!%p4856_p6)
}
 0xb1e   : > { %4254 = dma.vmem_to_hbm [thread:$0]  (%p5152_p9), %s3597_s30, 128, %s3594_s10, %s3582_s8  }
 0xb1f PF: > { %s5789_s27 = sld [smem:[#allocation32_spill]]  ;;  %p5791_p4 = scmp.ne.s32.totalorder %s5765_s21, 0 }
 0xb20   : > { %s5790_s25 = sld [smem:[#allocation35_spill]] }
 0xb25   : > { %s3608_s24 = sand.u32 1, %s5789_s27  }
 0xb26   : > { %p5792_p10 = scmp.ge.s32.totalorder %s5790_s25, 2  ;;  %s3609_s15 = scalar_lea.sflag [#allocation6], %s3608_s24 }
 0xb28   : > { %p4292_p3 = pnand %p5792_p10, %p5791_p4 }
 0xb2a   : > { %p4293_p1 = pneg %p4292_p3 }
 0xb2c   : > { %4917 = dma.done.wait (%p4293_p1), %s3609_s15, 128  }
 0xb2d   : > { %4919 = vsyncadd (%p4293_p1), %s3609_s15, 4294967168  ;;  %s34_s30 = sadd.s32 1, %s5790_s25   ;;  %s5793_s14 = sld [smem:[#allocation33_spill]] }
 0xb2e   : > { %p31_p7 = scmp.ge.s32.totalorder %s34_s30, 4   ;;  %s5794_s27 = sld [smem:[#allocation37_spill]] }
 0xb2f   : > { %s5795_s1 = sld [smem:[#allocation36_spill]]  ;;  %s5796_s25 = smov %s4926_s26 }
 0xb30   : > { %s5798_s28 = smov %s4938_s29 }
 0xb31   :  { %33 = sbr.rel (!%p31_p7) target bundleno = 19 (0x13), region = 169 }
 0xb33   : > { %s5797_s26 = smov %s5793_s14 }
 0xb35   : > { %s5799_s29 = smov %s5795_s1 }
 0xb36   :  { %3614 = vsyncpa [#allocation5], 1 }
 0xb37   :  { %3616 = vsyncpa [#allocation5 + $0x1], 1 }
 0xb38   :  { %3617 = vsyncpa [#allocation8], 1 }
 0xb39   :  { %3618 = vsyncpa [#allocation12], 1 }
 0xb3a   :  { %3619 = vsyncpa [#allocation15], 1 }
 0xb3b   :  { %3620 = vsyncpa [#allocation18], 1 }
 0xb3c   :  { %3621 = vsyncpa [#allocation21], 1 }
 0xb3d   :  { %3622 = vsyncpa [#allocation6], 1 }
 0xb3e   :  { %3624 = vsyncpa [#allocation6 + $0x1], 1 }

// kernel: tpu_custom_call.1
= control target key start
LH: loop header
LB: loop body
LE: loop exit
PB: predicated region body
PF: predicated region fallthrough
CT: control target
= control target key end

     0   :  { %s5711_s0 = inlined_call_operand.hbm [shape: f32[2,8,128], index: 0, kind: input, shape index: {}]   ;;  %s5712_s1 = inlined_call_operand.hbm [shape: f32[1,8,128], index: 1, kind: input, shape index: {}]   ;;  %s5713_s2 = inlined_call_operand.hbm [shape: f32[2,16,128], index: 2, kind: input, shape index: {}]   ;;  %s5714_s3 = inlined_call_operand.hbm [shape: f32[1,16,128], index: 3, kind: input, shape index: {}]   ;;  %s5715_s4 = inlined_call_operand.hbm [shape: bf16[128,128], index: 4, kind: input, shape index: {}]   ;;  %s5716_s5 = inlined_call_operand.hbm [shape: bf16[128,128], index: 5, kind: input, shape index: {}]   ;;  %s5717_s6 = inlined_call_operand.hbm [shape: bf16[128,128], index: 6, kind: input, shape index: {}]   ;;  %s5718_s7 = inlined_call_operand.hbm [shape: bf16[128,128], index: 7, kind: input, shape index: {}]   ;;  %s5719_s8 = inlined_call_operand.hbm [shape: bf16[128,512], index: 8, kind: input, shape index: {}]   ;;  %s5720_s9 = inlined_call_operand.hbm [shape: bf16[512,128], index: 9, kind: input, shape index: {}]   ;;  %s5721_s10 = inlined_call_operand.vmem [shape: f32[12,128], index: 10, kind: input, shape index: {}]   ;;  %s5722_s11 = inlined_call_operand.hbm [shape: f32[2,128], index: 11, kind: input, shape index: {}]   ;;  %s5723_s12 = inlined_call_operand.vmem [shape: f32[1,512], index: 12, kind: input, shape index: {}]   ;;  %s5724_s13 = inlined_call_operand.hbm [shape: f32[2,8,128], index: 13, kind: output, shape index: {}]  }
   0x1   :  { %5741 = sst [smem:[#allocation38_spill]] %s5712_s1 }
   0x2   :  { %5742 = sst [smem:[#allocation39_spill]] %s5715_s4 }
   0x3   :  { %5743 = sst [smem:[#allocation40_spill]] %s5717_s6 }
   0x4   :  { %5744 = sst [smem:[#allocation41_spill]] %s5719_s8 }
   0x5   :  { %5745 = sst [smem:[#allocation42_spill]] %s5721_s10 }
   0x6   :  { %5746 = sst [smem:[#allocation43_spill]] %s5723_s12 }
   0x7   :  { %5747 = sst [smem:[#allocation44_spill]] %s5724_s13 }
   0x8   :  { %18 = vsyncpa [#allocation5], 0 }
   0x9   :  { %20 = vsyncpa [#allocation5 + $0x1], 0 }
   0xa   :  { %21 = vsyncpa [#allocation8], 0 }
   0xb   :  { %22 = vsyncpa [#allocation12], 0 }
   0xc   :  { %23 = vsyncpa [#allocation15], 0 }
   0xd   :  { %24 = vsyncpa [#allocation18], 0 }
   0xe   :  { %25 = vsyncpa [#allocation21], 0 }
   0xf   :  { %26 = vsyncpa [#allocation6], 0 }
  0x10   :  { %28 = vsyncpa [#allocation6 + $0x1], 0  ;;  %s5040_s25 = smov 0   ;;  %s5042_s26 = smov 0  }
  0x11   :  { %s5044_s27 = smov 0   ;;  %s5046_s28 = smov 0  }
  0x12   :  { %s5048_s29 = smov 0   ;;  %s5050_s30 = smov 0  }
  0x13 LB: > { %5748 = sst [smem:[#allocation32_spill]] %s4922_s25  ;;  %s5071_s14 = sadd.s32 4294967295, %s4942_s30   ;;  %s4942_s30 = sphi %s5050_s30, %s34_s30   ;;  %s4938_s29 = sphi %s5048_s29, %s5799_s29   ;;  %s4934_s28 = sphi %s5046_s28, %s5798_s28   ;;  %s4930_s27 = sphi %s5044_s27, %s5794_s27   ;;  %s4926_s26 = sphi %s5042_s26, %s5797_s26   ;;  %s4922_s25 = sphi %s5040_s25, %s5796_s25  }
  0x14   : > { %5749 = sst [smem:[#allocation33_spill]] %s4930_s27  ;;  %p3786_p0 = scmp.ge.s32.totalorder %s4942_s30, 1 }
  0x15   : > { %5750 = sst [smem:[#allocation34_spill]] %s4934_s28  ;;  %p5725_p1 = scmp.eq.s32.totalorder %s5071_s14, 0 }
  0x16   : > { %5751 = sst [smem:[#allocation35_spill]] %s4942_s30  ;;  %p369_p2 = scmp.lt.s32.totalorder %s4942_s30, 3 }
  0x17   : > { %s4944_s16 = smov [#allocation7]   ;;  %s4945_s18 = smov [#allocation11]  }
  0x18   : > { %p5076_p3 = pnand %p3786_p0, %p369_p2  ;;  %s384_s17 = sshll.u32 %s4944_s16, 4  ;;  %s385_s17 = int_to_ptr.vmem [resolvable:$true] %s384_s17 }
  0x19   : > { %s407_s19 = sshll.u32 %s4945_s18, 4  ;;  %s4946_s21 = smov [#allocation14]   ;;  %s408_s19 = int_to_ptr.vmem [resolvable:$true] %s407_s19 }
  0x1a   : > { %s5752_s15 = scalar_select %p5076_p3, 1, 0 }
  0x1b   : > { %p4256_p5 = pneg %p5076_p3  ;;  %s433_s22 = sshll.u32 %s4946_s21, 4  ;;  %s434_s22 = int_to_ptr.vmem [resolvable:$true] %s433_s22 }
  0x1c   : > { %s4555_s24 = scalar_lea.vmem %s385_s17, 128  ;;  %p4563_p11 = scmp.lt.s32.totalorder %s385_s17, %s385_s17 }
  0x1d   : > { %p5085_p6 = pnand %p4256_p5, %p5725_p1  ;;  %p4556_p8 = scmp.ne.s32.totalorder %s385_s17, %s4555_s24 }
  0x1e   : > { %p4564_p12 = scmp.lt.s32.totalorder %s4555_s24, %s4555_s24 }
  0x1f   : > { %p5091_p7 = pneg %p5085_p6 }
  0x20   : > { %p4565_p13 = por %p4564_p12, %p4563_p11 }
  0x21   : > { %p4558_p9 = pnand %p4556_p8, %p5091_p7 }
  0x23   : > { %p4559_p10 = pneg %p4558_p9 }
  0x25   : > { %p4566_p0 = pnand %p4565_p13, %p4559_p10 }
  0x27   : > { %4569 = shalt.err (!%p4566_p0)
}
  0x28   : > { %s5755_s1 = sld [smem:[#allocation38_spill]]  ;;  %s4581_s21 = scalar_lea.vmem %s408_s19, 1024 }
  0x29   : > { %p4582_p2 = scmp.ne.s32.totalorder %s408_s19, %s4581_s21  ;;  %p4589_p1 = scmp.lt.s32.totalorder %s408_s19, %s408_s19 }
  0x2a   : > { %p4590_p8 = scmp.lt.s32.totalorder %s4581_s21, %s4581_s21 }
  0x2b   : > { %p4584_p5 = pnand %p4582_p2, %p5091_p7 }
  0x2c   : > { %p4591_p9 = por %p4590_p8, %p4589_p1 }
  0x2d   : > { %p4585_p4 = pneg %p4584_p5 }
  0x2e   : > { %4259 = dma.hbm_to_vmem [thread:$0]  (!%p5085_p6), %s5755_s1, 128, %s385_s17, [#allocation8]  }
  0x2f   : > { %p4592_p3 = pnand %p4591_p9, %p4585_p4 }
  0x31   : > { %4595 = shalt.err (!%p4592_p3)
}
  0x32   : > { %s5728_s24 = smov 64   ;;  %s5730_s13 = smov 4  }
  0x33   : > { %s5756_s4 = sld [smem:[#allocation39_spill]]  ;;  %s4607_s18 = scalar_lea.vmem %s434_s22, 1024 }
  0x34   : > { %p4608_p10 = scmp.ne.s32.totalorder %s434_s22, %s4607_s18  ;;  %p4615_p4 = scmp.lt.s32.totalorder %s434_s22, %s434_s22 }
  0x35   : > { %p4616_p3 = scmp.lt.s32.totalorder %s4607_s18, %s4607_s18 }
  0x36   : > { %p4610_p11 = pnand %p4608_p10, %p5091_p7 }
  0x37   : > { %p4617_p12 = por %p4616_p3, %p4615_p4 }
  0x38   : > { %p4611_p1 = pneg %p4610_p11 }
  0x39   : > { %4265 = dma.hbm_to_vmem [thread:$0]  (!%p5085_p6), %s5756_s4, 1024, %s408_s19, [#allocation12], %s5728_s24, %s5728_s24, %s5730_s13  }
  0x3a   : > { %p4618_p13 = pnand %p4617_p12, %p4611_p1 }
  0x3c   : > { %4621 = shalt.err (!%p4618_p13)
}
  0x3d   : > { %s5757_s6 = sld [smem:[#allocation40_spill]]  ;;  %s4949_s19 = smov [#allocation17]  }
  0x3e   : > { %s459_s16 = sshll.u32 %s4949_s19, 4  ;;  %s460_s16 = int_to_ptr.vmem [resolvable:$true] %s459_s16 }
  0x3f   : > { %s4633_s17 = scalar_lea.vmem %s460_s16, 4096  ;;  %p4641_p8 = scmp.lt.s32.totalorder %s460_s16, %s460_s16 }
  0x40   : > { %p4634_p0 = scmp.ne.s32.totalorder %s460_s16, %s4633_s17  ;;  %p4642_p9 = scmp.lt.s32.totalorder %s4633_s17, %s4633_s17 }
  0x42   : > { %p4636_p2 = pnand %p4634_p0, %p5091_p7  ;;  %p4643_p10 = por %p4642_p9, %p4641_p8 }
  0x43   : > { %4271 = dma.hbm_to_vmem [thread:$0]  (!%p5085_p6), %s5757_s6, 1024, %s434_s22, [#allocation15], %s5728_s24, %s5728_s24, %s5730_s13  }
  0x44   : > { %p4637_p5 = pneg %p4636_p2 }
  0x46   : > { %p4644_p11 = pnand %p4643_p10, %p4637_p5 }
  0x48   : > { %4647 = shalt.err (!%p4644_p11)
}
  0x49   : > { %s4950_s18 = smov 256   ;;  %s4951_s1 = smov 16  }
  0x4a   : > { %s5758_s8 = sld [smem:[#allocation41_spill]]  ;;  %s3785_s19 = sadd.s32 4294967294, %s4942_s30  }
  0x4b   : > { %s46_s17 = sadd.s32 1, %s4938_s29  ;;  %s55_s24 = sadd.s32 1, %s4930_s27 }
  0x4c   : > { %p48_p1 = scmp.ge.s32.totalorder %s46_s17, 2  ;;  %p62_p4 = scmp.ne.s32.totalorder %s4930_s27, %s4926_s26 }
  0x4d   : > { %p63_p3 = scmp.eq.s32.totalorder %s4942_s30, 0  ;;  %p68_p13 = scmp.ne.s32.totalorder %s4926_s26, %s4922_s25 }
  0x4e   : > { %s5801_s17 = smov (%p48_p1, %s46_s17), 0  ;;  %p356_p0 = scmp.eq.s32.totalorder %s5071_s14, 1 }
  0x4f   : > { %5759 = sst [smem:[#allocation36_spill]] %s5801_s17  ;;  %p5137_p12 = por %p63_p3, %p62_p4 }
  0x50   : > { %4277 = dma.hbm_to_vmem [thread:$0]  (!%p5085_p6), %s5758_s8, 4096, %s460_s16, [#allocation18], %s4950_s18, %s4950_s18, %s4951_s1  }
  0x51   : > { %s50_s16 = ssub.s32 %s4938_s29, %s5801_s17  ;;  %p5761_p5 = scmp.eq.s32.totalorder %s5071_s14, 0 }
  0x52   : > { %p53_p2 = scmp.eq.s32.totalorder %s50_s16, 0  ;;  %p5152_p9 = por %p356_p0, %p62_p4 }
  0x53   : > { %p5148_p8 = por %p5761_p5, %p68_p13  ;;  %p362_p10 = scmp.eq.s32.totalorder %s3785_s19, 1 }
  0x54   : > { %s5157_s22 = scalar_select %p53_p2, %s4930_s27, %s55_s24  }
  0x55   : > { %p5159_p11 = por %p362_p10, %p68_p13  ;;  %p4304_p1 = scmp.lt.s32.totalorder %s4942_s30, 2 }
  0x56   : > { %5764 = sst [smem:[#allocation37_spill]] %s5157_s22  ;;  %s503_s4 = sand.u32 1, %s4942_s30  }
  0x57   : > { %s5765_s21 = scalar_select %p5159_p11, 1, 0 }
  0x58   : > { %s505_s16 = sand.u32 1, %s4930_s27   ;;  %s3798_s8 = sshll.u32 %s4938_s29, 7 }
  0x59   : > { %s3797_s6 = sshll.u32 %s505_s16, 3  ;;  %s513_s28 = scalar_lea.hbm %s5711_s0, %s3798_s8 }
  0x5a   : > { %s507_s12 = scalar_lea.vmem [#allocation4], %s3797_s6  ;;  %p5172_p4 = pnand %p4304_p1, %p5137_p12 }
  0x5b   : > { %s515_s10 = sshll.u32 %s507_s12, 4  ;;  %s3799_s19 = sshll.u32 %s505_s16, 4  ;;  %s516_s10 = int_to_ptr.vmem [resolvable:$true] %s515_s10 }
  0x5c   : > { %s3965_s22 = sshll.u32 %s4938_s29, 8  ;;  %s5177_s30 = scalar_lea.sflag [#allocation5], %s503_s4 }
  0x5d   : > { %p5738_p3 = pneg %p5172_p4  ;;  %s4661_s27 = scalar_lea.vmem %s516_s10, 128 }
  0x5e   : > { %p4662_p13 = scmp.ne.s32.totalorder %s516_s10, %s4661_s27  ;;  %s4952_s6 = smov [#allocation4]  }
  0x5f   : > { %s4666_s8 = sshll.u32 %s4952_s6, 4  ;;  %s4667_s8 = int_to_ptr.vmem [resolvable:$false] %s4666_s8 }
  0x60   : > { %p4664_p0 = pnand %p4662_p13, %p5738_p3  ;;  %s4668_s12 = scalar_lea.vmem %s4667_s8, 256 }
  0x61   : > { %p4669_p12 = scmp.lt.s32.totalorder %s516_s10, %s4667_s8  ;;  %p4670_p5 = scmp.lt.s32.totalorder %s4668_s12, %s4661_s27 }
  0x62   : > { %p4665_p2 = pneg %p4664_p0 }
  0x63   : > { %p4671_p10 = por %p4670_p5, %p4669_p12 }
  0x65   : > { %p4672_p1 = pnand %p4671_p10, %p4665_p2 }
  0x67   : > { %4675 = shalt.err (!%p4672_p1)
}
  0x68   : > { %4287 = dma.hbm_to_vmem [thread:$0]  (!%p5172_p4), %s513_s28, 128, %s516_s10, %s5177_s30  }
  0x69   : > { %s526_s4 = scalar_lea.vmem [#allocation9], %s3799_s19  ;;  %s4953_s25 = smov [#allocation10]  }
  0x6a   : > { %s533_s13 = sshll.u32 %s526_s4, 4  ;;  %s394_s17 = sshll.u32 %s4953_s25, 4  ;;  %s5187_s13 = int_to_ptr.vmem [resolvable:$true] %s533_s13  ;;  %s395_s17 = int_to_ptr.vmem [resolvable:$true] %s394_s17 }
  0x6b   : > { %s4687_s16 = scalar_lea.vmem %s395_s17, 256  ;;  %p4695_p12 = scmp.lt.s32.totalorder %s395_s17, %s395_s17 }
  0x6c   : > { %p4688_p13 = scmp.ne.s32.totalorder %s395_s17, %s4687_s16  ;;  %p4696_p2 = scmp.lt.s32.totalorder %s4687_s16, %s4687_s16 }
  0x6e   : > { %p4690_p0 = pnand %p4688_p13, %p5091_p7  ;;  %p4697_p5 = por %p4696_p2, %p4695_p12 }
  0x70   : > { %p4691_p3 = pneg %p4690_p0 }
  0x72   : > { %p4698_p10 = pnand %p4697_p5, %p4691_p3 }
  0x74   : > { %4701 = shalt.err (!%p4698_p10)
}
  0x75   : > { %s5739_s27 = smov 128   ;;  %s5740_s10 = smov 8  }
  0x76   : > { %4262 = dma.hbm_to_vmem [thread:$0]  (!%p5085_p6), %s5714_s3, 256, %s395_s17, [#allocation8], %s5739_s27, %s5739_s27, %s5740_s10  }
  0x77   : > { %s4956_s6 = smov [#allocation13]   ;;  %s4957_s12 = smov [#allocation16]  }
  0x78   : > { %s420_s8 = sshll.u32 %s4956_s6, 4  ;;  %s446_s4 = sshll.u32 %s4957_s12, 4  ;;  %s421_s8 = int_to_ptr.vmem [resolvable:$true] %s420_s8  ;;  %s447_s4 = int_to_ptr.vmem [resolvable:$true] %s446_s4 }
  0x79   : > { %s4713_s25 = scalar_lea.vmem %s421_s8, 1024  ;;  %p4721_p0 = scmp.lt.s32.totalorder %s421_s8, %s421_s8 }
  0x7a   : > { %p4714_p3 = scmp.ne.s32.totalorder %s421_s8, %s4713_s25  ;;  %p4722_p12 = scmp.lt.s32.totalorder %s4713_s25, %s4713_s25 }
  0x7c   : > { %p4716_p1 = pnand %p4714_p3, %p5091_p7  ;;  %p4723_p2 = por %p4722_p12, %p4721_p0 }
  0x7e   : > { %p4717_p13 = pneg %p4716_p1 }
  0x80   : > { %p4724_p5 = pnand %p4723_p2, %p4717_p13 }
  0x82   : > { %4727 = shalt.err (!%p4724_p5)
}
  0x83   : > { %s5767_s16 = smov 4   ;;  %s5768_s28 = smov 64  }
  0x84   : > { %4268 = dma.hbm_to_vmem [thread:$0]  (!%p5085_p6), %s5716_s5, 1024, %s421_s8, [#allocation12], %s5768_s28, %s5768_s28, %s5767_s16  }
  0x85   : > { %s4739_s6 = scalar_lea.vmem %s447_s4, 1024  ;;  %p4747_p11 = scmp.lt.s32.totalorder %s447_s4, %s447_s4 }
  0x86   : > { %p4740_p10 = scmp.ne.s32.totalorder %s447_s4, %s4739_s6  ;;  %p4748_p0 = scmp.lt.s32.totalorder %s4739_s6, %s4739_s6 }
  0x88   : > { %p4742_p3 = pnand %p4740_p10, %p5091_p7  ;;  %p4749_p13 = por %p4748_p0, %p4747_p11 }
  0x8a   : > { %p4743_p1 = pneg %p4742_p3 }
  0x8c   : > { %p4750_p12 = pnand %p4749_p13, %p4743_p1 }
  0x8e   : > { %4753 = shalt.err (!%p4750_p12)
}
  0x8f   : > { %4274 = dma.hbm_to_vmem [thread:$0]  (!%p5085_p6), %s5718_s7, 1024, %s447_s4, [#allocation15], %s5768_s28, %s5768_s28, %s5767_s16  }
  0x90   : > { %s4958_s8 = smov [#allocation19]   ;;  %s4959_s19 = smov [#allocation20]  }
  0x91   : > { %s472_s17 = sshll.u32 %s4958_s8, 4  ;;  %s489_s27 = sshll.u32 %s4959_s19, 4  ;;  %s473_s17 = int_to_ptr.vmem [resolvable:$true] %s472_s17  ;;  %s490_s27 = int_to_ptr.vmem [resolvable:$true] %s489_s27 }
  0x92   : > { %s4765_s10 = scalar_lea.vmem %s473_s17, 4096  ;;  %p4773_p10 = scmp.lt.s32.totalorder %s473_s17, %s473_s17 }
  0x93   : > { %p4766_p2 = scmp.ne.s32.totalorder %s473_s17, %s4765_s10  ;;  %p4774_p3 = scmp.lt.s32.totalorder %s4765_s10, %s4765_s10 }
  0x95   : > { %p4768_p11 = pnand %p4766_p2, %p5091_p7  ;;  %p4775_p1 = por %p4774_p3, %p4773_p10 }
  0x97   : > { %p4769_p5 = pneg %p4768_p11 }
  0x99   : > { %p4776_p0 = pnand %p4775_p1, %p4769_p5 }
  0x9b   : > { %4779 = shalt.err (!%p4776_p0)
}
  0x9c   : > { %4280 = dma.hbm_to_vmem [thread:$0]  (!%p5085_p6), %s5720_s9, 4096, %s473_s17, [#allocation18], %s5768_s28, %s5768_s28, %s5767_s16  }
  0x9d   : > { %s532_s10 = scalar_lea.hbm %s5713_s2, %s3965_s22  ;;  %s4791_s8 = scalar_lea.vmem %s490_s27, 32 }
  0x9e   : > { %p4792_p13 = scmp.ne.s32.totalorder %s490_s27, %s4791_s8  ;;  %p4799_p11 = scmp.lt.s32.totalorder %s490_s27, %s490_s27 }
  0x9f   : > { %p4800_p5 = scmp.lt.s32.totalorder %s4791_s8, %s4791_s8 }
  0xa0   : > { %p4794_p12 = pnand %p4792_p13, %p5091_p7 }
  0xa1   : > { %p4801_p10 = por %p4800_p5, %p4799_p11 }
  0xa2   : > { %p4795_p2 = pneg %p4794_p12 }
  0xa4   : > { %p4802_p3 = pnand %p4801_p10, %p4795_p2 }
  0xa6   : > { %4805 = shalt.err (!%p4802_p3)
}
  0xa7   : > { %4283 = dma.hbm_to_vmem [thread:$0]  (!%p5085_p6), %s5722_s11, 32, %s490_s27, [#allocation21]  }
  0xa8   : > { %s4819_s22 = scalar_lea.vmem %s5187_s13, 256  ;;  %p5769_p7 = pneg %p5172_p4 }
  0xa9   : > { %p4820_p1 = scmp.ne.s32.totalorder %s5187_s13, %s4819_s22  ;;  %s4960_s23 = smov [#allocation9]  }
  0xaa   : > { %s4824_s28 = sshll.u32 %s4960_s23, 4  ;;  %s4825_s28 = int_to_ptr.vmem [resolvable:$false] %s4824_s28 }
  0xab   : > { %p4822_p0 = pnand %p4820_p1, %p5769_p7  ;;  %s4826_s17 = scalar_lea.vmem %s4825_s28, 512 }
  0xac   : > { %p4827_p12 = scmp.lt.s32.totalorder %s5187_s13, %s4825_s28  ;;  %p4828_p2 = scmp.lt.s32.totalorder %s4826_s17, %s4819_s22 }
  0xad   : > { %p4823_p13 = pneg %p4822_p0 }
  0xae   : > { %p4829_p11 = por %p4828_p2, %p4827_p12 }
  0xb0   : > { %p4830_p5 = pnand %p4829_p11, %p4823_p13 }
  0xb2   : > { %4833 = shalt.err (!%p4830_p5)
}
  0xb3   : > { %s5770_s20 = smov 8   ;;  %s5771_s4 = smov 128  }
  0xb4   : > { %4290 = dma.hbm_to_vmem [thread:$0]  (!%p5172_p4), %s532_s10, 256, %s5187_s13, %s5177_s30, %s5771_s4, %s5771_s4, %s5770_s20  }
  0xb5   : > { %p5772_p6 = scmp.ne.s32.totalorder %s5752_s15, 0 }
  0xb6   : > { %s547_s27 = sand.u32 (!%p5772_p6), 1, %s5071_s14   ;;  %s5258_s6 = sand.u32 (!%p5772_p6), 1, %s4926_s26  }
  0xb7   : > { %545 = sbr.rel (%p5772_p6) target bundleno = 2847 (0xb1f), region = 72  ;;  %s3803_s12 = sshll.u32 (!%p5772_p6), %s5258_s6, 3 }
  0xb8   : > { %s548_s25 = scalar_lea.sflag (!%p5772_p6), [#allocation5], %s547_s27  ;;  %s5263_s24 = scalar_lea.vmem (!%p5772_p6), [#allocation4], %s3803_s12 }
  0xbc   : > { %4885 = dma.done.wait (%p5148_p8), %s548_s25, 128  }
  0xbd   : > { %4887 = vsyncadd (%p5148_p8), %s548_s25, 4294967168  ;;  %p5773_p4 = scmp.eq.s32.totalorder %s5071_s14, 0 }
  0xbf   : > { %4889 = dma.done.wait (%p5773_p4), [#allocation8], 128   ;;  %p5774_p10 = pmov %p5773_p4 }
  0xc0   : > { %s3805_s30 = sshll.u32 %s5258_s6, 4 }
  0xc1   : > { %4891 = vsyncadd (%p5774_p10), [#allocation8], 4294967168  ;;  %s564_s15 = scalar_lea.vmem [#allocation9], %s3805_s30 }
  0xc2   : > { %4893 = dma.done.wait (%p5148_p8), %s548_s25, 256  }
  0xc3   : > { %4895 = vsyncadd (%p5148_p8), %s548_s25, 4294967040  ;;  %p5775_p3 = pmov %p5773_p4 }
  0xc5   : > { %4897 = dma.done.wait (%p5775_p3), [#allocation8], 256   ;;  %p5776_p1 = pmov %p5775_p3 }
  0xc7   : > { %4899 = vsyncadd (%p5776_p1), [#allocation8], 4294967040  ;;  %p5777_p7 = pmov %p5776_p1 }
  0xc8   : > { %p5778_p0 = pmov %p5776_p1 }
  0xc9   : > { %4901 = dma.done.wait (%p5777_p7), [#allocation12], 2048  }
  0xca   : > { %4903 = vsyncadd (%p5778_p0), [#allocation12], 4294965248  ;;  %p5779_p13 = pmov %p5778_p0 }
  0xcb   : > { %p5780_p12 = pmov %p5778_p0 }
  0xcc   : > { %4905 = dma.done.wait (%p5779_p13), [#allocation15], 2048  }
  0xcd   : > { %4907 = vsyncadd (%p5780_p12), [#allocation15], 4294965248  ;;  %p5781_p8 = pmov %p5778_p0 }
  0xce   : > { %p5782_p2 = pmov %p5778_p0 }
  0xcf   : > { %4909 = dma.done.wait (%p5781_p8), [#allocation18], 8192  }
  0xd0   : > { %4911 = vsyncadd (%p5782_p2), [#allocation18], 4294959104  ;;  %p5783_p11 = pmov %p5778_p0 }
  0xd1   : > { %p5784_p5 = pmov %p5778_p0 }
  0xd2   : > { %4913 = dma.done.wait (%p5783_p11), [#allocation21], 32  }
  0xd3   : > { %4915 = vsyncadd (%p5784_p5), [#allocation21], 4294967264  ;;  %v5298_v0 = vld [vmem:[%s564_s15] sm:$0xff]  ;;  %v1609_v4 = vld [vmem:[#allocation7] sm:$0xff]  ;;  %v4961_v10 = vmov 0.0   ;;  %vm4962_vm0 = vmmov 0   ;;  %v681_v39 = vlaneseq }
  0xd4   : > { %v654_v1 = vld [vmem:[#allocation10] sm:$0xff]  ;;  %v1608_v2 = vld [vmem:[%s5263_s24] sm:$0xff]  ;;  %4082 = vmatprep.subr.bf16.mxu0 %v4961_v10  ;;  %4102 = vmatprep.subr.bf16.mxu1 %v4961_v10  ;;  %v4388_v24 = vld [vmem:[#allocation13 + $0x28] sm:$0xff]   ;;  %s5785_s13 = sld [smem:[#allocation42_spill]]  ;;  %s4963_s10 = smov 64   ;;  %vm1267_vm1 = vcmask 257024  }
  0xd5   : > { %v656_v3 = vadd.f32 %v654_v1, %v5298_v0  ;;  %v5302_v5 = vld [vmem:[%s564_s15 + $0x8] sm:$0xff]  ;;  %v1610_v7 = vadd.f32 %v1609_v4, %v1608_v2  ;;  %v4387_v23 = vld [vmem:[#allocation13 + $0x30] sm:$0xff]   ;;  %v4389_v25 = vld [vmem:[#allocation13 + $0x20] sm:$0xff]   ;;  %4098 = vmatprep.mubr.msk.bf16.mxu0 %vm4962_vm0, %v4961_v10  ;;  %4118 = vmatprep.mubr.msk.bf16.mxu1 %vm4962_vm0, %v4961_v10  ;;  %v5341_v46 = vshrl.u32 %v681_v39, 7  ;;  %s4964_s8 = smov 96   ;;  %s4965_s19 = smov 32  }
  0xd6   : > { %v655_v6 = vld [vmem:[#allocation10 + $0x8] sm:$0xff]  ;;  %v4391_v27 = vld [vmem:[#allocation13 + $0x10] sm:$0xff]   ;;  %v4392_v28 = vld [vmem:[#allocation13 + $0x8] sm:$0xff]   ;;  %vm1911_vm2 = vcmask 261120   ;;  %vm2111_vm3 = vcmask 130048   ;;  %vm2757_vm4 = vcmask 523264  }
  0xd7   : > { %658 = vadd.xlane.f32.xlu0 %v656_v3  ;;  %v657_v8 = vadd.f32 %v655_v6, %v5302_v5  ;;  %1611 = vadd.xlane.f32.xlu1 %v1610_v7  ;;  %v4386_v9 = vld [vmem:[#allocation13 + $0x38] sm:$0xff]   ;;  %v4393_v29 = vld [vmem:[#allocation13] sm:$0xff]   ;;  %v4403_v31 = vld [vmem:[#allocation14 + $0x30] sm:$0xff]   ;;  %v5348_v49 = vsub.s32 2, %v5341_v46  ;;  %v5359_v54 = vsub.s32 3, %v5341_v46  ;;  %vm2759_vm5 = vcmask 785408  }
  0xd8   : > { %4083 = vmatpush3.bf16.msra.mxu0 %v4386_v9  ;;  %v4390_v26 = vld [vmem:[#allocation13 + $0x18] sm:$0xff]   ;;  %v4404_v2 = vld [vmem:[#allocation14 + $0x28] sm:$0xff]   ;;  %v4395_v4 = vld [vmem:[#allocation11 + $0x30] sm:$0xff]   ;;  %s5786_s4 = sld [smem:[#allocation43_spill]]  ;;  %s4969_s16 = smov [#allocation22]  }
  0xd9   : > { %4084 = vmatprep.subr.bf16.mxu0 %v4961_v10  ;;  %v4402_v30 = vld [vmem:[#allocation14 + $0x38] sm:$0xff]   ;;  %v4396_v6 = vld [vmem:[#allocation11 + $0x28] sm:$0xff]   ;;  %s5787_s27 = sld [smem:[#allocation34_spill]]  ;;  %s4838_s22 = sshll.u32 %s4969_s16, 4  ;;  %s4839_s22 = int_to_ptr.vmem [resolvable:$false] %s4838_s22 }
  0xda   : > { %4103 = vmatpush3.bf16.msra.mxu1 %v4402_v30  ;;  %v5353_v50 = vld [vmem:[%s5785_s13] sm:$0xff]  ;;  %v4408_v9 = vld [vmem:[#allocation14 + $0x8] sm:$0xff]   ;;  %s5788_s18 = sld [smem:[#allocation44_spill]] }
  0xdb   : > { %660 = vadd.xlane.f32.xlu0 %v657_v8  ;;  %4104 = vmatprep.subr.bf16.mxu1 %v4961_v10  ;;  %v684_v53 = vrot.slane %v5353_v50, %v5348_v49  ;;  %v690_v58 = vrot.slane %v5353_v50, %v5359_v54  ;;  %v4394_v63 = vld [vmem:[#allocation11 + $0x38] sm:$0xff]  }
  0xdc   : > { %4085 = vmatpush3.bf16.msra.mxu0 %v4387_v23  ;;  %v4401_v23 = vld [vmem:[#allocation11] sm:$0xff]  }
  0xdd   : > { %4086 = vmatprep.subr.bf16.mxu0 %v4961_v10 }
  0xde   : > { %4105 = vmatpush3.bf16.msra.mxu1 %v4403_v31  ;;  %v717_v31 = vsub.s32 4, %v5341_v46 }
  0xdf   : > { %4106 = vmatprep.subr.bf16.mxu1 %v4961_v10  ;;  %s3962_s25 = sshll.u32 %s5787_s27, 7 }
  0xe0   : > { %4087 = vmatpush3.bf16.msra.mxu0 %v4388_v24 }
  0xe1   : > { %4088 = vmatprep.subr.bf16.mxu0 %v4961_v10 }
  0xe2   : > { %4107 = vmatpush3.bf16.msra.mxu1 %v4404_v2 }
  0xe3   : > { %4108 = vmatprep.subr.bf16.mxu1 %v4961_v10 }
  0xe4   : > { %4089 = vmatpush3.bf16.msra.mxu0 %v4389_v25 }
  0xe5   : > { %4090 = vmatprep.subr.bf16.mxu0 %v4961_v10 }
  0xe8   : > { %4091 = vmatpush3.bf16.msra.mxu0 %v4390_v26 }
  0xe9   : > { %4092 = vmatprep.subr.bf16.mxu0 %v4961_v10 }
  0xec   : > { %4093 = vmatpush3.bf16.msra.mxu0 %v4391_v27 }
  0xed   : > { %4094 = vmatprep.subr.bf16.mxu0 %v4961_v10 }
  0xf0   : > { %4095 = vmatpush3.bf16.msra.mxu0 %v4392_v28 }
  0xf1   : > { %4096 = vmatprep.subr.bf16.mxu0 %v4961_v10 }
  0xf4   : > { %4097 = vmatpush3.bf16.msra.mxu0 %v4393_v29 }
  0xf5   : > { %4122 = vmatprep.subr.bf16.mxu0 %v4961_v10 }
 0x160   : > { %v659_v11 = vpop.xlane.xlu0 %658  ;;  %v1612_v13 = vpop.xlane.xlu1 %1611 }
 0x161   : > { %v663_v12 = vmul.f32 0.0078125, %v659_v11  ;;  %v1614_v14 = vmul.f32 0.0078125, %v1612_v13  ;;  %v4398_v11 = vld [vmem:[#allocation11 + $0x18] sm:$0xff]  }
 0x163   : > { %v5308_v15 = vsub.f32 %v656_v3, %v663_v12  ;;  %v5310_v16 = vsub.f32 %v1610_v7, %v1614_v14  ;;  %v4405_v3 = vld [vmem:[#allocation14 + $0x20] sm:$0xff]   ;;  %v4407_v7 = vld [vmem:[#allocation14 + $0x10] sm:$0xff]   ;;  %v5375_v12 = vsub.s32 0, %v5341_v46 }
 0x164   : > { %v661_v17 = vpop.xlane.xlu0 %660  ;;  %4109 = vmatpush3.bf16.msra.mxu1 %v4405_v3  ;;  %v4409_v14 = vld [vmem:[#allocation14] sm:$0xff]  }
 0x165   : > { %v664_v18 = vmul.f32 0.0078125, %v661_v17  ;;  %v667_v19 = vmul.f32 %v5308_v15, %v5308_v15  ;;  %v1616_v21 = vmul.f32 %v5310_v16, %v5310_v16  ;;  %4110 = vmatprep.subr.bf16.mxu1 %v4961_v10  ;;  %v5380_v17 = vsub.s32 1, %v5341_v46 }
 0x167   : > { %v5314_v20 = vsub.f32 %v657_v8, %v664_v18  ;;  %669 = vadd.xlane.f32.xlu1 %v667_v19  ;;  %v4397_v8 = vld [vmem:[#allocation11 + $0x20] sm:$0xff]   ;;  %v1626_v19 = vrot.slane %v5353_v50, %v5375_v12 }
 0x169   : > { %v668_v22 = vmul.f32 %v5314_v20, %v5314_v20 }
 0x16b   : > { %1617 = vadd.xlane.f32.xlu1 %v1616_v21  ;;  %671 = vadd.xlane.f32.xlu0 %v668_v22  ;;  %v1631_v22 = vrot.slane %v5353_v50, %v5380_v17 }
 0x16f   : > { %695 = vadd.xlane.f32.xlu1 %v5302_v5  ;;  %693 = vadd.xlane.f32.xlu0 %v5298_v0 }
 0x1f0   : > { %v670_v32 = vpop.xlane.xlu1 %669 }
 0x1f1   : > { %v673_v33 = vmul.f32 0.0078125, %v670_v32  ;;  %v723_v32 = vsub.s32 5, %v5341_v46 }
 0x1f3   : > { %v675_v34 = vadd.f32 1e-06, %v673_v33  ;;  %v718_v33 = vrot.slane %v5353_v50, %v717_v31 }
 0x1f4   : > { %v1618_v35 = vpop.xlane.xlu1 %1617  ;;  %v672_v36 = vpop.xlane.xlu0 %671 }
 0x1f5   : > { %4506 = vrsqrt.f32 %v675_v34  ;;  %v674_v37 = vmul.f32 0.0078125, %v672_v36  ;;  %v1619_v59 = vmul.f32 0.0078125, %v1618_v35 }
 0x1f7   : > { %v676_v38 = vadd.f32 1e-06, %v674_v37  ;;  %v724_v37 = vrot.slane %v5353_v50, %v723_v32  ;;  %v5407_v50 = vld [vmem:[#allocation20] sm:$0x3] }
 0x1f8   : > { %v696_v40 = vpop.xlane.xlu1 %695  ;;  %v694_v41 = vpop.xlane.xlu0 %693 }
 0x1f9   : > { %v698_v42 = vmul.f32 0.0078125, %v696_v40  ;;  %v697_v43 = vmul.f32 0.0078125, %v694_v41  ;;  %4508 = vrsqrt.f32 %v676_v38 }
 0x1fb   : > { %v5336_v44 = vsub.f32 %v5302_v5, %v698_v42  ;;  %v5339_v45 = vsub.f32 %v5298_v0, %v697_v43  ;;  %v1620_v0 = vadd.f32 1e-06, %v1619_v59  ;;  %v4406_v5 = vld [vmem:[#allocation14 + $0x18] sm:$0xff]  }
 0x1fc   : > { %4111 = vmatpush3.bf16.msra.mxu1 %v4406_v5 }
 0x1fd   : > { %v702_v47 = vmul.f32 %v5336_v44, %v5336_v44  ;;  %v701_v48 = vmul.f32 %v5339_v45, %v5339_v45  ;;  %4510 = vrsqrt.f32 %v1620_v0  ;;  %4112 = vmatprep.subr.bf16.mxu1 %v4961_v10 }
 0x1ff   : > { %705 = vadd.xlane.f32.xlu1 %v702_v47  ;;  %703 = vadd.xlane.f32.xlu0 %v701_v48 }
 0x200   : > { %4113 = vmatpush3.bf16.msra.mxu1 %v4407_v7 }
 0x201   : > { %4114 = vmatprep.subr.bf16.mxu1 %v4961_v10 }
 0x202   : > { %v4507_v51 = vpop.eup %4506 }
 0x203   : > { %v679_v52 = vmul.f32 %v4507_v51, %v5308_v15  ;;  %v4399_v15 = vld [vmem:[#allocation11 + $0x10] sm:$0xff]   ;;  %v1653_v51 = vrot.slane %v5407_v50, %v5375_v12 }
 0x204   : > { %4115 = vmatpush3.bf16.msra.mxu1 %v4408_v9 }
 0x205   : > { %v685_v57 = vmul.f32 %v684_v53, %v679_v52  ;;  %4116 = vmatprep.subr.bf16.mxu1 %v4961_v10 }
 0x206   : > { %v4509_v55 = vpop.eup %4508 }
 0x207   : > { %v680_v56 = vmul.f32 %v4509_v55, %v5314_v20  ;;  %v691_v61 = vadd.f32 %v690_v58, %v685_v57  ;;  %v4400_v20 = vld [vmem:[#allocation11 + $0x8] sm:$0xff]  }
 0x208   : > { %4117 = vmatpush3.bf16.msra.mxu1 %v4409_v14 }
 0x209   : > { %v686_v60 = vmul.f32 %v684_v53, %v680_v56  ;;  %4142 = vmatprep.subr.bf16.mxu1 %v4961_v10 }
 0x20a   : > { %v4511_v13 = vpop.eup %4510 }
 0x20b   : > { %v692_v62 = vadd.f32 %v690_v58, %v686_v60  ;;  %v1622_v18 = vmul.f32 %v4511_v13, %v5310_v16  ;;  %v4966_v58 = vmov 1983009808   ;;  %v4967_v60 = vmov 1934713408  }
 0x20c   : > { %v966_v59 = vunpack.c.l.s4 %v4966_v58 }
 0x20d   : > { %v727_v1 = vpack.c.bf16 %v692_v62, %v691_v61  ;;  %v1627_v21 = vmul.f32 %v1626_v19, %v1622_v18  ;;  %v998_v61 = vunpack.c.l.s4 %v4967_v60 }
 0x20e   : > { %v967_v62 = vunpack.c.0.s8 %v966_v59 }
 0x20f   : > { %4099 = vmatmul.mubr.bf16.vlgmr.msra.gmra.mxu0 %v727_v1  ;;  %v1632_v24 = vadd.f32 %v1631_v22, %v1627_v21  ;;  %v999_v1 = vunpack.c.0.s8 %v998_v61 }
 0x210   : > { %4123 = vmatpush3.bf16.msra.mxu0 %v4394_v63  ;;  %4138 = vmatprep.mubr.msk.bf16.mxu0 %vm4962_vm0, %v4961_v10  ;;  %v5420_v2 = vsub.s32 %v967_v62, %v5341_v46 }
 0x211   : > { %4124 = vmatprep.subr.bf16.mxu0 %v4961_v10  ;;  %v1633_v16 = vpack.c.bf16 %v1632_v24, %v1632_v24  ;;  %v5423_v9 = vsub.s32 %v999_v1, %v5341_v46 }
 0x214   : > { %4125 = vmatpush3.bf16.msra.mxu0 %v4395_v4 }
 0x215   : > { %4126 = vmatprep.subr.bf16.mxu0 %v4961_v10 }
 0x218   : > { %4127 = vmatpush3.bf16.msra.mxu0 %v4396_v6 }
 0x219   : > { %4128 = vmatprep.subr.bf16.mxu0 %v4961_v10 }
 0x21c   : > { %4129 = vmatpush3.bf16.msra.mxu0 %v4397_v8 }
 0x21d   : > { %4130 = vmatprep.subr.bf16.mxu0 %v4961_v10 }
 0x220   : > { %4131 = vmatpush3.bf16.msra.mxu0 %v4398_v11 }
 0x221   : > { %4132 = vmatprep.subr.bf16.mxu0 %v4961_v10 }
 0x224   : > { %4133 = vmatpush3.bf16.msra.mxu0 %v4399_v15 }
 0x225   : > { %4134 = vmatprep.subr.bf16.mxu0 %v4961_v10 }
 0x228   : > { %4135 = vmatpush3.bf16.msra.mxu0 %v4400_v20 }
 0x229   : > { %4136 = vmatprep.subr.bf16.mxu0 %v4961_v10 }
 0x22c   : > { %4137 = vmatpush3.bf16.msra.mxu0 %v4401_v23 }
 0x22d   : > { %4190 = vmatprep.subr.bf16.mxu0 %v4961_v10 }
 0x22f   : > { %4139 = vmatmul.mubr.bf16.vlgmr.msra.gmra.mxu0 %v1633_v16 }
 0x230   : > { %4206 = vmatprep.mubr.msk.bf16.mxu0 %vm4962_vm0, %v4961_v10 }
 0x288   : > { %v706_v25 = vpop.xlane.xlu1 %705  ;;  %v704_v26 = vpop.xlane.xlu0 %703 }
 0x289   : > { %v708_v27 = vmul.f32 0.0078125, %v706_v25  ;;  %v707_v28 = vmul.f32 0.0078125, %v704_v26 }
 0x28b   : > { %v710_v29 = vadd.f32 1e-06, %v708_v27  ;;  %v709_v30 = vadd.f32 1e-06, %v707_v28 }
 0x28d   : > { %4512 = vrsqrt.f32 %v710_v29 }
 0x28e   : > { %4514 = vrsqrt.f32 %v709_v30 }
 0x29a   : > { %v4513_v34 = vpop.eup %4512 }
 0x29b   : > { %v4515_v35 = vpop.eup %4514  ;;  %v714_v36 = vmul.f32 %v4513_v34, %v5336_v44 }
 0x29c   : > { %v713_v38 = vmul.f32 %v4515_v35, %v5339_v45 }
 0x29d   : > { %v720_v39 = vmul.f32 %v718_v33, %v714_v36 }
 0x29e   : > { %v719_v40 = vmul.f32 %v718_v33, %v713_v38 }
 0x29f   : > { %v726_v41 = vadd.f32 %v724_v37, %v720_v39 }
 0x2a0   : > { %v725_v42 = vadd.f32 %v724_v37, %v719_v40 }
 0x2a2   : > { %v833_v43 = vpack.c.bf16 %v726_v41, %v725_v42 }
 0x2a4   : > { %4119 = vmatmul.mubr.bf16.vlgmr.msra.gmra.mxu1 %v833_v43 }
 0x2a5   : > { %4144 = vmatprep.mubr.msk.bf16.mxu1 %vm4962_vm0, %v4961_v10 }
 0x2cf   : > { %v826_v47 = vpop.f32.mrf.mxu0 }
 0x2d0   : > { %951 = vrot.lane.b32.xlu1 %v826_v47, %s4963_s10  ;;  %945 = vrot.lane.b32.xlu0 %v826_v47, %s4964_s8 }
 0x2d1   : > { %v4100_v44 = vpop.f32.mrf.mxu0 }
 0x2d3   : > { %v829_v48 = vpop.f32.mrf.mxu0 }
 0x2d4   : > { %957 = vrot.lane.b32.xlu0 %v826_v47, %s4965_s19  ;;  %947 = vrot.lane.b32.xlu1 %v829_v48, %s4964_s8 }
 0x2d5   : > { %v4101_v45 = vpop.f32.mrf.mxu0 }
 0x2d8   : > { %953 = vrot.lane.b32.xlu1 %v829_v48, %s4963_s10 }
 0x2dc   : > { %959 = vrot.lane.b32.xlu1 %v829_v48, %s4965_s19 }
 0x2ef   : > { %v1736_v52 = vpop.f32.mrf.mxu0 }
 0x2f0   : > { %v5411_v53 = vadd.f32 %v1736_v52, %v1653_v51 }
 0x2f1   : > { %v4140_v55 = vpop.f32.mrf.mxu0 }
 0x2f2   : > { %1746 = vrot.lane.b32.xlu1 %v5411_v53, %s4963_s10  ;;  %1743 = vrot.lane.b32.xlu0 %v5411_v53, %s4964_s8 }
 0x2f3   : > { %v1739_v56 = vpop.f32.mrf.mxu0 }
 0x2f5   : > { %v4141_v57 = vpop.f32.mrf.mxu0 }
 0x2f6   : > { %1749 = vrot.lane.b32.xlu0 %v5411_v53, %s4965_s19 }
 0x342   : > { %v952_v63 = vpop.permute.xlu1 %951  ;;  %v946_v0 = vpop.permute.xlu0 %945 }
 0x343   : > { %v963_v3 = vcombine.low %v826_v47, %v952_v63  ;;  %v964_v4 = vcombine.high %v826_v47, %v952_v63 }
 0x345   : > { %v971_v11 = vrot.slane %v963_v3, %v5420_v2  ;;  %v978_v13 = vrot.slane %v964_v4, %v5420_v2 }
 0x346   : > { %v958_v5 = vpop.permute.xlu0 %957  ;;  %v948_v6 = vpop.permute.xlu1 %947 }
 0x347   : > { %v979_v7 = vcombine.low %v946_v0, %v958_v5  ;;  %v980_v8 = vcombine.high %v946_v0, %v958_v5 }
 0x349   : > { %v987_v14 = vrot.slane %v979_v7, %v5420_v2  ;;  %v994_v15 = vrot.slane %v980_v8, %v5420_v2 }
 0x34a   : > { %v954_v18 = vpop.permute.xlu1 %953 }
 0x34b   : > { %v995_v19 = vcombine.low %v971_v11, %v987_v14  ;;  %v996_v20 = vcombine.high %v971_v11, %v987_v14  ;;  %v1011_v21 = vcombine.low %v978_v13, %v994_v15  ;;  %v1012_v22 = vcombine.high %v978_v13, %v994_v15 }
 0x34c   : > { %v1031_v26 = vcombine.low %v829_v48, %v954_v18  ;;  %v1032_v27 = vcombine.high %v829_v48, %v954_v18 }
 0x34d   : > { %v1003_v23 = vrot.slane %v995_v19, %v5423_v9  ;;  %v1010_v24 = vrot.slane %v996_v20, %v5423_v9  ;;  %v1019_v16 = vrot.slane %v1011_v21, %v5423_v9  ;;  %v1026_v25 = vrot.slane %v1012_v22, %v5423_v9 }
 0x34e   : > { %v960_v28 = vpop.permute.xlu1 %959  ;;  %v1039_v39 = vrot.slane %v1031_v26, %v5420_v2  ;;  %v1046_v40 = vrot.slane %v1032_v27, %v5420_v2 }
 0x34f   : > { %v1099_v29 = vcombine.low %v1003_v23, %v1010_v24  ;;  %v3831_v30 = vcombine.high %v1003_v23, %v1010_v24  ;;  %v1115_v31 = vcombine.low %v1019_v16, %v1026_v25  ;;  %v3832_v32 = vcombine.high %v1019_v16, %v1026_v25 }
 0x350   : > { %v1047_v33 = vcombine.low %v948_v6, %v960_v28  ;;  %v1048_v34 = vcombine.high %v948_v6, %v960_v28 }
 0x351   : > { %v1106_v35 = vrot.slane %v1099_v29, %v5420_v2  ;;  %v1114_v36 = vrot.slane %v3831_v30, %v5420_v2  ;;  %v1122_v37 = vrot.slane %v1115_v31, %v5420_v2  ;;  %v1130_v38 = vrot.slane %v3832_v32, %v5420_v2 }
 0x352   : > { %v1055_v41 = vrot.slane %v1047_v33, %v5420_v2  ;;  %v1062_v42 = vrot.slane %v1048_v34, %v5420_v2 }
 0x353   : > { %v1131_v43 = vcombine.low %v1106_v35, %v1114_v36  ;;  %v1132_v47 = vcombine.high %v1106_v35, %v1114_v36  ;;  %v1147_v44 = vcombine.low %v1122_v37, %v1130_v38  ;;  %v1148_v48 = vcombine.high %v1122_v37, %v1130_v38 }
 0x354   : > { %v1063_v45 = vcombine.low %v1039_v39, %v1055_v41  ;;  %v1064_v51 = vcombine.high %v1039_v39, %v1055_v41  ;;  %v1079_v52 = vcombine.low %v1046_v40, %v1062_v42  ;;  %v1080_v55 = vcombine.high %v1046_v40, %v1062_v42 }
 0x355   : > { %v1139_v56 = vrot.slane %v1131_v43, %v5423_v9  ;;  %v1146_v57 = vrot.slane %v1132_v47, %v5423_v9  ;;  %v1155_v58 = vrot.slane %v1147_v44, %v5423_v9  ;;  %v1162_v59 = vrot.slane %v1148_v48, %v5423_v9 }
 0x356   : > { %v1071_v60 = vrot.slane %v1063_v45, %v5423_v9  ;;  %v1078_v61 = vrot.slane %v1064_v51, %v5423_v9  ;;  %v1087_v62 = vrot.slane %v1079_v52, %v5423_v9  ;;  %v1094_v63 = vrot.slane %v1080_v55, %v5423_v9 }
 0x357   : > { %v1163_v0 = vcombine.low %v1139_v56, %v1155_v58  ;;  %v1164_v1 = vcombine.high %v1139_v56, %v1155_v58  ;;  %v1165_v3 = vcombine.low %v1146_v57, %v1162_v59  ;;  %v1166_v4 = vcombine.high %v1146_v57, %v1162_v59 }
 0x358   : > { %v1167_v5 = vcombine.low %v1071_v60, %v1078_v61  ;;  %v3833_v6 = vcombine.high %v1071_v60, %v1078_v61  ;;  %v1183_v7 = vcombine.low %v1087_v62, %v1094_v63  ;;  %v3834_v8 = vcombine.high %v1087_v62, %v1094_v63 }
 0x359   : > { %v3966_v11 = vpack.c.bf16 %v1163_v0, %v1163_v0  ;;  %v3968_v13 = vpack.c.bf16 %v1164_v1, %v1164_v1  ;;  %v3970_v14 = vpack.c.bf16 %v1165_v3, %v1165_v3  ;;  %v3972_v15 = vpack.c.bf16 %v1166_v4, %v1166_v4 }
 0x35a   : > { %v1174_v18 = vrot.slane %v1167_v5, %v5420_v2  ;;  %v1182_v19 = vrot.slane %v3833_v6, %v5420_v2  ;;  %v1190_v20 = vrot.slane %v1183_v7, %v5420_v2  ;;  %v1198_v21 = vrot.slane %v3834_v8, %v5420_v2 }
 0x35b   : > { %1268 = vst.msk [vmem:[#allocation2] sm:$0xf] %vm1267_vm1, %v3966_v11  ;;  %1270 = vst.msk [vmem:[#allocation2 + $0x8] sm:$0xf] %vm1267_vm1, %v3968_v13 }
 0x35c   : > { %1272 = vst.msk [vmem:[#allocation2 + $0x10] sm:$0xf] %vm1267_vm1, %v3970_v14  ;;  %1274 = vst.msk [vmem:[#allocation2 + $0x18] sm:$0xf] %vm1267_vm1, %v3972_v15  ;;  %v1199_v22 = vcombine.low %v1174_v18, %v1182_v19  ;;  %v1200_v23 = vcombine.high %v1174_v18, %v1182_v19  ;;  %v1215_v24 = vcombine.low %v1190_v20, %v1198_v21 }
 0x35d   : > { %v1216_v16 = vcombine.high %v1190_v20, %v1198_v21 }
 0x35e   : > { %v1207_v25 = vrot.slane %v1199_v22, %v5423_v9  ;;  %v1214_v26 = vrot.slane %v1200_v23, %v5423_v9  ;;  %v1223_v27 = vrot.slane %v1215_v24, %v5423_v9 }
 0x35f   : > { %v1230_v28 = vrot.slane %v1216_v16, %v5423_v9 }
 0x360   : > { %v1231_v29 = vcombine.low %v1207_v25, %v1223_v27  ;;  %v1232_v30 = vcombine.high %v1207_v25, %v1223_v27 }
 0x361   : > { %v1233_v31 = vcombine.low %v1214_v26, %v1230_v28  ;;  %v1234_v32 = vcombine.high %v1214_v26, %v1230_v28 }
 0x362   : > { %v3967_v33 = vpack.c.bf16 %v1231_v29, %v1231_v29  ;;  %v3969_v34 = vpack.c.bf16 %v1232_v30, %v1232_v30 }
 0x363   : > { %v3971_v35 = vpack.c.bf16 %v1233_v31, %v1233_v31  ;;  %v3973_v36 = vpack.c.bf16 %v1234_v32, %v1234_v32  ;;  %v4968_v31 = vmov 0  }
 0x364   : > { %v5461_v37 = vpop.f32.mrf.mxu1  ;;  %1269 = vst.msk [vmem:[#allocation2 + $0x4] sm:$0xf] %vm1267_vm1, %v3967_v33  ;;  %1271 = vst.msk [vmem:[#allocation2 + $0xc] sm:$0xf] %vm1267_vm1, %v3969_v34  ;;  %v1747_v38 = vpop.permute.xlu1 %1746 }
 0x365   : > { %1273 = vst.msk [vmem:[#allocation2 + $0x14] sm:$0xf] %vm1267_vm1, %v3971_v35  ;;  %1275 = vst.msk [vmem:[#allocation2 + $0x1c] sm:$0xf] %vm1267_vm1, %v3973_v36  ;;  %v1744_v39 = vpop.permute.xlu0 %1743  ;;  %v1752_v41 = vcombine.low %v5411_v53, %v1747_v38  ;;  %v1753_v42 = vcombine.high %v5411_v53, %v1747_v38 }
 0x366   : > { %v4120_v40 = vpop.f32.mrf.mxu1 }
 0x367   : > { %v1760_v51 = vrot.slane %v1752_v41, %v5420_v2  ;;  %v1767_v52 = vrot.slane %v1753_v42, %v5420_v2 }
 0x368   : > { %v5469_v43 = vpop.f32.mrf.mxu1 }
 0x369   : > { %v1750_v47 = vpop.permute.xlu0 %1749 }
 0x36a   : > { %v1768_v44 = vcombine.low %v1744_v39, %v1750_v47  ;;  %v1769_v48 = vcombine.high %v1744_v39, %v1750_v47  ;;  %v4121_v45 = vpop.f32.mrf.mxu1 }
 0x36b   : > { %v4410_v57 = vld [vmem:[#allocation2] sm:$0xff]   ;;  %v4411_v24 = vld [vmem:[#allocation2 + $0x8] sm:$0xff]  }
 0x36c   : > { %v1776_v55 = vrot.slane %v1768_v44, %v5420_v2  ;;  %v1783_v56 = vrot.slane %v1769_v48, %v5420_v2  ;;  %v1916_v61 = vsel %vm1911_vm2, %v4410_v57, 0  ;;  %v1967_v25 = vsel %vm1911_vm2, %v4411_v24, 0  ;;  %v4412_v28 = vld [vmem:[#allocation2 + $0x10] sm:$0xff]   ;;  %v4413_v34 = vld [vmem:[#allocation2 + $0x18] sm:$0xff]  }
 0x36d   : > { %4143 = vmatpush3.bf16.xpose.msra.mxu1 %v1916_v61  ;;  %v2018_v30 = vsel %vm1911_vm2, %v4412_v28, 0  ;;  %v2069_v36 = vsel %vm1911_vm2, %v4413_v34, 0 }
 0x36e   : > { %v1784_v58 = vcombine.low %v1760_v51, %v1776_v55  ;;  %v1785_v59 = vcombine.high %v1760_v51, %v1776_v55  ;;  %v1800_v60 = vcombine.low %v1767_v52, %v1783_v56  ;;  %v1801_v53 = vcombine.high %v1767_v52, %v1783_v56  ;;  %4148 = vmatprep.subr.bf16.mxu1 %v4961_v10 }
 0x36f   : > { %v853_v56 = vrot.slane %v5407_v50, %v5380_v17 }
 0x370   : > { %v1792_v62 = vrot.slane %v1784_v58, %v5423_v9  ;;  %v1799_v63 = vrot.slane %v1785_v59, %v5423_v9  ;;  %v1808_v0 = vrot.slane %v1800_v60, %v5423_v9  ;;  %v1815_v1 = vrot.slane %v1801_v53, %v5423_v9 }
 0x371   : > { %v937_v59 = vadd.f32 %v5461_v37, %v853_v56 }
 0x372   : > { %v1816_v3 = vcombine.high %v1792_v62, %v4961_v10  ;;  %v1817_v4 = vcombine.high %v1799_v63, %v4961_v10  ;;  %v1818_v5 = vcombine.high %v1808_v0, %v4961_v10  ;;  %v1819_v6 = vcombine.high %v1815_v1, %v4961_v10 }
 0x373   : > { %v3863_v7 = vpack.c.bf16 %v1808_v0, %v1792_v62  ;;  %v3864_v8 = vpack.c.bf16 %v1815_v1, %v1799_v63  ;;  %v5517_v0 = vadd.f32 %v5469_v43, %v853_v56 }
 0x374   : > { %v3865_v11 = vpack.c.bf16 %v1818_v5, %v1816_v3  ;;  %v3866_v13 = vpack.c.bf16 %v1819_v6, %v1817_v4 }
 0x375   : > { %v1851_v14 = vrot.slane %v3863_v7, %v5420_v2  ;;  %v1859_v15 = vrot.slane %v3864_v8, %v5420_v2 }
 0x376   : > { %v1876_v18 = vrot.slane %v3865_v11, %v5420_v2  ;;  %v1884_v19 = vrot.slane %v3866_v13, %v5420_v2 }
 0x377   : > { %v1860_v20 = vcombine.low %v1851_v14, %v1859_v15 }
 0x378   : > { %v1885_v21 = vcombine.low %v1876_v18, %v1884_v19 }
 0x379   : > { %v1867_v22 = vrot.slane %v1860_v20, %v5423_v9 }
 0x37a   : > { %v1892_v23 = vrot.slane %v1885_v21, %v5423_v9 }
 0x37b   : > { %v1897_v27 = vshrl.u32 %v1867_v22, 16  ;;  %v1868_v33 = vcombine.high %v1867_v22, %v4968_v31 }
 0x37c   : > { %v1896_v16 = vpack.i.b16 %v1892_v23, %v1867_v22  ;;  %v1898_v26 = vshrl.u32 %v1892_v23, 16  ;;  %v1893_v32 = vcombine.high %v1892_v23, %v4968_v31 }
 0x37d   : > { %v1903_v39 = vshrl.u32 %v1868_v33, 16 }
 0x37e   : > { %4145 = vmatmul.mubr.msk.bf16.vlgmr.msra.gmra.mxu1 %vm1911_vm2, %v1896_v16  ;;  %v1899_v29 = vpack.i.b16 %v1898_v26, %v1897_v27  ;;  %v1902_v35 = vpack.i.b16 %v1893_v32, %v1868_v33  ;;  %v1904_v38 = vshrl.u32 %v1893_v32, 16 }
 0x37f   : > { %4149 = vmatpush3.bf16.xpose.msra.mxu1 %v1967_v25  ;;  %4150 = vmatprep.mubr.msk.bf16.mxu1 %vm4962_vm0, %v4961_v10 }
 0x380   : > { %4154 = vmatprep.subr.bf16.mxu1 %v4961_v10  ;;  %v1905_v40 = vpack.i.b16 %v1904_v38, %v1903_v39 }
 0x386   : > { %4151 = vmatmul.mubr.msk.bf16.vlgmr.msra.gmra.mxu1 %vm1911_vm2, %v1899_v29 }
 0x387   : > { %4155 = vmatpush3.bf16.xpose.msra.mxu1 %v2018_v30  ;;  %4156 = vmatprep.mubr.msk.bf16.mxu1 %vm4962_vm0, %v4961_v10 }
 0x388   : > { %4160 = vmatprep.subr.bf16.mxu1 %v4961_v10 }
 0x38e   : > { %4157 = vmatmul.mubr.msk.bf16.vlgmr.msra.gmra.mxu1 %vm1911_vm2, %v1902_v35 }
 0x38f   : > { %4161 = vmatpush3.bf16.xpose.msra.mxu1 %v2069_v36  ;;  %4162 = vmatprep.mubr.msk.bf16.mxu1 %vm4962_vm0, %v4961_v10 }
 0x396   : > { %4163 = vmatmul.mubr.msk.bf16.vlgmr.msra.gmra.mxu1 %vm1911_vm2, %v1905_v40 }
 0x43e   : > { %v1952_v41 = vpop.f32.mrf.mxu1 }
 0x43f   : > { %v2112_v42 = vsel %vm2111_vm3, %v1952_v41, -inf }
 0x440   : > { %2113 = vmax.xlane.f32.xlu1 %v2112_v42  ;;  %v4146_v47 = vpop.f32.mrf.mxu1 }
 0x442   : > { %v1955_v44 = vpop.f32.mrf.mxu1 }
 0x444   : > { %v4147_v48 = vpop.f32.mrf.mxu1 }
 0x446   : > { %v2003_v45 = vpop.f32.mrf.mxu1 }
 0x447   : > { %v2115_v51 = vsel %vm2111_vm3, %v2003_v45, -inf }
 0x448   : > { %2116 = vmax.xlane.f32.xlu0 %v2115_v51  ;;  %v4152_v52 = vpop.f32.mrf.mxu1 }
 0x44a   : > { %v2006_v55 = vpop.f32.mrf.mxu1 }
 0x44c   : > { %v4153_v57 = vpop.f32.mrf.mxu1 }
 0x44e   : > { %v2054_v58 = vpop.f32.mrf.mxu1 }
 0x44f   : > { %v2118_v60 = vsel %vm2111_vm3, %v2054_v58, -inf }
 0x450   : > { %2119 = vmax.xlane.f32.xlu0 %v2118_v60  ;;  %v4158_v53 = vpop.f32.mrf.mxu1 }
 0x451   : > { %1278 = vrot.lane.b32.xlu1 %v937_v59, %s4964_s8 }
 0x452   : > { %v2057_v61 = vpop.f32.mrf.mxu1 }
 0x454   : > { %v4159_v62 = vpop.f32.mrf.mxu1 }
 0x455   : > { %1284 = vrot.lane.b32.xlu1 %v937_v59, %s4963_s10 }
 0x456   : > { %v2105_v63 = vpop.f32.mrf.mxu1 }
 0x457   : > { %v2121_v50 = vsel %vm2111_vm3, %v2105_v63, -inf }
 0x458   : > { %2122 = vmax.xlane.f32.xlu0 %v2121_v50  ;;  %v4164_v1 = vpop.f32.mrf.mxu1 }
 0x459   : > { %1286 = vrot.lane.b32.xlu1 %v5517_v0, %s4963_s10 }
 0x45a   : > { %v2108_v37 = vpop.f32.mrf.mxu1 }
 0x45c   : > { %v4165_v3 = vpop.f32.mrf.mxu1 }
 0x45d   : > { %1290 = vrot.lane.b32.xlu1 %v937_v59, %s4965_s19 }
 0x46e   : > { %1280 = vrot.lane.b32.xlu0 %v5517_v0, %s4964_s8 }
 0x472   : > { %1292 = vrot.lane.b32.xlu0 %v5517_v0, %s4965_s19 }
 0x4c9   : > { %v2114_v4 = vpop.xlane.xlu1 %2113 }
 0x4ca   : > { %v2124_v43 = vsub.f32 %v1952_v41, %v2114_v4 }
 0x4cc   : > { %v2128_v5 = vmul.f32 1.442695, %v2124_v43 }
 0x4cd   : > { %v1279_v6 = vpop.permute.xlu1 %1278 }
 0x4ce   : > { %4516 = vpow2.f32 %v2128_v5 }
 0x4d1   : > { %v1285_v7 = vpop.permute.xlu1 %1284  ;;  %v2117_v8 = vpop.xlane.xlu0 %2116 }
 0x4d2   : > { %v2125_v11 = vsub.f32 %v2003_v45, %v2117_v8  ;;  %v1296_v15 = vcombine.low %v937_v59, %v1285_v7  ;;  %v1297_v18 = vcombine.high %v937_v59, %v1285_v7 }
 0x4d4   : > { %v2130_v13 = vmul.f32 1.442695, %v2125_v11  ;;  %v1304_v16 = vrot.slane %v1296_v15, %v5420_v2  ;;  %v1311_v25 = vrot.slane %v1297_v18, %v5420_v2 }
 0x4d5   : > { %v5527_v14 = vpop.permute.xlu1 %1286 }
 0x4d6   : > { %4518 = vpow2.f32 %v2130_v13  ;;  %v1365_v4 = vcombine.high %v5517_v0, %v5527_v14 }
 0x4d9   : > { %v1291_v19 = vpop.permute.xlu1 %1290  ;;  %v2120_v20 = vpop.xlane.xlu0 %2119 }
 0x4da   : > { %v1312_v21 = vcombine.low %v1279_v6, %v1291_v19  ;;  %v1313_v22 = vcombine.high %v1279_v6, %v1291_v19  ;;  %v2126_v23 = vsub.f32 %v2054_v58, %v2120_v20 }
 0x4db   : > { %v5529_v24 = vpop.eup %4516 }
 0x4dc   : > { %v1320_v26 = vrot.slane %v1312_v21, %v5420_v2  ;;  %v1327_v27 = vrot.slane %v1313_v22, %v5420_v2  ;;  %v2132_v28 = vmul.f32 1.442695, %v2126_v23  ;;  %v2136_v29 = vsel %vm2111_vm3, %v5529_v24, 0.0 }
 0x4dd   : > { %2137 = vadd.xlane.f32.xlu1 %v2136_v29  ;;  %v1379_v23 = vrot.slane %v1365_v4, %v5420_v2 }
 0x4de   : > { %v1328_v30 = vcombine.low %v1304_v16, %v1320_v26  ;;  %v1329_v32 = vcombine.high %v1304_v16, %v1320_v26  ;;  %v1344_v33 = vcombine.low %v1311_v25, %v1327_v27  ;;  %v1345_v34 = vcombine.high %v1311_v25, %v1327_v27 }
 0x4df   : > { %4520 = vpow2.f32 %v2132_v28 }
 0x4e0   : > { %v1336_v35 = vrot.slane %v1328_v30, %v5423_v9  ;;  %v1343_v36 = vrot.slane %v1329_v32, %v5423_v9  ;;  %v1352_v38 = vrot.slane %v1344_v33, %v5423_v9  ;;  %v1359_v39 = vrot.slane %v1345_v34, %v5423_v9 }
 0x4e1   : > { %v2123_v40 = vpop.xlane.xlu0 %2122 }
 0x4e2   : > { %v1432_v41 = vcombine.low %v1336_v35, %v1343_v36  ;;  %v3843_v42 = vcombine.high %v1336_v35, %v1343_v36  ;;  %v1448_v47 = vcombine.low %v1352_v38, %v1359_v39  ;;  %v3844_v44 = vcombine.high %v1352_v38, %v1359_v39 }
 0x4e3   : > { %v5541_v48 = vpop.eup %4518  ;;  %v2127_v45 = vsub.f32 %v2105_v63, %v2123_v40  ;;  %v1364_v63 = vcombine.low %v5517_v0, %v5527_v14 }
 0x4e4   : > { %v1439_v51 = vrot.slane %v1432_v41, %v5420_v2  ;;  %v1447_v52 = vrot.slane %v3843_v42, %v5420_v2  ;;  %v1455_v55 = vrot.slane %v1448_v47, %v5420_v2  ;;  %v1463_v56 = vrot.slane %v3844_v44, %v5420_v2 }
 0x4e5   : > { %v2134_v57 = vmul.f32 1.442695, %v2127_v45  ;;  %v2139_v58 = vsel %vm2111_vm3, %v5541_v48, 0.0  ;;  %v1281_v59 = vpop.permute.xlu0 %1280  ;;  %v1372_v11 = vrot.slane %v1364_v63, %v5420_v2 }
 0x4e6   : > { %v1464_v60 = vcombine.low %v1439_v51, %v1447_v52  ;;  %v1465_v53 = vcombine.high %v1439_v51, %v1447_v52  ;;  %v1480_v61 = vcombine.low %v1455_v55, %v1463_v56  ;;  %v1481_v62 = vcombine.high %v1455_v55, %v1463_v56  ;;  %2140 = vadd.xlane.f32.xlu0 %v2139_v58 }
 0x4e7   : > { %4522 = vpow2.f32 %v2134_v57 }
 0x4e8   : > { %v1472_v50 = vrot.slane %v1464_v60, %v5423_v9  ;;  %v1479_v1 = vrot.slane %v1465_v53, %v5423_v9  ;;  %v1488_v37 = vrot.slane %v1480_v61, %v5423_v9  ;;  %v1495_v3 = vrot.slane %v1481_v62, %v5423_v9 }
 0x4e9   : > { %v1293_v43 = vpop.permute.xlu0 %1292 }
 0x4ea   : > { %v1496_v5 = vcombine.low %v1472_v50, %v1488_v37  ;;  %v1497_v6 = vcombine.high %v1472_v50, %v1488_v37  ;;  %v1498_v7 = vcombine.low %v1479_v1, %v1495_v3  ;;  %v1499_v8 = vcombine.high %v1479_v1, %v1495_v3 }
 0x4eb   : > { %v1380_v13 = vcombine.low %v1281_v59, %v1293_v43  ;;  %v1381_v15 = vcombine.high %v1281_v59, %v1293_v43 }
 0x4ec   : > { %v5558_v18 = vpop.eup %4520  ;;  %v3974_v19 = vpack.c.bf16 %v1496_v5, %v1496_v5  ;;  %v3976_v20 = vpack.c.bf16 %v1497_v6, %v1497_v6  ;;  %v3978_v21 = vpack.c.bf16 %v1498_v7, %v1498_v7  ;;  %v3980_v22 = vpack.c.bf16 %v1499_v8, %v1499_v8 }
 0x4ed   : > { %v1388_v16 = vrot.slane %v1380_v13, %v5420_v2  ;;  %v1395_v0 = vrot.slane %v1381_v15, %v5420_v2  ;;  %v2142_v14 = vsel %vm2111_vm3, %v5558_v18, 0.0 }
 0x4ee   : > { %1600 = vst.msk [vmem:[#allocation3] sm:$0xf] %vm1267_vm1, %v3974_v19  ;;  %1602 = vst.msk [vmem:[#allocation3 + $0x8] sm:$0xf] %vm1267_vm1, %v3976_v20  ;;  %2143 = vadd.xlane.f32.xlu0 %v2142_v14 }
 0x4ef   : > { %1604 = vst.msk [vmem:[#allocation3 + $0x10] sm:$0xf] %vm1267_vm1, %v3978_v21  ;;  %1606 = vst.msk [vmem:[#allocation3 + $0x18] sm:$0xf] %vm1267_vm1, %v3980_v22  ;;  %v1396_v25 = vcombine.low %v1372_v11, %v1388_v16  ;;  %v1397_v26 = vcombine.high %v1372_v11, %v1388_v16  ;;  %v1412_v27 = vcombine.low %v1379_v23, %v1395_v0 }
 0x4f0   : > { %v1413_v28 = vcombine.high %v1379_v23, %v1395_v0 }
 0x4f1   : > { %v1404_v29 = vrot.slane %v1396_v25, %v5423_v9  ;;  %v1411_v30 = vrot.slane %v1397_v26, %v5423_v9  ;;  %v1420_v32 = vrot.slane %v1412_v27, %v5423_v9 }
 0x4f2   : > { %v1427_v33 = vrot.slane %v1413_v28, %v5423_v9 }
 0x4f3   : > { %v1500_v34 = vcombine.low %v1404_v29, %v1411_v30  ;;  %v3845_v35 = vcombine.high %v1404_v29, %v1411_v30 }
 0x4f4   : > { %v1516_v36 = vcombine.low %v1420_v32, %v1427_v33  ;;  %v3846_v38 = vcombine.high %v1420_v32, %v1427_v33  ;;  %v5573_v39 = vpop.eup %4522 }
 0x4f5   : > { %v1507_v40 = vrot.slane %v1500_v34, %v5420_v2  ;;  %v1515_v41 = vrot.slane %v3845_v35, %v5420_v2  ;;  %v2145_v44 = vsel %vm2111_vm3, %v5573_v39, 0.0 }
 0x4f6   : > { %v1523_v42 = vrot.slane %v1516_v36, %v5420_v2  ;;  %v1531_v47 = vrot.slane %v3846_v38, %v5420_v2  ;;  %2146 = vadd.xlane.f32.xlu0 %v2145_v44 }
 0x4f7   : > { %v1532_v45 = vcombine.low %v1507_v40, %v1515_v41  ;;  %v1533_v51 = vcombine.high %v1507_v40, %v1515_v41 }
 0x4f8   : > { %v1548_v52 = vcombine.low %v1523_v42, %v1531_v47  ;;  %v1549_v55 = vcombine.high %v1523_v42, %v1531_v47 }
 0x4f9   : > { %v1540_v56 = vrot.slane %v1532_v45, %v5423_v9  ;;  %v1547_v57 = vrot.slane %v1533_v51, %v5423_v9 }
 0x4fa   : > { %v1556_v58 = vrot.slane %v1548_v52, %v5423_v9  ;;  %v1563_v59 = vrot.slane %v1549_v55, %v5423_v9 }
 0x4fc   : > { %v1564_v60 = vcombine.low %v1540_v56, %v1556_v58  ;;  %v1565_v53 = vcombine.high %v1540_v56, %v1556_v58  ;;  %v1566_v61 = vcombine.low %v1547_v57, %v1563_v59  ;;  %v1567_v62 = vcombine.high %v1547_v57, %v1563_v59 }
 0x4fe   : > { %v3975_v63 = vpack.c.bf16 %v1564_v60, %v1564_v60  ;;  %v3977_v50 = vpack.c.bf16 %v1565_v53, %v1565_v53  ;;  %v3979_v1 = vpack.c.bf16 %v1566_v61, %v1566_v61  ;;  %v3981_v37 = vpack.c.bf16 %v1567_v62, %v1567_v62  ;;  %v4418_v53 = vld [vmem:[#allocation16 + $0x38] sm:$0xff]   ;;  %v4419_v61 = vld [vmem:[#allocation16 + $0x30] sm:$0xff]   ;;  %v4420_v62 = vld [vmem:[#allocation16 + $0x28] sm:$0xff]  }
 0x4ff   : > { %4191 = vmatpush3.bf16.msra.mxu0 %v4418_v53 }
 0x500   : > { %1601 = vst.msk [vmem:[#allocation3 + $0x4] sm:$0xf] %vm1267_vm1, %v3975_v63  ;;  %1603 = vst.msk [vmem:[#allocation3 + $0xc] sm:$0xf] %vm1267_vm1, %v3977_v50  ;;  %4192 = vmatprep.subr.bf16.mxu0 %v4961_v10  ;;  %v4421_v63 = vld [vmem:[#allocation16 + $0x20] sm:$0xff]   ;;  %v4422_v50 = vld [vmem:[#allocation16 + $0x18] sm:$0xff]  }
 0x501   : > { %1605 = vst.msk [vmem:[#allocation3 + $0x14] sm:$0xf] %vm1267_vm1, %v3979_v1  ;;  %1607 = vst.msk [vmem:[#allocation3 + $0x1c] sm:$0xf] %vm1267_vm1, %v3981_v37  ;;  %v4423_v1 = vld [vmem:[#allocation16 + $0x10] sm:$0xff]  }
 0x503   : > { %4193 = vmatpush3.bf16.msra.mxu0 %v4419_v61 }
 0x504   : > { %4194 = vmatprep.subr.bf16.mxu0 %v4961_v10 }
 0x507   : > { %v4414_v3 = vld [vmem:[#allocation3] sm:$0xff]   ;;  %v4416_v43 = vld [vmem:[#allocation3 + $0x8] sm:$0xff]   ;;  %4195 = vmatpush3.bf16.msra.mxu0 %v4420_v62 }
 0x508   : > { %v4415_v4 = vld [vmem:[#allocation3 + $0x10] sm:$0xff]   ;;  %v4417_v5 = vld [vmem:[#allocation3 + $0x18] sm:$0xff]   ;;  %4196 = vmatprep.subr.bf16.mxu0 %v4961_v10 }
 0x50a   : > { %2166 = vxpose.xlu1.c.b16.start.end [1/1] (short) (narrow) %v4414_v3, 32 }
 0x50b   : > { %4197 = vmatpush3.bf16.msra.mxu0 %v4421_v63 }
 0x50c   : > { %4198 = vmatprep.subr.bf16.mxu0 %v4961_v10 }
 0x50f   : > { %2326 = vxpose.xlu1.c.b16.start.end [1/1] (short) (narrow) %v4415_v4, 32  ;;  %4199 = vmatpush3.bf16.msra.mxu0 %v4422_v50 }
 0x510   : > { %4200 = vmatprep.subr.bf16.mxu0 %v4961_v10 }
 0x513   : > { %4201 = vmatpush3.bf16.msra.mxu0 %v4423_v1  ;;  %v4542_v1 = vld [vmem:[%s5263_s24] sm:$0xff]  ;;  %s643_s24 = scalar_lea.vmem [#allocation22], %s3803_s12  ;;  %s4840_s12 = scalar_lea.vmem %s4839_s22, 256 }
 0x514   : > { %4202 = vmatprep.subr.bf16.mxu0 %v4961_v10  ;;  %s3596_s30 = sshll.u32 %s643_s24, 4  ;;  %s3597_s30 = int_to_ptr.vmem [resolvable:$true] %s3596_s30 }
 0x515   : > { %p4841_p3 = scmp.lt.s32.totalorder %s3597_s30, %s4839_s22 }
 0x523   : > { %2246 = vxpose.xlu0.c.b16.start.end [1/1] (short) (narrow) %v4416_v43, 32 }
 0x528   : > { %2406 = vxpose.xlu0.c.b16.start.end [1/1] (short) (narrow) %v4417_v5, 32 }
 0x566   : > { %v2138_v6 = vpop.xlane.xlu1 %2137 }
 0x567   : > { %4524 = vrcp.f32 %v2138_v6 }
 0x56c   : > { %v2174_v7 = vpop.trf.xlu1 }
 0x56d   : > { %4168 = vmatprep.mubr.msk.bf16.mxu1 %vm2111_vm3, %v2174_v7 }
 0x56f   : > { %v2141_v8 = vpop.xlane.xlu0 %2140 }
 0x570   : > { %4526 = vrcp.f32 %v2141_v8  ;;  %v2175_v22 = vpop.trf.xlu1 }
 0x574   : > { %v4525_v11 = vpop.eup %4524  ;;  %v2334_v28 = vpop.trf.xlu1 }
 0x575   : > { %v2152_v13 = vmul.f32 %v4525_v11, %v5529_v24 }
 0x577   : > { %v2144_v15 = vpop.xlane.xlu0 %2143  ;;  %v2156_v19 = vpack.c.bf16 %v2152_v13, %v2152_v13 }
 0x578   : > { %4528 = vrcp.f32 %v2144_v15  ;;  %v2335_v33 = vpop.trf.xlu1 }
 0x579   : > { %4210 = vmatprep.subr.msk.bf16.mxu1 %vm2111_vm3, %v2156_v19  ;;  %v2189_v20 = vsel %vm2111_vm3, %v2156_v19, 0 }
 0x57a   : > { %4167 = vmatpush3.bf16.xpose.msra.mxu1 %v2189_v20 }
 0x57d   : > { %v4527_v21 = vpop.eup %4526 }
 0x57e   : > { %v2153_v23 = vmul.f32 %v4527_v21, %v5541_v48 }
 0x57f   : > { %v2147_v16 = vpop.xlane.xlu0 %2146 }
 0x580   : > { %v2157_v0 = vpack.c.bf16 %v2153_v23, %v2153_v23  ;;  %4530 = vrcp.f32 %v2147_v16  ;;  %v4424_v16 = vld [vmem:[#allocation16 + $0x8] sm:$0xff]  }
 0x581   : > { %4169 = vmatmul.mubr.msk.bf16.vlgmr.msra.gmra.mxu1 %vm2111_vm3, %v2175_v22  ;;  %4203 = vmatpush3.bf16.msra.mxu0 %v4424_v16  ;;  %v4441_v16 = vld [vmem:[#allocation17 + $0xa8] ss:$16 sps:$4 sm:$0xff]  }
 0x582   : > { %4211 = vmatprep.subr.msk.bf16.mxu1 %vm2111_vm3, %v2157_v0  ;;  %v2269_v24 = vsel %vm2111_vm3, %v2157_v0, 0  ;;  %4204 = vmatprep.subr.bf16.mxu0 %v4961_v10 }
 0x583   : > { %4173 = vmatpush3.bf16.xpose.msra.mxu1 %v2269_v24 }
 0x585   : > { %v4529_v14 = vpop.eup %4528  ;;  %v2254_v25 = vpop.trf.xlu0 }
 0x586   : > { %v2154_v26 = vmul.f32 %v4529_v14, %v5558_v18  ;;  %4174 = vmatprep.mubr.msk.bf16.mxu1 %vm2111_vm3, %v2254_v25 }
 0x588   : > { %v2158_v27 = vpack.c.bf16 %v2154_v26, %v2154_v26 }
 0x589   : > { %v2255_v29 = vpop.trf.xlu0 }
 0x58a   : > { %4212 = vmatprep.subr.msk.bf16.mxu1 %vm2111_vm3, %v2158_v27  ;;  %v2349_v48 = vsel %vm2111_vm3, %v2158_v27, 0  ;;  %4175 = vmatmul.mubr.msk.bf16.vlgmr.msra.gmra.mxu1 %vm2111_vm3, %v2255_v29 }
 0x58b   : > { %4179 = vmatpush3.bf16.xpose.msra.mxu1 %v2349_v48  ;;  %4180 = vmatprep.mubr.msk.bf16.mxu1 %vm2111_vm3, %v2334_v28  ;;  %v4425_v48 = vld [vmem:[#allocation16] sm:$0xff]  }
 0x58c   : > { %4205 = vmatpush3.bf16.msra.mxu0 %v4425_v48  ;;  %v4458_v48 = vld [vmem:[#allocation17 + $0x44] ss:$16 sps:$4 sm:$0xff]  }
 0x58d   : > { %v4531_v30 = vpop.eup %4530  ;;  %v2414_v18 = vpop.trf.xlu0 }
 0x58e   : > { %v2155_v32 = vmul.f32 %v4531_v30, %v5573_v39 }
 0x590   : > { %v2159_v34 = vpack.c.bf16 %v2155_v32, %v2155_v32 }
 0x591   : > { %v2415_v36 = vpop.trf.xlu0 }
 0x592   : > { %4181 = vmatmul.mubr.msk.bf16.vlgmr.msra.gmra.mxu1 %vm2111_vm3, %v2335_v33  ;;  %4213 = vmatprep.subr.msk.bf16.mxu1 %vm2111_vm3, %v2159_v34  ;;  %v2429_v35 = vsel %vm2111_vm3, %v2159_v34, 0 }
 0x593   : > { %4185 = vmatpush3.bf16.xpose.msra.mxu1 %v2429_v35  ;;  %4186 = vmatprep.mubr.msk.bf16.mxu1 %vm2111_vm3, %v2414_v18 }
 0x59a   : > { %4187 = vmatmul.mubr.msk.bf16.vlgmr.msra.gmra.mxu1 %vm2111_vm3, %v2415_v36 }
 0x59b   : > { %3144 = vmatprep.mubr.bf16.mxu1 %v4968_v31 }
 0x641   : > { %v4170_v38 = vpop.f32.mrf.mxu1 }
 0x643   : > { %v2225_v40 = vpop.f32.mrf.mxu1 }
 0x644   : > { %2480 = vxpose.xlu1.b32.start [1/4] (short) (narrow) %v2225_v40, 8 }
 0x645   : > { %v4171_v39 = vpop.f32.mrf.mxu1 }
 0x647   : > { %v2228_v41 = vpop.f32.mrf.mxu1 }
 0x648   : > { %2481 = vxpose.xlu1.b32.cont [2/4] (short) (narrow) %v2228_v41, 8 }
 0x64a   : > { %v4176_v42 = vpop.f32.mrf.mxu1 }
 0x64c   : > { %2482 = vxpose.xlu1.b32.cont [3/4] (short) (narrow) %v4170_v38, 8  ;;  %v2305_v47 = vpop.f32.mrf.mxu1 }
 0x64d   : > { %2512 = vxpose.xlu0.b32.start [1/4] (short) (narrow) %v2305_v47, 8 }
 0x64e   : > { %v4177_v44 = vpop.f32.mrf.mxu1 }
 0x650   : > { %2483 = vxpose.xlu1.b32.end [4/4] (short) (narrow) %v4171_v39, 8  ;;  %v2308_v45 = vpop.f32.mrf.mxu1 }
 0x651   : > { %2513 = vxpose.xlu0.b32.cont [2/4] (short) (narrow) %v2308_v45, 8 }
 0x652   : > { %v4182_v51 = vpop.f32.mrf.mxu1 }
 0x654   : > { %v2385_v52 = vpop.f32.mrf.mxu1 }
 0x655   : > { %2514 = vxpose.xlu0.b32.cont [3/4] (short) (narrow) %v4176_v42, 8 }
 0x656   : > { %v4183_v55 = vpop.f32.mrf.mxu1 }
 0x658   : > { %v2388_v56 = vpop.f32.mrf.mxu1 }
 0x659   : > { %2515 = vxpose.xlu0.b32.end [4/4] (short) (narrow) %v4177_v44, 8 }
 0x65a   : > { %v4188_v57 = vpop.f32.mrf.mxu1 }
 0x65c   : > { %v2465_v58 = vpop.f32.mrf.mxu1 }
 0x65d   : > { %2544 = vxpose.xlu0.b32.start [1/4] (short) (narrow) %v2385_v52, 8  ;;  %2576 = vxpose.xlu1.b32.start [1/4] (short) (narrow) %v2465_v58, 8  ;;  %v5641_v58 = vld [vmem:[%s5785_s13 + $0x8] sm:$0xf] }
 0x65e   : > { %v4189_v59 = vpop.f32.mrf.mxu1 }
 0x660   : > { %v2468_v60 = vpop.f32.mrf.mxu1 }
 0x661   : > { %2545 = vxpose.xlu0.b32.cont [2/4] (short) (narrow) %v2388_v56, 8  ;;  %2577 = vxpose.xlu1.b32.cont [2/4] (short) (narrow) %v2468_v60, 8  ;;  %v2873_v60 = vrot.slane %v5641_v58, %v5380_v17 }
 0x665   : > { %2546 = vxpose.xlu0.b32.cont [3/4] (short) (narrow) %v4182_v51, 8  ;;  %2578 = vxpose.xlu1.b32.cont [3/4] (short) (narrow) %v4188_v57, 8 }
 0x669   : > { %2547 = vxpose.xlu0.b32.end [4/4] (short) (narrow) %v4183_v55, 8  ;;  %2579 = vxpose.xlu1.b32.end [4/4] (short) (narrow) %v4189_v59, 8  ;;  %v2781_v59 = vrot.slane %v5641_v58, %v5375_v12 }
 0x6c0   : > { %v2496_v37 = vpop.trf.xlu1 }
 0x6c9   : > { %v2528_v3 = vpop.trf.xlu0 }
 0x6d9   : > { %v2560_v4 = vpop.trf.xlu0  ;;  %v2592_v43 = vpop.trf.xlu1 }
 0x6da   : > { %v2608_v5 = vcombine.low %v2496_v37, %v2560_v4  ;;  %v2609_v6 = vcombine.high %v2496_v37, %v2560_v4  ;;  %v2624_v7 = vcombine.low %v2528_v3, %v2592_v43  ;;  %v2625_v8 = vcombine.high %v2528_v3, %v2592_v43  ;;  %v4428_v4 = vld [vmem:[#allocation17 + $0xe4] ss:$16 sps:$4 sm:$0xff]   ;;  %v4429_v43 = vld [vmem:[#allocation17 + $0xe8] ss:$16 sps:$4 sm:$0xff]  }
 0x6db   : > { %3112 = vmatprep.subr.bf16.mxu1 %v4428_v4  ;;  %v4485_v4 = vld [vmem:[#allocation19 + $0xa8] sm:$0xff]  }
 0x6dc   : > { %v2616_v11 = vrot.slane %v2608_v5, %v5420_v2  ;;  %v2623_v13 = vrot.slane %v2609_v6, %v5420_v2  ;;  %v2632_v15 = vrot.slane %v2624_v7, %v5420_v2  ;;  %v2639_v19 = vrot.slane %v2625_v8, %v5420_v2  ;;  %v4431_v5 = vld [vmem:[#allocation17 + $0xec] ss:$16 sps:$4 sm:$0xff]   ;;  %v4434_v6 = vld [vmem:[#allocation17 + $0xc4] ss:$16 sps:$4 sm:$0xff]   ;;  %v4432_v8 = vld [vmem:[#allocation17 + $0xc0] ss:$16 sps:$4 sm:$0xff]  }
 0x6dd   : > { %v4437_v7 = vld [vmem:[#allocation17 + $0xcc] ss:$16 sps:$4 sm:$0xff]   ;;  %3153 = vmatprep.subr.bf16.mxu0 %v4431_v5  ;;  %v4487_v5 = vld [vmem:[#allocation19 + $0xe0] sm:$0xff]  }
 0x6de   : > { %v2640_v20 = vcombine.low %v2616_v11, %v2632_v15  ;;  %v2641_v21 = vcombine.high %v2616_v11, %v2632_v15  ;;  %v2656_v22 = vcombine.low %v2623_v13, %v2639_v19  ;;  %v2657_v23 = vcombine.high %v2623_v13, %v2639_v19  ;;  %v4435_v11 = vld [vmem:[#allocation17 + $0xc8] ss:$16 sps:$4 sm:$0xff]  }
 0x6e0   : > { %v2648_v0 = vrot.slane %v2640_v20, %v5423_v9  ;;  %v2655_v24 = vrot.slane %v2641_v21, %v5423_v9  ;;  %v2664_v14 = vrot.slane %v2656_v22, %v5423_v9  ;;  %v2671_v25 = vrot.slane %v2657_v23, %v5423_v9  ;;  %v4440_v21 = vld [vmem:[#allocation17 + $0xa4] ss:$16 sps:$4 sm:$0xff]   ;;  %v4443_v22 = vld [vmem:[#allocation17 + $0xac] ss:$16 sps:$4 sm:$0xff]   ;;  %v4438_v23 = vld [vmem:[#allocation17 + $0xa0] ss:$16 sps:$4 sm:$0xff]  }
 0x6e2   : > { %v2676_v26 = vcombine.low %v2648_v0, %v2655_v24  ;;  %v3887_v27 = vcombine.high %v2648_v0, %v2655_v24  ;;  %v2692_v28 = vcombine.low %v2664_v14, %v2671_v25  ;;  %v3888_v29 = vcombine.high %v2664_v14, %v2671_v25  ;;  %v4444_v0 = vld [vmem:[#allocation17 + $0x80] ss:$16 sps:$4 sm:$0xff]   ;;  %v4446_v24 = vld [vmem:[#allocation17 + $0x84] ss:$16 sps:$4 sm:$0xff]   ;;  %v4447_v14 = vld [vmem:[#allocation17 + $0x88] ss:$16 sps:$4 sm:$0xff]  }
 0x6e3   : > { %v4449_v25 = vld [vmem:[#allocation17 + $0x8c] ss:$16 sps:$4 sm:$0xff]  }
 0x6e4   : > { %v2683_v30 = vrot.slane %v2676_v26, %v5420_v2  ;;  %v2691_v32 = vrot.slane %v3887_v27, %v5420_v2  ;;  %v2699_v33 = vrot.slane %v2692_v28, %v5420_v2  ;;  %v2707_v34 = vrot.slane %v3888_v29, %v5420_v2  ;;  %v4452_v26 = vld [vmem:[#allocation17 + $0x64] ss:$16 sps:$4 sm:$0xff]   ;;  %v4455_v27 = vld [vmem:[#allocation17 + $0x6c] ss:$16 sps:$4 sm:$0xff]   ;;  %v4450_v28 = vld [vmem:[#allocation17 + $0x60] ss:$16 sps:$4 sm:$0xff]  }
 0x6e5   : > { %v4453_v29 = vld [vmem:[#allocation17 + $0x68] ss:$16 sps:$4 sm:$0xff]  }
 0x6e6   : > { %v2709_v18 = vcombine.high %v2683_v30, %v2691_v32  ;;  %v2725_v35 = vcombine.high %v2699_v33, %v2707_v34  ;;  %v2708_v36 = vcombine.low %v2683_v30, %v2691_v32  ;;  %v2724_v38 = vcombine.low %v2699_v33, %v2707_v34  ;;  %v4461_v30 = vld [vmem:[#allocation17 + $0x4c] ss:$16 sps:$4 sm:$0xff]   ;;  %v4456_v32 = vld [vmem:[#allocation17 + $0x40] ss:$16 sps:$4 sm:$0xff]   ;;  %v4459_v33 = vld [vmem:[#allocation17 + $0x48] ss:$16 sps:$4 sm:$0xff]  }
 0x6e7   : > { %v4464_v34 = vld [vmem:[#allocation17 + $0x24] ss:$16 sps:$4 sm:$0xff]  }
 0x6e8   : > { %v2723_v10 = vrot.slane %v2709_v18, %v5423_v9  ;;  %v2739_v40 = vrot.slane %v2725_v35, %v5423_v9  ;;  %v2716_v39 = vrot.slane %v2708_v36, %v5423_v9  ;;  %v2732_v41 = vrot.slane %v2724_v38, %v5423_v9  ;;  %v4467_v18 = vld [vmem:[#allocation17 + $0x2c] ss:$16 sps:$4 sm:$0xff]   ;;  %v4462_v35 = vld [vmem:[#allocation17 + $0x20] ss:$16 sps:$4 sm:$0xff]   ;;  %v4465_v36 = vld [vmem:[#allocation17 + $0x28] ss:$16 sps:$4 sm:$0xff]  }
 0x6e9   : > { %v4470_v38 = vld [vmem:[#allocation17 + $0x4] ss:$16 sps:$4 sm:$0xff]  }
 0x6ea   : > { %v2742_v42 = vcombine.low %v2723_v10, %v2739_v40  ;;  %v2741_v47 = vcombine.high %v2716_v39, %v2732_v41  ;;  %v2740_v44 = vcombine.low %v2716_v39, %v2732_v41  ;;  %v2743_v2 = vcombine.high %v2723_v10, %v2739_v40  ;;  %v4473_v10 = vld [vmem:[#allocation17 + $0xc] ss:$16 sps:$4 sm:$0xff]   ;;  %v4468_v40 = vld [vmem:[#allocation17] ss:$16 sps:$4 sm:$0xff]   ;;  %v4471_v39 = vld [vmem:[#allocation17 + $0x8] ss:$16 sps:$4 sm:$0xff]  }
 0x6ec   : > { %2749 = vrot.lane.b32.xlu1 %v2742_v42, %s4963_s10  ;;  %2745 = vrot.lane.b32.xlu0 %v2741_v47, %s4965_s19  ;;  %s3594_s10 = scalar_lea.hbm %s5788_s18, %s3962_s25  ;;  %s4834_s19 = scalar_lea.vmem %s3597_s30, 128 }
 0x6ed   : > { %p4835_p6 = scmp.ne.s32.totalorder %s3597_s30, %s4834_s19  ;;  %p4842_p1 = scmp.lt.s32.totalorder %s4840_s12, %s4834_s19 }
 0x6ef   : > { %p4836_p4 = pnand %p4835_p6, %p5152_p9  ;;  %p4843_p7 = por %p4842_p1, %p4841_p3 }
 0x6f0   : > { %2753 = vrot.lane.b32.xlu1 %v2743_v2, %s4964_s8  ;;  %v2894_v2 = vsub.s32 7, %v5341_v46  ;;  %s3582_s8 = scalar_lea.sflag [#allocation6], %s5258_s6 }
 0x6f1   : > { %p4837_p10 = pneg %p4836_p4 }
 0x6f3   : > { %p4844_p0 = pnand %p4843_p7, %p4837_p10 }
 0x75e   : > { %v2750_v45 = vpop.permute.xlu1 %2749  ;;  %v2746_v51 = vpop.permute.xlu0 %2745 }
 0x75f   : > { %v2756_v52 = vsel %vm1911_vm2, %v2740_v44, %v2746_v51  ;;  %v2889_v44 = vsub.s32 6, %v5341_v46  ;;  %v4477_v46 = vld [vmem:[#allocation19 + $0xb8] sm:$0xff]  }
 0x760   : > { %v2758_v56 = vsel %vm2757_vm4, %v2756_v52, %v2750_v45  ;;  %v4543_v45 = vld [vmem:[%s5785_s13] sm:$0xff] }
 0x761   : > { %v2890_v51 = vrot.slane %v4543_v45, %v2889_v44 }
 0x762   : > { %v2754_v55 = vpop.permute.xlu1 %2753 }
 0x763   : > { %v2760_v9 = vsel %vm2759_vm5, %v2758_v56, %v2754_v55  ;;  %v2895_v56 = vrot.slane %v4543_v45, %v2894_v2 }
 0x764   : > { %v2761_v57 = vpack.c.bf16 %v2760_v9, %v2760_v9 }
 0x766   : > { %4207 = vmatmul.mubr.bf16.vlgmr.msra.gmra.mxu0 %v2761_v57 }
 0x767   : > { %3185 = vmatprep.mubr.bf16.mxu0 %v4968_v31  ;;  %v4426_v31 = vld [vmem:[#allocation17 + $0xe0] ss:$16 sps:$4 sm:$0xff]   ;;  %3154 = vmatpush1.bf16.msra.mxu0 %v4429_v43 }
 0x768   : > { %3113 = vmatpush1.bf16.msra.mxu1 %v4426_v31  ;;  %3155 = vmatprep.subr.bf16.mxu0 %v4437_v7  ;;  %v4484_v31 = vld [vmem:[#allocation19 + $0x28] sm:$0xff]   ;;  %v4486_v43 = vld [vmem:[#allocation19 + $0x60] sm:$0xff]  }
 0x769   : > { %3114 = vmatprep.subr.bf16.mxu1 %v4434_v6  ;;  %v4488_v6 = vld [vmem:[#allocation19 + $0x20] sm:$0xff]  }
 0x76a   : > { %v4489_v7 = vld [vmem:[#allocation19 + $0xa0] sm:$0xff]  }
 0x76b   : > { %3156 = vmatpush1.bf16.msra.mxu0 %v4435_v11  ;;  %v4491_v11 = vld [vmem:[#allocation19 + $0xd8] sm:$0xff]  }
 0x76c   : > { %3115 = vmatpush1.bf16.msra.mxu1 %v4432_v8  ;;  %3157 = vmatprep.subr.bf16.mxu0 %v4443_v22  ;;  %v4490_v8 = vld [vmem:[#allocation19 + $0x58] sm:$0xff]   ;;  %v4497_v22 = vld [vmem:[#allocation19 + $0x90] sm:$0xff]  }
 0x76d   : > { %3116 = vmatprep.subr.bf16.mxu1 %v4440_v21  ;;  %v4496_v21 = vld [vmem:[#allocation19 + $0x10] sm:$0xff]  }
 0x76f   : > { %3158 = vmatpush1.bf16.msra.mxu0 %v4441_v16  ;;  %v4499_v16 = vld [vmem:[#allocation19 + $0xc8] sm:$0xff]  }
 0x770   : > { %3117 = vmatpush1.bf16.msra.mxu1 %v4438_v23  ;;  %3159 = vmatprep.subr.bf16.mxu0 %v4449_v25  ;;  %v4498_v23 = vld [vmem:[#allocation19 + $0x48] sm:$0xff]   ;;  %v4503_v25 = vld [vmem:[#allocation19 + $0xc0] sm:$0xff]  }
 0x771   : > { %3118 = vmatprep.subr.bf16.mxu1 %v4446_v24  ;;  %v4501_v24 = vld [vmem:[#allocation19 + $0x88] sm:$0xff]  }
 0x773   : > { %3160 = vmatpush1.bf16.msra.mxu0 %v4447_v14  ;;  %v4502_v14 = vld [vmem:[#allocation19 + $0x40] sm:$0xff]  }
 0x774   : > { %3119 = vmatpush1.bf16.msra.mxu1 %v4444_v0  ;;  %3161 = vmatprep.subr.bf16.mxu0 %v4455_v27  ;;  %v4500_v0 = vld [vmem:[#allocation19 + $0x8] sm:$0xff]   ;;  %v4505_v27 = vld [vmem:[#allocation19 + $0x80] sm:$0xff]  }
 0x775   : > { %3120 = vmatprep.subr.bf16.mxu1 %v4452_v26  ;;  %v4504_v26 = vld [vmem:[#allocation19] sm:$0xff]  }
 0x777   : > { %3162 = vmatpush1.bf16.msra.mxu0 %v4453_v29 }
 0x778   : > { %3121 = vmatpush1.bf16.msra.mxu1 %v4450_v28  ;;  %3163 = vmatprep.subr.bf16.mxu0 %v4461_v30  ;;  %v2930_v28 = vld [vmem:[%s5786_s4] sm:$0xf] }
 0x779   : > { %3122 = vmatprep.subr.bf16.mxu1 %v4458_v48  ;;  %v2935_v29 = vrot.slane %v2930_v28, %v5375_v12  ;;  %v2943_v48 = vrot.slane %v2930_v28, %v5348_v49  ;;  %v2939_v30 = vrot.slane %v2930_v28, %v5380_v17 }
 0x77b   : > { %3164 = vmatpush1.bf16.msra.mxu0 %v4459_v33 }
 0x77c   : > { %3123 = vmatpush1.bf16.msra.mxu1 %v4456_v32  ;;  %3165 = vmatprep.subr.bf16.mxu0 %v4467_v18  ;;  %v2947_v32 = vrot.slane %v2930_v28, %v5359_v54 }
 0x77d   : > { %3124 = vmatprep.subr.bf16.mxu1 %v4464_v34 }
 0x77f   : > { %3166 = vmatpush1.bf16.msra.mxu0 %v4465_v36 }
 0x780   : > { %3125 = vmatpush1.bf16.msra.mxu1 %v4462_v35  ;;  %3167 = vmatprep.subr.bf16.mxu0 %v4473_v10 }
 0x781   : > { %3126 = vmatprep.subr.bf16.mxu1 %v4470_v38 }
 0x783   : > { %3168 = vmatpush1.bf16.msra.mxu0 %v4471_v39 }
 0x784   : > { %3127 = vmatpush1.bf16.msra.mxu1 %v4468_v40 }
 0x826   : > { %v2864_v53 = vpop.f32.mrf.mxu0 }
 0x827   : > { %v2865_v61 = vadd.f32 %v2864_v53, %v2781_v59  ;;  %v4475_v53 = vld [vmem:[#allocation19 + $0xf8] sm:$0xff]  }
 0x828   : > { %v4208_v62 = vpop.f32.mrf.mxu0  ;;  %4060 = vmatprep.subr.bf16.mxu0 %v4475_v53 }
 0x829   : > { %v2874_v63 = vmul.f32 %v2873_v60, %v2865_v61  ;;  %v4474_v60 = vld [vmem:[#allocation19 + $0x78] sm:$0xff]   ;;  %v4478_v62 = vld [vmem:[#allocation19 + $0x70] sm:$0xff]  }
 0x82a   : > { %v2867_v50 = vpop.f32.mrf.mxu0  ;;  %v4476_v61 = vld [vmem:[#allocation19 + $0x38] sm:$0xff]   ;;  %4038 = vmatprep.subr.bf16.mxu1 %v4474_v60 }
 0x82b   : > { %v2875_v37 = vadd.f32 %v4542_v1, %v2874_v63  ;;  %v4479_v63 = vld [vmem:[#allocation19 + $0xf0] sm:$0xff]  }
 0x82c   : > { %v4209_v3 = vpop.f32.mrf.mxu0  ;;  %v4480_v50 = vld [vmem:[#allocation19 + $0x30] sm:$0xff]  }
 0x82d   : > { %2876 = vadd.xlane.f32.xlu1 %v2875_v37  ;;  %v4481_v1 = vld [vmem:[#allocation19 + $0xb0] sm:$0xff]   ;;  %v4483_v3 = vld [vmem:[#allocation19 + $0xe8] sm:$0xff]  }
 0x8b6   : > { %v2877_v13 = vpop.xlane.xlu1 %2876 }
 0x8b7   : > { %v2878_v15 = vmul.f32 0.0078125, %v2877_v13  ;;  %v4492_v13 = vld [vmem:[#allocation19 + $0x18] sm:$0xff]  }
 0x8b9   : > { %v2879_v19 = vsub.f32 %v2875_v37, %v2878_v15  ;;  %v4482_v37 = vld [vmem:[#allocation19 + $0x68] sm:$0xff]   ;;  %v4493_v15 = vld [vmem:[#allocation19 + $0x98] sm:$0xff]  }
 0x8bb   : > { %v2880_v20 = vmul.f32 %v2879_v19, %v2879_v19 }
 0x8bd   : > { %2881 = vadd.xlane.f32.xlu0 %v2880_v20  ;;  %v4495_v20 = vld [vmem:[#allocation19 + $0xd0] sm:$0xff]  }
 0x946   : > { %v2882_v41 = vpop.xlane.xlu0 %2881 }
 0x947   : > { %v2883_v42 = vmul.f32 0.0078125, %v2882_v41 }
 0x949   : > { %v2884_v47 = vadd.f32 1e-06, %v2883_v42 }
 0x94b   : > { %4532 = vrsqrt.f32 %v2884_v47 }
 0x958   : > { %v4533_v52 = vpop.eup %4532 }
 0x959   : > { %v2886_v55 = vmul.f32 %v4533_v52, %v2879_v19  ;;  %v4494_v19 = vld [vmem:[#allocation19 + $0x50] sm:$0xff]  }
 0x95b   : > { %v2891_v9 = vmul.f32 %v2890_v51, %v2886_v55 }
 0x95d   : > { %v5653_v57 = vadd.f32 %v2895_v56, %v2891_v9 }
 0x95f   : > { %v2897_v59 = vpack.c.bf16 %v5653_v57, %v5653_v57 }
 0x961   : > { %3145 = vmatmul.mubr.bf16.vlgmr.msra.gmra.mxu1 %v2897_v59  ;;  %3186 = vmatmul.mubr.bf16.vlgmr.msra.gmra.mxu0 %v2897_v59 }
 0x962   : > { %4039 = vmatpush3.bf16.msra.mxu1 %v4476_v61  ;;  %4061 = vmatpush3.bf16.msra.mxu0 %v4477_v46 }
 0x963   : > { %4040 = vmatprep.subr.bf16.mxu1 %v4478_v62  ;;  %4062 = vmatprep.subr.bf16.mxu0 %v4479_v63 }
 0x966   : > { %4041 = vmatpush3.bf16.msra.mxu1 %v4480_v50  ;;  %4063 = vmatpush3.bf16.msra.mxu0 %v4481_v1 }
 0x967   : > { %4042 = vmatprep.subr.bf16.mxu1 %v4482_v37  ;;  %4064 = vmatprep.subr.bf16.mxu0 %v4483_v3 }
 0x96a   : > { %4043 = vmatpush3.bf16.msra.mxu1 %v4484_v31  ;;  %4065 = vmatpush3.bf16.msra.mxu0 %v4485_v4 }
 0x96b   : > { %4044 = vmatprep.subr.bf16.mxu1 %v4486_v43  ;;  %4066 = vmatprep.subr.bf16.mxu0 %v4487_v5 }
 0x96e   : > { %4045 = vmatpush3.bf16.msra.mxu1 %v4488_v6  ;;  %4067 = vmatpush3.bf16.msra.mxu0 %v4489_v7 }
 0x96f   : > { %4046 = vmatprep.subr.bf16.mxu1 %v4490_v8  ;;  %4068 = vmatprep.subr.bf16.mxu0 %v4491_v11 }
 0x972   : > { %4047 = vmatpush3.bf16.msra.mxu1 %v4492_v13  ;;  %4069 = vmatpush3.bf16.msra.mxu0 %v4493_v15 }
 0x973   : > { %4048 = vmatprep.subr.bf16.mxu1 %v4494_v19  ;;  %4070 = vmatprep.subr.bf16.mxu0 %v4495_v20 }
 0x976   : > { %4049 = vmatpush3.bf16.msra.mxu1 %v4496_v21  ;;  %4071 = vmatpush3.bf16.msra.mxu0 %v4497_v22 }
 0x977   : > { %4050 = vmatprep.subr.bf16.mxu1 %v4498_v23  ;;  %4072 = vmatprep.subr.bf16.mxu0 %v4499_v16 }
 0x97a   : > { %4051 = vmatpush3.bf16.msra.mxu1 %v4500_v0  ;;  %4073 = vmatpush3.bf16.msra.mxu0 %v4501_v24 }
 0x97b   : > { %4052 = vmatprep.subr.bf16.mxu1 %v4502_v14  ;;  %4074 = vmatprep.subr.bf16.mxu0 %v4503_v25 }
 0x97e   : > { %4053 = vmatpush3.bf16.msra.mxu1 %v4504_v26  ;;  %4075 = vmatpush3.bf16.msra.mxu0 %v4505_v27  ;;  %v3301_v27 = vrot.slane %v5641_v58, %v5359_v54 }
 0xa21   : > { %v3146_v33 = vpop.f32.mrf.mxu1  ;;  %v3187_v34 = vpop.f32.mrf.mxu0 }
 0xa22   : > { %v3147_v18 = vadd.f32 %v3146_v33, %v2935_v29  ;;  %v3188_v35 = vadd.f32 %v3187_v34, %v2943_v48  ;;  %v3577_v34 = vrot.slane %v5641_v58, %v5348_v49 }
 0xa23   : > { %v3148_v36 = vpop.f32.mrf.mxu1  ;;  %v3189_v38 = vpop.f32.mrf.mxu0 }
 0xa24   : > { %v3198_v10 = vmul.f32 0.044715, %v3147_v18  ;;  %v3200_v40 = vmul.f32 0.044715, %v3188_v35  ;;  %v3149_v39 = vadd.f32 %v3148_v36, %v2939_v30  ;;  %v3190_v41 = vadd.f32 %v3189_v38, %v2947_v32 }
 0xa25   : > { %v3150_v42 = vpop.f32.mrf.mxu1  ;;  %v3191_v47 = vpop.f32.mrf.mxu0  ;;  %v3194_v5 = vmul.f32 0.5, %v3147_v18  ;;  %v3196_v13 = vmul.f32 0.5, %v3188_v35 }
 0xa26   : > { %v3202_v44 = vmul.f32 %v3198_v10, %v3147_v18  ;;  %v3204_v12 = vmul.f32 %v3200_v40, %v3188_v35  ;;  %v3199_v2 = vmul.f32 0.044715, %v3149_v39  ;;  %v3201_v45 = vmul.f32 0.044715, %v3190_v41 }
 0xa27   : > { %v3151_v51 = vpop.f32.mrf.mxu1  ;;  %v3192_v17 = vpop.f32.mrf.mxu0  ;;  %v3195_v8 = vmul.f32 0.5, %v3149_v39  ;;  %v3197_v15 = vmul.f32 0.5, %v3190_v41 }
 0xa28   : > { %v3206_v52 = vmul.f32 %v3202_v44, %v3147_v18  ;;  %v3208_v55 = vmul.f32 %v3204_v12, %v3188_v35  ;;  %v3203_v56 = vmul.f32 %v3199_v2, %v3149_v39  ;;  %v3205_v9 = vmul.f32 %v3201_v45, %v3190_v41 }
 0xa2a   : > { %v3210_v59 = vadd.f32 %v3206_v52, %v3147_v18  ;;  %v3212_v60 = vadd.f32 %v3208_v55, %v3188_v35  ;;  %v3207_v53 = vmul.f32 %v3203_v56, %v3149_v39  ;;  %v3209_v61 = vmul.f32 %v3205_v9, %v3190_v41 }
 0xa2c   : > { %v3214_v46 = vmul.f32 0.7978846, %v3210_v59  ;;  %v3216_v62 = vmul.f32 0.7978846, %v3212_v60  ;;  %v3211_v63 = vadd.f32 %v3207_v53, %v3149_v39  ;;  %v3213_v50 = vadd.f32 %v3209_v61, %v3190_v41 }
 0xa2e   : > { %v3215_v1 = vmul.f32 0.7978846, %v3211_v63  ;;  %v3217_v37 = vmul.f32 0.7978846, %v3213_v50  ;;  %4534 = vtanh.f32 %v3214_v46 }
 0xa2f   : > { %4536 = vtanh.f32 %v3216_v62 }
 0xa30   : > { %4538 = vtanh.f32 %v3215_v1 }
 0xa31   : > { %4540 = vtanh.f32 %v3217_v37 }
 0xa3b   : > { %v4535_v3 = vpop.eup %4534 }
 0xa3c   : > { %v4537_v31 = vpop.eup %4536  ;;  %v3222_v4 = vadd.f32 1.0, %v4535_v3 }
 0xa3d   : > { %v4539_v43 = vpop.eup %4538  ;;  %v3224_v6 = vadd.f32 1.0, %v4537_v31 }
 0xa3e   : > { %v4541_v7 = vpop.eup %4540  ;;  %v3223_v11 = vadd.f32 1.0, %v4539_v43  ;;  %v3226_v20 = vmul.f32 %v3222_v4, %v3194_v5 }
 0xa3f   : > { %v3225_v19 = vadd.f32 1.0, %v4541_v7  ;;  %v3228_v22 = vmul.f32 %v3224_v6, %v3196_v13 }
 0xa40   : > { %v3227_v21 = vmul.f32 %v3223_v11, %v3195_v8  ;;  %v3230_v24 = vpack.c.bf16 %v3226_v20, %v3226_v20 }
 0xa41   : > { %v3229_v23 = vmul.f32 %v3225_v19, %v3197_v15  ;;  %v3232_v14 = vpack.c.bf16 %v3228_v22, %v3228_v22 }
 0xa42   : > { %v3231_v16 = vpack.c.bf16 %v3227_v21, %v3227_v21 }
 0xa43   : > { %v3233_v0 = vpack.c.bf16 %v3229_v23, %v3229_v23 }
 0xa44   : > { %3526 = vmatprep.mubr.bf16.mxu1 %v3231_v16 }
 0xa45   : > { %3566 = vmatprep.mubr.bf16.mxu0 %v3233_v0  ;;  %3527 = vmatmul.mubr.bf16.vlgmr.msra.gmra.mxu1 %v3230_v24 }
 0xa46   : > { %3567 = vmatmul.mubr.bf16.vlgmr.msra.gmra.mxu0 %v3232_v14 }
 0xb05   : > { %v4054_v25 = vpop.f32.mrf.mxu1 }
 0xb06   : > { %v4076_v26 = vpop.f32.mrf.mxu0 }
 0xb07   : > { %v4055_v28 = vpop.f32.mrf.mxu1 }
 0xb08   : > { %v4056_v29 = vadd.f32 %v4055_v28, %v4054_v25  ;;  %v4077_v48 = vpop.f32.mrf.mxu0 }
 0xb09   : > { %v4057_v30 = vpop.f32.mrf.mxu1  ;;  %v4078_v33 = vadd.f32 %v4077_v48, %v4076_v26 }
 0xb0a   : > { %v3529_v32 = vadd.f32 %v4056_v29, %v3301_v27  ;;  %v4079_v18 = vpop.f32.mrf.mxu0 }
 0xb0b   : > { %v4058_v35 = vpop.f32.mrf.mxu1 }
 0xb0c   : > { %v3569_v36 = vadd.f32 %v4078_v33, %v3529_v32  ;;  %v4080_v38 = vpop.f32.mrf.mxu0 }
 0xb0e   : > { %v3578_v54 = vmul.f32 %v3577_v34, %v3569_v36 }
 0xb10   : > { %v3579_v10 = vadd.f32 %v3578_v54, %v5653_v57 }
 0xb12   : > { %3580 = vst [vmem:[%s643_s24] sm:$0xff] %v3579_v10 }
 0xb13   : > { %4847 = shalt.err (!%p4844_p0)
}
 0xb14   : > { %s4848_s23 = scalar_lea.hbm %s3594_s10, 128  ;;  %s4852_s17 = scalar_lea.hbm %s5788_s18, 256 }
 0xb15   : > { %p4849_p13 = scmp.ne.s32.totalorder %s3594_s10, %s4848_s23  ;;  %p4853_p2 = scmp.lt.s32.totalorder %s3594_s10, %s5788_s18 }
 0xb16   : > { %p4854_p11 = scmp.lt.s32.totalorder %s4852_s17, %s4848_s23 }
 0xb17   : > { %p4850_p12 = pnand %p4849_p13, %p5152_p9 }
 0xb18   : > { %p4855_p5 = por %p4854_p11, %p4853_p2 }
 0xb19   : > { %p4851_p8 = pneg %p4850_p12 }
 0xb1b   : > { %p4856_p6 = pnand %p4855_p5, %p4851_p8 }
 0xb1d   : > { %4859 = shalt.err (!%p4856_p6)
}
 0xb1e   : > { %4254 = dma.vmem_to_hbm [thread:$0]  (%p5152_p9), %s3597_s30, 128, %s3594_s10, %s3582_s8  }
 0xb1f PF: > { %s5789_s27 = sld [smem:[#allocation32_spill]]  ;;  %p5791_p4 = scmp.ne.s32.totalorder %s5765_s21, 0 }
 0xb20   : > { %s5790_s25 = sld [smem:[#allocation35_spill]] }
 0xb25   : > { %s3608_s24 = sand.u32 1, %s5789_s27  }
 0xb26   : > { %p5792_p10 = scmp.ge.s32.totalorder %s5790_s25, 2  ;;  %s3609_s15 = scalar_lea.sflag [#allocation6], %s3608_s24 }
 0xb28   : > { %p4292_p3 = pnand %p5792_p10, %p5791_p4 }
 0xb2a   : > { %p4293_p1 = pneg %p4292_p3 }
 0xb2c   : > { %4917 = dma.done.wait (%p4293_p1), %s3609_s15, 128  }
 0xb2d   : > { %4919 = vsyncadd (%p4293_p1), %s3609_s15, 4294967168  ;;  %s34_s30 = sadd.s32 1, %s5790_s25   ;;  %s5793_s14 = sld [smem:[#allocation33_spill]] }
 0xb2e   : > { %p31_p7 = scmp.ge.s32.totalorder %s34_s30, 4   ;;  %s5794_s27 = sld [smem:[#allocation37_spill]] }
 0xb2f   : > { %s5795_s1 = sld [smem:[#allocation36_spill]]  ;;  %s5796_s25 = smov %s4926_s26 }
 0xb30   : > { %s5798_s28 = smov %s4938_s29 }
 0xb31   :  { %33 = sbr.rel (!%p31_p7) target bundleno = 19 (0x13), region = 169 }
 0xb33   : > { %s5797_s26 = smov %s5793_s14 }
 0xb35   : > { %s5799_s29 = smov %s5795_s1 }
 0xb36   :  { %3614 = vsyncpa [#allocation5], 1 }
 0xb37   :  { %3616 = vsyncpa [#allocation5 + $0x1], 1 }
 0xb38   :  { %3617 = vsyncpa [#allocation8], 1 }
 0xb39   :  { %3618 = vsyncpa [#allocation12], 1 }
 0xb3a   :  { %3619 = vsyncpa [#allocation15], 1 }
 0xb3b   :  { %3620 = vsyncpa [#allocation18], 1 }
 0xb3c   :  { %3621 = vsyncpa [#allocation21], 1 }
 0xb3d   :  { %3622 = vsyncpa [#allocation6], 1 }
 0xb3e   :  { %3624 = vsyncpa [#allocation6 + $0x1], 1 }

</bundles_post_ra>
